<compile_context>
chip_gen: v7x
topology: tpu7x:2x2x1
jax: 0.10.0
libtpu: 0.0.40
codegen_flags: <defaults>
</compile_context>

<pallas_src>
import jax
import jax.numpy as jnp
import numpy as np
from jax.experimental import pallas as pl
from jax.experimental.pallas import tpu as pltpu


# ----------------------------------------------------------------------------
# Pallas kernel: one grid step == one (batch block, chunk of T timesteps).
# Recurrent hidden states persist across time chunks in a VMEM scratch buffer
# (the time axis is marked "arbitrary" -> strictly sequential per batch block).
# ----------------------------------------------------------------------------
def _gru_kernel(x_ref, h0_ref,
                wx0_ref, wxh_ref, whzr_ref, whg_ref,
                bzr_ref, bg_ref, wy_ref, by_ref,
                y_ref, hout_ref,
                h_scr):
    c = pl.program_id(1)                    # time-chunk index (sequential)
    L, TB, H = h_scr.shape
    T = x_ref.shape[1]
    Din = x_ref.shape[2]
    f32 = jnp.float32

    # Seed the persistent hidden-state scratch from h0 on the first chunk of
    # each batch block.
    @pl.when(c == 0)
    def _():
        h0 = h0_ref[...]                    # (TB, L, H)
        for i in range(L):
            h_scr[i] = h0[:, i, :]

    hs = [h_scr[i] for i in range(L)]       # carried states, (TB, H) each

    # Hoist weight loads / bf16->f32 upcasts out of the time loop.
    wx = [None] + [wxh_ref[i].astype(f32) for i in range(1, L)]   # (H, 3H)
    whzr = [whzr_ref[i].astype(f32) for i in range(L)]            # (H, 2H)
    whg = [whg_ref[i].astype(f32) for i in range(L)]              # (H, H)
    bzr = [bzr_ref[i] for i in range(L)]                          # (1, 2H)
    bg = [bg_ref[i] for i in range(L)]                            # (1, H)
    wy = wy_ref[...].astype(f32)                                  # (H, O)
    by = by_ref[...]                                              # (1, O)

    # Layer-0 input projection for the whole chunk in one wide matmul
    # (the input term has no recurrence): (TB*T, Din) @ (Din, 3H).
    x_flat = x_ref[...].reshape(TB * T, Din)
    px0 = jnp.dot(x_flat, wx0_ref[...].astype(f32),
                  preferred_element_type=f32).reshape(TB, T, 3 * H)

    ys = []
    for t in range(T):                      # static unroll: sequential recurrence
        px = px0[:, t, :]                   # (TB, 3H) layer-0 pre-activation
        for i in range(L):
            h = hs[i]
            if i > 0:
                # input to layer i is the already-updated state of layer i-1
                px = jnp.dot(hs[i - 1], wx[i], preferred_element_type=f32)
            # fused [z | r] pre-activation
            zr = px[:, :2 * H] + jnp.dot(h, whzr[i],
                                         preferred_element_type=f32) + bzr[i]
            z = jax.nn.sigmoid(zr[:, :H])
            r = jax.nn.sigmoid(zr[:, H:])
            g = jnp.tanh(px[:, 2 * H:]
                         + jnp.dot(r * h, whg[i], preferred_element_type=f32)
                         + bg[i])
            hs[i] = g + z * (h - g)         # == h*z + (1-z)*g
        ys.append(jnp.dot(hs[-1], wy, preferred_element_type=f32) + by)

    # Persist recurrent state for the next chunk.
    for i in range(L):
        h_scr[i] = hs[i]

    # One lane-dense store of the whole y chunk, directly in (B, S, O) layout.
    y_ref[...] = jnp.stack(ys, axis=1).astype(y_ref.dtype)

    # Final hidden state: written exactly once, on the last chunk.
    @pl.when(c == pl.num_programs(1) - 1)
    def _():
        hout_ref[...] = jnp.stack(hs, axis=1).astype(hout_ref.dtype)


# ----------------------------------------------------------------------------
# Wrapper: layout glue + pallas_call.
# ----------------------------------------------------------------------------
def _pick_time_chunk(S, max_chunk=32):
    # T must divide S and be (a multiple of 8) or (== S) to satisfy the
    # (8, 128) block-shape rule on the second-to-last dim of the x/y blocks.
    for t in range(min(max_chunk, S), 0, -1):
        if S % t == 0 and (t % 8 == 0 or t == S):
            return t
    return S


def multilayer_gru_forward(x, h0, params):
    """x: (B, S, I) f32, h0: (B, L, H) f32 or None.  Returns (y, h_final)."""
    (wx0, wxh, whzr, whg, bzr, bg, wy, by,
     in_dim, h_dim, out_dim, n_layers) = params
    B, S, I = x.shape
    assert I == in_dim
    L, H, O = n_layers, h_dim, out_dim

    if h0 is None:
        h0 = jnp.zeros((B, L, H), jnp.float32)

    T = _pick_time_chunk(S)
    # Split the batch into blocks so large batches can use both v7x
    # TensorCores (parallel axis); tiny batches stay as a single block.
    TB = B if (B < 16 or B % 2) else B // 2
    NB, NC = B // TB, S // T

    full = lambda a: pl.BlockSpec(a.shape, lambda b, c: (0,) * a.ndim)

    # Explicit VMEM budget: weights + double-buffered x/y chunks + scratch.
    weight_bytes = sum(int(a.size) * a.dtype.itemsize
                       for a in (wx0, wxh, whzr, whg, bzr, bg, wy, by))
    stream_bytes = 2 * TB * T * (I + O) * 4 + 2 * TB * L * H * 4
    vmem_limit = int(max(32 * 2**20,
                         min(64 * 2**20, 4 * (weight_bytes + stream_bytes))))

    y, h_final = pl.pallas_call(
        _gru_kernel,
        out_shape=(jax.ShapeDtypeStruct((B, S, O), jnp.float32),
                   jax.ShapeDtypeStruct((B, L, H), jnp.float32)),
        grid_spec=pltpu.PrefetchScalarGridSpec(
            num_scalar_prefetch=0,
            grid=(NB, NC),
            in_specs=[
                pl.BlockSpec((TB, T, I), lambda b, c: (b, c, 0)),   # x chunk
                pl.BlockSpec((TB, L, H), lambda b, c: (b, 0, 0)),   # h0
                full(wx0),                                          # (Din, 3H)
                full(wxh),                                          # (L, H, 3H)
                full(whzr),                                         # (L, H, 2H)
                full(whg),                                          # (L, H, H)
                full(bzr), full(bg),                                # biases
                full(wy), full(by),                                 # output head
            ],
            out_specs=[
                pl.BlockSpec((TB, T, O), lambda b, c: (b, c, 0)),   # y chunk
                pl.BlockSpec((TB, L, H), lambda b, c: (b, 0, 0)),   # h final
            ],
            scratch_shapes=[pltpu.VMEM((L, TB, H), jnp.float32)],
        ),
        compiler_params=pltpu.CompilerParams(
            dimension_semantics=("parallel", "arbitrary"),
            vmem_limit_bytes=vmem_limit),
    )(x, h0, wx0, wxh, whzr, whg, bzr, bg, wy, by)
    return y, h_final


# ----------------------------------------------------------------------------
# Deterministic parameter construction (mirrors MultilayerGRU.__init__ shapes;
# weights stored transposed as (in, out) so the kernel does x @ W).
# Weights are rounded to bf16 (storage dtype in the kernel); the reference
# uses the same rounded values so the comparison is exact up to f32 matmul
# reduction order.
# ----------------------------------------------------------------------------
def make_params(key, in_dim, h_dim, out_dim, n_layers):
    L, H, O = n_layers, h_dim, out_dim

    def init(k, shape):
        return jax.random.normal(k, shape, jnp.float32) * 0.1

    def round_bf16(w):
        return w.astype(jnp.bfloat16).astype(jnp.float32)

    keys = iter(jax.random.split(key, 9 * n_layers + 2))
    wx0 = None
    wxh = jnp.zeros((L, H, 3 * H), jnp.float32)     # index 0 unused
    whzr = jnp.zeros((L, H, 2 * H), jnp.float32)
    whg = jnp.zeros((L, H, H), jnp.float32)
    bzr = jnp.zeros((L, 1, 2 * H), jnp.float32)
    bg = jnp.zeros((L, 1, H), jnp.float32)
    raw_layers = []
    for i in range(L):
        lin = in_dim if i == 0 else H
        wxz_i = round_bf16(init(next(keys), (lin, H)))
        wxr_i = round_bf16(init(next(keys), (lin, H)))
        wxg_i = round_bf16(init(next(keys), (lin, H)))
        whz_i = round_bf16(init(next(keys), (H, H)))
        whr_i = round_bf16(init(next(keys), (H, H)))
        whg_i = round_bf16(init(next(keys), (H, H)))
        bz_i = init(next(keys), (H,))
        br_i = init(next(keys), (H,))
        bg_i = init(next(keys), (H,))
        raw_layers.append((wxz_i, wxr_i, wxg_i, whz_i, whr_i, whg_i,
                           bz_i, br_i, bg_i))
        wx_i = jnp.concatenate([wxz_i, wxr_i, wxg_i], axis=1)   # (lin, 3H)
        if i == 0:
            wx0 = wx_i
        else:
            wxh = wxh.at[i].set(wx_i)
        whzr = whzr.at[i].set(jnp.concatenate([whz_i, whr_i], axis=1))
        whg = whg.at[i].set(whg_i)
        bzr = bzr.at[i, 0].set(jnp.concatenate([bz_i, br_i]))
        bg = bg.at[i, 0].set(bg_i)
    wy_f = round_bf16(init(next(keys), (H, O)))
    by = init(next(keys), (O,))

    packed = (wx0.astype(jnp.bfloat16), wxh.astype(jnp.bfloat16),
              whzr.astype(jnp.bfloat16), whg.astype(jnp.bfloat16),
              bzr, bg, wy_f.astype(jnp.bfloat16), by.reshape(1, O),
              in_dim, h_dim, out_dim, n_layers)
    return packed, raw_layers, wy_f, by


# ----------------------------------------------------------------------------
# Pure-JAX reference (direct transcription of the PyTorch forward).
# ----------------------------------------------------------------------------
def reference_forward(x, h0, raw_layers, wy, by):
    B, S, _ = x.shape
    L = len(raw_layers)
    h = [h0[:, i, :] for i in range(L)]
    ys = []
    for s in range(S):
        xs = x[:, s, :]
        for i, (wxz_i, wxr_i, wxg_i, whz_i, whr_i, whg_i,
                bz_i, br_i, bg_i) in enumerate(raw_layers):
            cur_in = xs if i == 0 else h[i - 1]
            hi = h[i]
            r = jax.nn.sigmoid(cur_in @ wxr_i + hi @ whr_i + br_i)
            z = jax.nn.sigmoid(cur_in @ wxz_i + hi @ whz_i + bz_i)
            g = jnp.tanh(cur_in @ wxg_i + (r * hi) @ whg_i + bg_i)
            h[i] = hi * z + (1.0 - z) * g
        ys.append(h[-1] @ wy + by)
    return jnp.stack(ys, axis=1), jnp.stack(h, axis=1)


if __name__ == "__main__":
    B, S = 2, 8
    in_dim, h_dim, out_dim, n_layers = 16, 32, 16, 2   # out_dim == in_dim (torch y buffer)
    assert out_dim == in_dim

    key = jax.random.PRNGKey(0)
    kx, kh, kp = jax.random.split(key, 3)
    x = jax.random.normal(kx, (B, S, in_dim), jnp.float32)
    h0 = jax.random.normal(kh, (B, n_layers, h_dim), jnp.float32) * 0.1

    params, raw_layers, wy, by = make_params(kp, in_dim, h_dim, out_dim, n_layers)

    y, h_final = multilayer_gru_forward(x, h0, params)
    jax.block_until_ready((y, h_final))

    y_ref, h_ref = reference_forward(x, h0, raw_layers, wy, by)
    np.testing.assert_allclose(np.asarray(y), np.asarray(y_ref),
                               rtol=1e-5, atol=1e-5)
    np.testing.assert_allclose(np.asarray(h_final), np.asarray(h_ref),
                               rtol=1e-5, atol=1e-5)
    print("KERNEL_OK")
</pallas_src>

<mosaic_0001>
module attributes {stable_mosaic.version = 11 : i64} {
  func.func @_gru_kernel(%arg0: i32, %arg1: i32, %arg2: memref<2x8x16xf32, #tpu.memory_space<vmem>>, %arg3: memref<2x2x32xf32, #tpu.memory_space<vmem>>, %arg4: memref<16x96xbf16, #tpu.memory_space<vmem>>, %arg5: memref<2x32x96xbf16, #tpu.memory_space<vmem>>, %arg6: memref<2x32x64xbf16, #tpu.memory_space<vmem>>, %arg7: memref<2x32x32xbf16, #tpu.memory_space<vmem>>, %arg8: memref<2x1x64xf32, #tpu.memory_space<vmem>>, %arg9: memref<2x1x32xf32, #tpu.memory_space<vmem>>, %arg10: memref<32x16xbf16, #tpu.memory_space<vmem>>, %arg11: memref<1x16xf32, #tpu.memory_space<vmem>>, %arg12: memref<2x8x16xf32, #tpu.memory_space<vmem>>, %arg13: memref<2x2x32xf32, #tpu.memory_space<vmem>>, %arg14: memref<2x2x32xf32, #tpu.memory_space<vmem>>) attributes {dimension_semantics = [#tpu.dimension_semantics<parallel>, #tpu.dimension_semantics<arbitrary>], iteration_bounds = array<i64: 1, 1>, scalar_prefetch = 0 : i64, scratch_operands = 1 : i64, tpu.core_type = #tpu.core_type<tc>, window_params = [{transform_indices = @transform_0, window_bounds = array<i64: 2, 8, 16>}, {transform_indices = @transform_1, window_bounds = array<i64: 2, 2, 32>}, {pipeline_mode = #tpu.pipeline_mode<synchronous>, transform_indices = @transform_2, window_bounds = array<i64: 16, 96>}, {pipeline_mode = #tpu.pipeline_mode<synchronous>, transform_indices = @transform_3, window_bounds = array<i64: 2, 32, 96>}, {pipeline_mode = #tpu.pipeline_mode<synchronous>, transform_indices = @transform_4, window_bounds = array<i64: 2, 32, 64>}, {pipeline_mode = #tpu.pipeline_mode<synchronous>, transform_indices = @transform_5, window_bounds = array<i64: 2, 32, 32>}, {pipeline_mode = #tpu.pipeline_mode<synchronous>, transform_indices = @transform_6, window_bounds = array<i64: 2, 1, 64>}, {pipeline_mode = #tpu.pipeline_mode<synchronous>, transform_indices = @transform_7, window_bounds = array<i64: 2, 1, 32>}, {pipeline_mode = #tpu.pipeline_mode<synchronous>, transform_indices = @transform_8, window_bounds = array<i64: 32, 16>}, {pipeline_mode = #tpu.pipeline_mode<synchronous>, transform_indices = @transform_9, window_bounds = array<i64: 1, 16>}, {transform_indices = @transform_10, window_bounds = array<i64: 2, 8, 16>}, {transform_indices = @transform_11, window_bounds = array<i64: 2, 2, 32>}]} {
    %c0_i32 = arith.constant 0 : i32
    %0 = arith.cmpi eq, %arg1, %c0_i32 : i32
    %1 = arith.extui %0 : i1 to i32
    %c0_i32_0 = arith.constant 0 : i32
    %2 = arith.cmpi ne, %1, %c0_i32_0 : i32
    scf.if %2 {
      %c0_132 = arith.constant 0 : index
      %c0_133 = arith.constant 0 : index
      %c0_134 = arith.constant 0 : index
      %538 = vector.load %arg3[%c0_132, %c0_133, %c0_134] : memref<2x2x32xf32, #tpu.memory_space<vmem>>, vector<2x2x32xf32>
      %539 = vector.extract_strided_slice %538 {offsets = [0, 0, 0], sizes = [2, 1, 32], strides = [1, 1, 1]} : vector<2x2x32xf32> to vector<2x1x32xf32>
      %540 = vector.shape_cast %539 : vector<2x1x32xf32> to vector<2x32xf32>
      %c0_135 = arith.constant 0 : index
      %c0_136 = arith.constant 0 : index
      %c0_137 = arith.constant 0 : index
      %541 = vector.load %arg14[%c0_135, %c0_136, %c0_137] : memref<2x2x32xf32, #tpu.memory_space<vmem>>, vector<1x2x32xf32>
      %542 = vector.shape_cast %541 : vector<1x2x32xf32> to vector<2x32xf32>
      %543 = vector.shape_cast %540 : vector<2x32xf32> to vector<1x2x32xf32>
      tpu.vector_store %arg14[%c0_135, %c0_136, %c0_137], %543 {strides = array<i32>} : memref<2x2x32xf32, #tpu.memory_space<vmem>>, vector<1x2x32xf32>,
      %544 = vector.extract_strided_slice %538 {offsets = [0, 1, 0], sizes = [2, 1, 32], strides = [1, 1, 1]} : vector<2x2x32xf32> to vector<2x1x32xf32>
      %545 = vector.shape_cast %544 : vector<2x1x32xf32> to vector<2x32xf32>
      %c1_138 = arith.constant 1 : index
      %c0_139 = arith.constant 0 : index
      %c0_140 = arith.constant 0 : index
      %546 = vector.load %arg14[%c1_138, %c0_139, %c0_140] : memref<2x2x32xf32, #tpu.memory_space<vmem>>, vector<1x2x32xf32>
      %547 = vector.shape_cast %546 : vector<1x2x32xf32> to vector<2x32xf32>
      %548 = vector.shape_cast %545 : vector<2x32xf32> to vector<1x2x32xf32>
      tpu.vector_store %arg14[%c1_138, %c0_139, %c0_140], %548 {strides = array<i32>} : memref<2x2x32xf32, #tpu.memory_space<vmem>>, vector<1x2x32xf32>,
    } else {
    }
    %c0 = arith.constant 0 : index
    %c0_1 = arith.constant 0 : index
    %c0_2 = arith.constant 0 : index
    %3 = vector.load %arg14[%c0, %c0_1, %c0_2] : memref<2x2x32xf32, #tpu.memory_space<vmem>>, vector<1x2x32xf32>
    %4 = vector.shape_cast %3 : vector<1x2x32xf32> to vector<2x32xf32>
    %c1 = arith.constant 1 : index
    %c0_3 = arith.constant 0 : index
    %c0_4 = arith.constant 0 : index
    %5 = vector.load %arg14[%c1, %c0_3, %c0_4] : memref<2x2x32xf32, #tpu.memory_space<vmem>>, vector<1x2x32xf32>
    %6 = vector.shape_cast %5 : vector<1x2x32xf32> to vector<2x32xf32>
    %c1_5 = arith.constant 1 : index
    %c0_6 = arith.constant 0 : index
    %c0_7 = arith.constant 0 : index
    %7 = vector.load %arg5[%c1_5, %c0_6, %c0_7] : memref<2x32x96xbf16, #tpu.memory_space<vmem>>, vector<1x32x96xbf16>
    %8 = vector.shape_cast %7 : vector<1x32x96xbf16> to vector<32x96xbf16>
    %9 = arith.extf %8 : vector<32x96xbf16> to vector<32x96xf32>
    %c0_8 = arith.constant 0 : index
    %c0_9 = arith.constant 0 : index
    %c0_10 = arith.constant 0 : index
    %10 = vector.load %arg6[%c0_8, %c0_9, %c0_10] : memref<2x32x64xbf16, #tpu.memory_space<vmem>>, vector<1x32x64xbf16>
    %11 = vector.shape_cast %10 : vector<1x32x64xbf16> to vector<32x64xbf16>
    %12 = arith.extf %11 : vector<32x64xbf16> to vector<32x64xf32>
    %c1_11 = arith.constant 1 : index
    %c0_12 = arith.constant 0 : index
    %c0_13 = arith.constant 0 : index
    %13 = vector.load %arg6[%c1_11, %c0_12, %c0_13] : memref<2x32x64xbf16, #tpu.memory_space<vmem>>, vector<1x32x64xbf16>
    %14 = vector.shape_cast %13 : vector<1x32x64xbf16> to vector<32x64xbf16>
    %15 = arith.extf %14 : vector<32x64xbf16> to vector<32x64xf32>
    %c0_14 = arith.constant 0 : index
    %c0_15 = arith.constant 0 : index
    %c0_16 = arith.constant 0 : index
    %16 = vector.load %arg7[%c0_14, %c0_15, %c0_16] : memref<2x32x32xbf16, #tpu.memory_space<vmem>>, vector<1x32x32xbf16>
    %17 = vector.shape_cast %16 : vector<1x32x32xbf16> to vector<32x32xbf16>
    %18 = arith.extf %17 : vector<32x32xbf16> to vector<32x32xf32>
    %c1_17 = arith.constant 1 : index
    %c0_18 = arith.constant 0 : index
    %c0_19 = arith.constant 0 : index
    %19 = vector.load %arg7[%c1_17, %c0_18, %c0_19] : memref<2x32x32xbf16, #tpu.memory_space<vmem>>, vector<1x32x32xbf16>
    %20 = vector.shape_cast %19 : vector<1x32x32xbf16> to vector<32x32xbf16>
    %21 = arith.extf %20 : vector<32x32xbf16> to vector<32x32xf32>
    %c0_20 = arith.constant 0 : index
    %c0_21 = arith.constant 0 : index
    %c0_22 = arith.constant 0 : index
    %22 = vector.load %arg8[%c0_20, %c0_21, %c0_22] : memref<2x1x64xf32, #tpu.memory_space<vmem>>, vector<1x1x64xf32>
    %23 = vector.shape_cast %22 : vector<1x1x64xf32> to vector<1x64xf32>
    %c1_23 = arith.constant 1 : index
    %c0_24 = arith.constant 0 : index
    %c0_25 = arith.constant 0 : index
    %24 = vector.load %arg8[%c1_23, %c0_24, %c0_25] : memref<2x1x64xf32, #tpu.memory_space<vmem>>, vector<1x1x64xf32>
    %25 = vector.shape_cast %24 : vector<1x1x64xf32> to vector<1x64xf32>
    %c0_26 = arith.constant 0 : index
    %c0_27 = arith.constant 0 : index
    %c0_28 = arith.constant 0 : index
    %26 = vector.load %arg9[%c0_26, %c0_27, %c0_28] : memref<2x1x32xf32, #tpu.memory_space<vmem>>, vector<1x1x32xf32>
    %27 = vector.shape_cast %26 : vector<1x1x32xf32> to vector<1x32xf32>
    %c1_29 = arith.constant 1 : index
    %c0_30 = arith.constant 0 : index
    %c0_31 = arith.constant 0 : index
    %28 = vector.load %arg9[%c1_29, %c0_30, %c0_31] : memref<2x1x32xf32, #tpu.memory_space<vmem>>, vector<1x1x32xf32>
    %29 = vector.shape_cast %28 : vector<1x1x32xf32> to vector<1x32xf32>
    %c0_32 = arith.constant 0 : index
    %c0_33 = arith.constant 0 : index
    %30 = vector.load %arg10[%c0_32, %c0_33] : memref<32x16xbf16, #tpu.memory_space<vmem>>, vector<32x16xbf16>
    %31 = arith.extf %30 : vector<32x16xbf16> to vector<32x16xf32>
    %c0_34 = arith.constant 0 : index
    %c0_35 = arith.constant 0 : index
    %32 = vector.load %arg11[%c0_34, %c0_35] : memref<1x16xf32, #tpu.memory_space<vmem>>, vector<1x16xf32>
    %c0_36 = arith.constant 0 : index
    %c0_37 = arith.constant 0 : index
    %c0_38 = arith.constant 0 : index
    %33 = vector.load %arg2[%c0_36, %c0_37, %c0_38] : memref<2x8x16xf32, #tpu.memory_space<vmem>>, vector<2x8x16xf32>
    %34 = vector.shape_cast %33 : vector<2x8x16xf32> to vector<16x16xf32>
    %c0_39 = arith.constant 0 : index
    %c0_40 = arith.constant 0 : index
    %35 = vector.load %arg4[%c0_39, %c0_40] : memref<16x96xbf16, #tpu.memory_space<vmem>>, vector<16x96xbf16>
    %36 = arith.extf %35 : vector<16x96xbf16> to vector<16x96xf32>
    %cst = arith.constant dense<0.000000e+00> : vector<16x96xf32>
    %37 = tpu.matmul %34, %36, %cst {dimension_numbers = #tpu.dot_dimension_numbers<[1], [0], [0], [1], [0, 0, 1, 1], [], []>} : vector<16x16xf32>, vector<16x96xf32>, vector<16x96xf32> -> vector<16x96xf32>
    %38 = vector.shape_cast %37 : vector<16x96xf32> to vector<2x8x96xf32>
    %39 = vector.extract_strided_slice %38 {offsets = [0, 0, 0], sizes = [2, 1, 96], strides = [1, 1, 1]} : vector<2x8x96xf32> to vector<2x1x96xf32>
    %40 = vector.shape_cast %39 : vector<2x1x96xf32> to vector<2x96xf32>
    %41 = vector.extract_strided_slice %40 {offsets = [0, 0], sizes = [2, 64], strides = [1, 1]} : vector<2x96xf32> to vector<2x64xf32>
    %cst_41 = arith.constant dense<0.000000e+00> : vector<2x64xf32>
    %42 = tpu.matmul %4, %12, %cst_41 {dimension_numbers = #tpu.dot_dimension_numbers<[1], [0], [0], [1], [0, 0, 1, 1], [], []>} : vector<2x32xf32>, vector<32x64xf32>, vector<2x64xf32> -> vector<2x64xf32>
    %43 = arith.addf %41, %42 : vector<2x64xf32>
    %44 = vector.broadcast %23 : vector<1x64xf32> to vector<2x64xf32>
    %45 = arith.addf %43, %44 : vector<2x64xf32>
    %46 = vector.extract_strided_slice %45 {offsets = [0, 0], sizes = [2, 32], strides = [1, 1]} : vector<2x64xf32> to vector<2x32xf32>
    %47 = arith.negf %46 : vector<2x32xf32>
    %48 = math.exp %47 : vector<2x32xf32>
    %cst_42 = arith.constant 1.000000e+00 : f32
    %49 = vector.broadcast %cst_42 : f32 to vector<2x32xf32>
    %50 = arith.addf %49, %48 : vector<2x32xf32>
    %51 = arith.divf %49, %50 : vector<2x32xf32>
    %52 = vector.extract_strided_slice %45 {offsets = [0, 32], sizes = [2, 32], strides = [1, 1]} : vector<2x64xf32> to vector<2x32xf32>
    %53 = arith.negf %52 : vector<2x32xf32>
    %54 = math.exp %53 : vector<2x32xf32>
    %cst_43 = arith.constant 1.000000e+00 : f32
    %55 = vector.broadcast %cst_43 : f32 to vector<2x32xf32>
    %56 = arith.addf %55, %54 : vector<2x32xf32>
    %57 = arith.divf %55, %56 : vector<2x32xf32>
    %58 = vector.extract_strided_slice %40 {offsets = [0, 64], sizes = [2, 32], strides = [1, 1]} : vector<2x96xf32> to vector<2x32xf32>
    %59 = arith.mulf %57, %4 : vector<2x32xf32>
    %cst_44 = arith.constant dense<0.000000e+00> : vector<2x32xf32>
    %60 = tpu.matmul %59, %18, %cst_44 {dimension_numbers = #tpu.dot_dimension_numbers<[1], [0], [0], [1], [0, 0, 1, 1], [], []>} : vector<2x32xf32>, vector<32x32xf32>, vector<2x32xf32> -> vector<2x32xf32>
    %61 = arith.addf %58, %60 : vector<2x32xf32>
    %62 = vector.broadcast %27 : vector<1x32xf32> to vector<2x32xf32>
    %63 = arith.addf %61, %62 : vector<2x32xf32>
    %64 = math.tanh %63 : vector<2x32xf32>
    %65 = arith.subf %4, %64 : vector<2x32xf32>
    %66 = arith.mulf %51, %65 : vector<2x32xf32>
    %67 = arith.addf %64, %66 : vector<2x32xf32>
    %cst_45 = arith.constant dense<0.000000e+00> : vector<2x96xf32>
    %68 = tpu.matmul %67, %9, %cst_45 {dimension_numbers = #tpu.dot_dimension_numbers<[1], [0], [0], [1], [0, 0, 1, 1], [], []>} : vector<2x32xf32>, vector<32x96xf32>, vector<2x96xf32> -> vector<2x96xf32>
    %69 = vector.extract_strided_slice %68 {offsets = [0, 0], sizes = [2, 64], strides = [1, 1]} : vector<2x96xf32> to vector<2x64xf32>
    %cst_46 = arith.constant dense<0.000000e+00> : vector<2x64xf32>
    %70 = tpu.matmul %6, %15, %cst_46 {dimension_numbers = #tpu.dot_dimension_numbers<[1], [0], [0], [1], [0, 0, 1, 1], [], []>} : vector<2x32xf32>, vector<32x64xf32>, vector<2x64xf32> -> vector<2x64xf32>
    %71 = arith.addf %69, %70 : vector<2x64xf32>
    %72 = vector.broadcast %25 : vector<1x64xf32> to vector<2x64xf32>
    %73 = arith.addf %71, %72 : vector<2x64xf32>
    %74 = vector.extract_strided_slice %73 {offsets = [0, 0], sizes = [2, 32], strides = [1, 1]} : vector<2x64xf32> to vector<2x32xf32>
    %75 = arith.negf %74 : vector<2x32xf32>
    %76 = math.exp %75 : vector<2x32xf32>
    %cst_47 = arith.constant 1.000000e+00 : f32
    %77 = vector.broadcast %cst_47 : f32 to vector<2x32xf32>
    %78 = arith.addf %77, %76 : vector<2x32xf32>
    %79 = arith.divf %77, %78 : vector<2x32xf32>
    %80 = vector.extract_strided_slice %73 {offsets = [0, 32], sizes = [2, 32], strides = [1, 1]} : vector<2x64xf32> to vector<2x32xf32>
    %81 = arith.negf %80 : vector<2x32xf32>
    %82 = math.exp %81 : vector<2x32xf32>
    %cst_48 = arith.constant 1.000000e+00 : f32
    %83 = vector.broadcast %cst_48 : f32 to vector<2x32xf32>
    %84 = arith.addf %83, %82 : vector<2x32xf32>
    %85 = arith.divf %83, %84 : vector<2x32xf32>
    %86 = vector.extract_strided_slice %68 {offsets = [0, 64], sizes = [2, 32], strides = [1, 1]} : vector<2x96xf32> to vector<2x32xf32>
    %87 = arith.mulf %85, %6 : vector<2x32xf32>
    %cst_49 = arith.constant dense<0.000000e+00> : vector<2x32xf32>
    %88 = tpu.matmul %87, %21, %cst_49 {dimension_numbers = #tpu.dot_dimension_numbers<[1], [0], [0], [1], [0, 0, 1, 1], [], []>} : vector<2x32xf32>, vector<32x32xf32>, vector<2x32xf32> -> vector<2x32xf32>
    %89 = arith.addf %86, %88 : vector<2x32xf32>
    %90 = vector.broadcast %29 : vector<1x32xf32> to vector<2x32xf32>
    %91 = arith.addf %89, %90 : vector<2x32xf32>
    %92 = math.tanh %91 : vector<2x32xf32>
    %93 = arith.subf %6, %92 : vector<2x32xf32>
    %94 = arith.mulf %79, %93 : vector<2x32xf32>
    %95 = arith.addf %92, %94 : vector<2x32xf32>
    %cst_50 = arith.constant dense<0.000000e+00> : vector<2x16xf32>
    %96 = tpu.matmul %95, %31, %cst_50 {dimension_numbers = #tpu.dot_dimension_numbers<[1], [0], [0], [1], [0, 0, 1, 1], [], []>} : vector<2x32xf32>, vector<32x16xf32>, vector<2x16xf32> -> vector<2x16xf32>
    %97 = vector.broadcast %32 : vector<1x16xf32> to vector<2x16xf32>
    %98 = arith.addf %96, %97 : vector<2x16xf32>
    %99 = vector.extract_strided_slice %38 {offsets = [0, 1, 0], sizes = [2, 1, 96], strides = [1, 1, 1]} : vector<2x8x96xf32> to vector<2x1x96xf32>
    %100 = vector.shape_cast %99 : vector<2x1x96xf32> to vector<2x96xf32>
    %101 = vector.extract_strided_slice %100 {offsets = [0, 0], sizes = [2, 64], strides = [1, 1]} : vector<2x96xf32> to vector<2x64xf32>
    %cst_51 = arith.constant dense<0.000000e+00> : vector<2x64xf32>
    %102 = tpu.matmul %67, %12, %cst_51 {dimension_numbers = #tpu.dot_dimension_numbers<[1], [0], [0], [1], [0, 0, 1, 1], [], []>} : vector<2x32xf32>, vector<32x64xf32>, vector<2x64xf32> -> vector<2x64xf32>
    %103 = arith.addf %101, %102 : vector<2x64xf32>
    %104 = vector.broadcast %23 : vector<1x64xf32> to vector<2x64xf32>
    %105 = arith.addf %103, %104 : vector<2x64xf32>
    %106 = vector.extract_strided_slice %105 {offsets = [0, 0], sizes = [2, 32], strides = [1, 1]} : vector<2x64xf32> to vector<2x32xf32>
    %107 = arith.negf %106 : vector<2x32xf32>
    %108 = math.exp %107 : vector<2x32xf32>
    %cst_52 = arith.constant 1.000000e+00 : f32
    %109 = vector.broadcast %cst_52 : f32 to vector<2x32xf32>
    %110 = arith.addf %109, %108 : vector<2x32xf32>
    %111 = arith.divf %109, %110 : vector<2x32xf32>
    %112 = vector.extract_strided_slice %105 {offsets = [0, 32], sizes = [2, 32], strides = [1, 1]} : vector<2x64xf32> to vector<2x32xf32>
    %113 = arith.negf %112 : vector<2x32xf32>
    %114 = math.exp %113 : vector<2x32xf32>
    %cst_53 = arith.constant 1.000000e+00 : f32
    %115 = vector.broadcast %cst_53 : f32 to vector<2x32xf32>
    %116 = arith.addf %115, %114 : vector<2x32xf32>
    %117 = arith.divf %115, %116 : vector<2x32xf32>
    %118 = vector.extract_strided_slice %100 {offsets = [0, 64], sizes = [2, 32], strides = [1, 1]} : vector<2x96xf32> to vector<2x32xf32>
    %119 = arith.mulf %117, %67 : vector<2x32xf32>
    %cst_54 = arith.constant dense<0.000000e+00> : vector<2x32xf32>
    %120 = tpu.matmul %119, %18, %cst_54 {dimension_numbers = #tpu.dot_dimension_numbers<[1], [0], [0], [1], [0, 0, 1, 1], [], []>} : vector<2x32xf32>, vector<32x32xf32>, vector<2x32xf32> -> vector<2x32xf32>
    %121 = arith.addf %118, %120 : vector<2x32xf32>
    %122 = vector.broadcast %27 : vector<1x32xf32> to vector<2x32xf32>
    %123 = arith.addf %121, %122 : vector<2x32xf32>
    %124 = math.tanh %123 : vector<2x32xf32>
    %125 = arith.subf %67, %124 : vector<2x32xf32>
    %126 = arith.mulf %111, %125 : vector<2x32xf32>
    %127 = arith.addf %124, %126 : vector<2x32xf32>
    %cst_55 = arith.constant dense<0.000000e+00> : vector<2x96xf32>
    %128 = tpu.matmul %127, %9, %cst_55 {dimension_numbers = #tpu.dot_dimension_numbers<[1], [0], [0], [1], [0, 0, 1, 1], [], []>} : vector<2x32xf32>, vector<32x96xf32>, vector<2x96xf32> -> vector<2x96xf32>
    %129 = vector.extract_strided_slice %128 {offsets = [0, 0], sizes = [2, 64], strides = [1, 1]} : vector<2x96xf32> to vector<2x64xf32>
    %cst_56 = arith.constant dense<0.000000e+00> : vector<2x64xf32>
    %130 = tpu.matmul %95, %15, %cst_56 {dimension_numbers = #tpu.dot_dimension_numbers<[1], [0], [0], [1], [0, 0, 1, 1], [], []>} : vector<2x32xf32>, vector<32x64xf32>, vector<2x64xf32> -> vector<2x64xf32>
    %131 = arith.addf %129, %130 : vector<2x64xf32>
    %132 = vector.broadcast %25 : vector<1x64xf32> to vector<2x64xf32>
    %133 = arith.addf %131, %132 : vector<2x64xf32>
    %134 = vector.extract_strided_slice %133 {offsets = [0, 0], sizes = [2, 32], strides = [1, 1]} : vector<2x64xf32> to vector<2x32xf32>
    %135 = arith.negf %134 : vector<2x32xf32>
    %136 = math.exp %135 : vector<2x32xf32>
    %cst_57 = arith.constant 1.000000e+00 : f32
    %137 = vector.broadcast %cst_57 : f32 to vector<2x32xf32>
    %138 = arith.addf %137, %136 : vector<2x32xf32>
    %139 = arith.divf %137, %138 : vector<2x32xf32>
    %140 = vector.extract_strided_slice %133 {offsets = [0, 32], sizes = [2, 32], strides = [1, 1]} : vector<2x64xf32> to vector<2x32xf32>
    %141 = arith.negf %140 : vector<2x32xf32>
    %142 = math.exp %141 : vector<2x32xf32>
    %cst_58 = arith.constant 1.000000e+00 : f32
    %143 = vector.broadcast %cst_58 : f32 to vector<2x32xf32>
    %144 = arith.addf %143, %142 : vector<2x32xf32>
    %145 = arith.divf %143, %144 : vector<2x32xf32>
    %146 = vector.extract_strided_slice %128 {offsets = [0, 64], sizes = [2, 32], strides = [1, 1]} : vector<2x96xf32> to vector<2x32xf32>
    %147 = arith.mulf %145, %95 : vector<2x32xf32>
    %cst_59 = arith.constant dense<0.000000e+00> : vector<2x32xf32>
    %148 = tpu.matmul %147, %21, %cst_59 {dimension_numbers = #tpu.dot_dimension_numbers<[1], [0], [0], [1], [0, 0, 1, 1], [], []>} : vector<2x32xf32>, vector<32x32xf32>, vector<2x32xf32> -> vector<2x32xf32>
    %149 = arith.addf %146, %148 : vector<2x32xf32>
    %150 = vector.broadcast %29 : vector<1x32xf32> to vector<2x32xf32>
    %151 = arith.addf %149, %150 : vector<2x32xf32>
    %152 = math.tanh %151 : vector<2x32xf32>
    %153 = arith.subf %95, %152 : vector<2x32xf32>
    %154 = arith.mulf %139, %153 : vector<2x32xf32>
    %155 = arith.addf %152, %154 : vector<2x32xf32>
    %cst_60 = arith.constant dense<0.000000e+00> : vector<2x16xf32>
    %156 = tpu.matmul %155, %31, %cst_60 {dimension_numbers = #tpu.dot_dimension_numbers<[1], [0], [0], [1], [0, 0, 1, 1], [], []>} : vector<2x32xf32>, vector<32x16xf32>, vector<2x16xf32> -> vector<2x16xf32>
    %157 = vector.broadcast %32 : vector<1x16xf32> to vector<2x16xf32>
    %158 = arith.addf %156, %157 : vector<2x16xf32>
    %159 = vector.extract_strided_slice %38 {offsets = [0, 2, 0], sizes = [2, 1, 96], strides = [1, 1, 1]} : vector<2x8x96xf32> to vector<2x1x96xf32>
    %160 = vector.shape_cast %159 : vector<2x1x96xf32> to vector<2x96xf32>
    %161 = vector.extract_strided_slice %160 {offsets = [0, 0], sizes = [2, 64], strides = [1, 1]} : vector<2x96xf32> to vector<2x64xf32>
    %cst_61 = arith.constant dense<0.000000e+00> : vector<2x64xf32>
    %162 = tpu.matmul %127, %12, %cst_61 {dimension_numbers = #tpu.dot_dimension_numbers<[1], [0], [0], [1], [0, 0, 1, 1], [], []>} : vector<2x32xf32>, vector<32x64xf32>, vector<2x64xf32> -> vector<2x64xf32>
    %163 = arith.addf %161, %162 : vector<2x64xf32>
    %164 = vector.broadcast %23 : vector<1x64xf32> to vector<2x64xf32>
    %165 = arith.addf %163, %164 : vector<2x64xf32>
    %166 = vector.extract_strided_slice %165 {offsets = [0, 0], sizes = [2, 32], strides = [1, 1]} : vector<2x64xf32> to vector<2x32xf32>
    %167 = arith.negf %166 : vector<2x32xf32>
    %168 = math.exp %167 : vector<2x32xf32>
    %cst_62 = arith.constant 1.000000e+00 : f32
    %169 = vector.broadcast %cst_62 : f32 to vector<2x32xf32>
    %170 = arith.addf %169, %168 : vector<2x32xf32>
    %171 = arith.divf %169, %170 : vector<2x32xf32>
    %172 = vector.extract_strided_slice %165 {offsets = [0, 32], sizes = [2, 32], strides = [1, 1]} : vector<2x64xf32> to vector<2x32xf32>
    %173 = arith.negf %172 : vector<2x32xf32>
    %174 = math.exp %173 : vector<2x32xf32>
    %cst_63 = arith.constant 1.000000e+00 : f32
    %175 = vector.broadcast %cst_63 : f32 to vector<2x32xf32>
    %176 = arith.addf %175, %174 : vector<2x32xf32>
    %177 = arith.divf %175, %176 : vector<2x32xf32>
    %178 = vector.extract_strided_slice %160 {offsets = [0, 64], sizes = [2, 32], strides = [1, 1]} : vector<2x96xf32> to vector<2x32xf32>
    %179 = arith.mulf %177, %127 : vector<2x32xf32>
    %cst_64 = arith.constant dense<0.000000e+00> : vector<2x32xf32>
    %180 = tpu.matmul %179, %18, %cst_64 {dimension_numbers = #tpu.dot_dimension_numbers<[1], [0], [0], [1], [0, 0, 1, 1], [], []>} : vector<2x32xf32>, vector<32x32xf32>, vector<2x32xf32> -> vector<2x32xf32>
    %181 = arith.addf %178, %180 : vector<2x32xf32>
    %182 = vector.broadcast %27 : vector<1x32xf32> to vector<2x32xf32>
    %183 = arith.addf %181, %182 : vector<2x32xf32>
    %184 = math.tanh %183 : vector<2x32xf32>
    %185 = arith.subf %127, %184 : vector<2x32xf32>
    %186 = arith.mulf %171, %185 : vector<2x32xf32>
    %187 = arith.addf %184, %186 : vector<2x32xf32>
    %cst_65 = arith.constant dense<0.000000e+00> : vector<2x96xf32>
    %188 = tpu.matmul %187, %9, %cst_65 {dimension_numbers = #tpu.dot_dimension_numbers<[1], [0], [0], [1], [0, 0, 1, 1], [], []>} : vector<2x32xf32>, vector<32x96xf32>, vector<2x96xf32> -> vector<2x96xf32>
    %189 = vector.extract_strided_slice %188 {offsets = [0, 0], sizes = [2, 64], strides = [1, 1]} : vector<2x96xf32> to vector<2x64xf32>
    %cst_66 = arith.constant dense<0.000000e+00> : vector<2x64xf32>
    %190 = tpu.matmul %155, %15, %cst_66 {dimension_numbers = #tpu.dot_dimension_numbers<[1], [0], [0], [1], [0, 0, 1, 1], [], []>} : vector<2x32xf32>, vector<32x64xf32>, vector<2x64xf32> -> vector<2x64xf32>
    %191 = arith.addf %189, %190 : vector<2x64xf32>
    %192 = vector.broadcast %25 : vector<1x64xf32> to vector<2x64xf32>
    %193 = arith.addf %191, %192 : vector<2x64xf32>
    %194 = vector.extract_strided_slice %193 {offsets = [0, 0], sizes = [2, 32], strides = [1, 1]} : vector<2x64xf32> to vector<2x32xf32>
    %195 = arith.negf %194 : vector<2x32xf32>
    %196 = math.exp %195 : vector<2x32xf32>
    %cst_67 = arith.constant 1.000000e+00 : f32
    %197 = vector.broadcast %cst_67 : f32 to vector<2x32xf32>
    %198 = arith.addf %197, %196 : vector<2x32xf32>
    %199 = arith.divf %197, %198 : vector<2x32xf32>
    %200 = vector.extract_strided_slice %193 {offsets = [0, 32], sizes = [2, 32], strides = [1, 1]} : vector<2x64xf32> to vector<2x32xf32>
    %201 = arith.negf %200 : vector<2x32xf32>
    %202 = math.exp %201 : vector<2x32xf32>
    %cst_68 = arith.constant 1.000000e+00 : f32
    %203 = vector.broadcast %cst_68 : f32 to vector<2x32xf32>
    %204 = arith.addf %203, %202 : vector<2x32xf32>
    %205 = arith.divf %203, %204 : vector<2x32xf32>
    %206 = vector.extract_strided_slice %188 {offsets = [0, 64], sizes = [2, 32], strides = [1, 1]} : vector<2x96xf32> to vector<2x32xf32>
    %207 = arith.mulf %205, %155 : vector<2x32xf32>
    %cst_69 = arith.constant dense<0.000000e+00> : vector<2x32xf32>
    %208 = tpu.matmul %207, %21, %cst_69 {dimension_numbers = #tpu.dot_dimension_numbers<[1], [0], [0], [1], [0, 0, 1, 1], [], []>} : vector<2x32xf32>, vector<32x32xf32>, vector<2x32xf32> -> vector<2x32xf32>
    %209 = arith.addf %206, %208 : vector<2x32xf32>
    %210 = vector.broadcast %29 : vector<1x32xf32> to vector<2x32xf32>
    %211 = arith.addf %209, %210 : vector<2x32xf32>
    %212 = math.tanh %211 : vector<2x32xf32>
    %213 = arith.subf %155, %212 : vector<2x32xf32>
    %214 = arith.mulf %199, %213 : vector<2x32xf32>
    %215 = arith.addf %212, %214 : vector<2x32xf32>
    %cst_70 = arith.constant dense<0.000000e+00> : vector<2x16xf32>
    %216 = tpu.matmul %215, %31, %cst_70 {dimension_numbers = #tpu.dot_dimension_numbers<[1], [0], [0], [1], [0, 0, 1, 1], [], []>} : vector<2x32xf32>, vector<32x16xf32>, vector<2x16xf32> -> vector<2x16xf32>
    %217 = vector.broadcast %32 : vector<1x16xf32> to vector<2x16xf32>
    %218 = arith.addf %216, %217 : vector<2x16xf32>
    %219 = vector.extract_strided_slice %38 {offsets = [0, 3, 0], sizes = [2, 1, 96], strides = [1, 1, 1]} : vector<2x8x96xf32> to vector<2x1x96xf32>
    %220 = vector.shape_cast %219 : vector<2x1x96xf32> to vector<2x96xf32>
    %221 = vector.extract_strided_slice %220 {offsets = [0, 0], sizes = [2, 64], strides = [1, 1]} : vector<2x96xf32> to vector<2x64xf32>
    %cst_71 = arith.constant dense<0.000000e+00> : vector<2x64xf32>
    %222 = tpu.matmul %187, %12, %cst_71 {dimension_numbers = #tpu.dot_dimension_numbers<[1], [0], [0], [1], [0, 0, 1, 1], [], []>} : vector<2x32xf32>, vector<32x64xf32>, vector<2x64xf32> -> vector<2x64xf32>
    %223 = arith.addf %221, %222 : vector<2x64xf32>
    %224 = vector.broadcast %23 : vector<1x64xf32> to vector<2x64xf32>
    %225 = arith.addf %223, %224 : vector<2x64xf32>
    %226 = vector.extract_strided_slice %225 {offsets = [0, 0], sizes = [2, 32], strides = [1, 1]} : vector<2x64xf32> to vector<2x32xf32>
    %227 = arith.negf %226 : vector<2x32xf32>
    %228 = math.exp %227 : vector<2x32xf32>
    %cst_72 = arith.constant 1.000000e+00 : f32
    %229 = vector.broadcast %cst_72 : f32 to vector<2x32xf32>
    %230 = arith.addf %229, %228 : vector<2x32xf32>
    %231 = arith.divf %229, %230 : vector<2x32xf32>
    %232 = vector.extract_strided_slice %225 {offsets = [0, 32], sizes = [2, 32], strides = [1, 1]} : vector<2x64xf32> to vector<2x32xf32>
    %233 = arith.negf %232 : vector<2x32xf32>
    %234 = math.exp %233 : vector<2x32xf32>
    %cst_73 = arith.constant 1.000000e+00 : f32
    %235 = vector.broadcast %cst_73 : f32 to vector<2x32xf32>
    %236 = arith.addf %235, %234 : vector<2x32xf32>
    %237 = arith.divf %235, %236 : vector<2x32xf32>
    %238 = vector.extract_strided_slice %220 {offsets = [0, 64], sizes = [2, 32], strides = [1, 1]} : vector<2x96xf32> to vector<2x32xf32>
    %239 = arith.mulf %237, %187 : vector<2x32xf32>
    %cst_74 = arith.constant dense<0.000000e+00> : vector<2x32xf32>
    %240 = tpu.matmul %239, %18, %cst_74 {dimension_numbers = #tpu.dot_dimension_numbers<[1], [0], [0], [1], [0, 0, 1, 1], [], []>} : vector<2x32xf32>, vector<32x32xf32>, vector<2x32xf32> -> vector<2x32xf32>
    %241 = arith.addf %238, %240 : vector<2x32xf32>
    %242 = vector.broadcast %27 : vector<1x32xf32> to vector<2x32xf32>
    %243 = arith.addf %241, %242 : vector<2x32xf32>
    %244 = math.tanh %243 : vector<2x32xf32>
    %245 = arith.subf %187, %244 : vector<2x32xf32>
    %246 = arith.mulf %231, %245 : vector<2x32xf32>
    %247 = arith.addf %244, %246 : vector<2x32xf32>
    %cst_75 = arith.constant dense<0.000000e+00> : vector<2x96xf32>
    %248 = tpu.matmul %247, %9, %cst_75 {dimension_numbers = #tpu.dot_dimension_numbers<[1], [0], [0], [1], [0, 0, 1, 1], [], []>} : vector<2x32xf32>, vector<32x96xf32>, vector<2x96xf32> -> vector<2x96xf32>
    %249 = vector.extract_strided_slice %248 {offsets = [0, 0], sizes = [2, 64], strides = [1, 1]} : vector<2x96xf32> to vector<2x64xf32>
    %cst_76 = arith.constant dense<0.000000e+00> : vector<2x64xf32>
    %250 = tpu.matmul %215, %15, %cst_76 {dimension_numbers = #tpu.dot_dimension_numbers<[1], [0], [0], [1], [0, 0, 1, 1], [], []>} : vector<2x32xf32>, vector<32x64xf32>, vector<2x64xf32> -> vector<2x64xf32>
    %251 = arith.addf %249, %250 : vector<2x64xf32>
    %252 = vector.broadcast %25 : vector<1x64xf32> to vector<2x64xf32>
    %253 = arith.addf %251, %252 : vector<2x64xf32>
    %254 = vector.extract_strided_slice %253 {offsets = [0, 0], sizes = [2, 32], strides = [1, 1]} : vector<2x64xf32> to vector<2x32xf32>
    %255 = arith.negf %254 : vector<2x32xf32>
    %256 = math.exp %255 : vector<2x32xf32>
    %cst_77 = arith.constant 1.000000e+00 : f32
    %257 = vector.broadcast %cst_77 : f32 to vector<2x32xf32>
    %258 = arith.addf %257, %256 : vector<2x32xf32>
    %259 = arith.divf %257, %258 : vector<2x32xf32>
    %260 = vector.extract_strided_slice %253 {offsets = [0, 32], sizes = [2, 32], strides = [1, 1]} : vector<2x64xf32> to vector<2x32xf32>
    %261 = arith.negf %260 : vector<2x32xf32>
    %262 = math.exp %261 : vector<2x32xf32>
    %cst_78 = arith.constant 1.000000e+00 : f32
    %263 = vector.broadcast %cst_78 : f32 to vector<2x32xf32>
    %264 = arith.addf %263, %262 : vector<2x32xf32>
    %265 = arith.divf %263, %264 : vector<2x32xf32>
    %266 = vector.extract_strided_slice %248 {offsets = [0, 64], sizes = [2, 32], strides = [1, 1]} : vector<2x96xf32> to vector<2x32xf32>
    %267 = arith.mulf %265, %215 : vector<2x32xf32>
    %cst_79 = arith.constant dense<0.000000e+00> : vector<2x32xf32>
    %268 = tpu.matmul %267, %21, %cst_79 {dimension_numbers = #tpu.dot_dimension_numbers<[1], [0], [0], [1], [0, 0, 1, 1], [], []>} : vector<2x32xf32>, vector<32x32xf32>, vector<2x32xf32> -> vector<2x32xf32>
    %269 = arith.addf %266, %268 : vector<2x32xf32>
    %270 = vector.broadcast %29 : vector<1x32xf32> to vector<2x32xf32>
    %271 = arith.addf %269, %270 : vector<2x32xf32>
    %272 = math.tanh %271 : vector<2x32xf32>
    %273 = arith.subf %215, %272 : vector<2x32xf32>
    %274 = arith.mulf %259, %273 : vector<2x32xf32>
    %275 = arith.addf %272, %274 : vector<2x32xf32>
    %cst_80 = arith.constant dense<0.000000e+00> : vector<2x16xf32>
    %276 = tpu.matmul %275, %31, %cst_80 {dimension_numbers = #tpu.dot_dimension_numbers<[1], [0], [0], [1], [0, 0, 1, 1], [], []>} : vector<2x32xf32>, vector<32x16xf32>, vector<2x16xf32> -> vector<2x16xf32>
    %277 = vector.broadcast %32 : vector<1x16xf32> to vector<2x16xf32>
    %278 = arith.addf %276, %277 : vector<2x16xf32>
    %279 = vector.extract_strided_slice %38 {offsets = [0, 4, 0], sizes = [2, 1, 96], strides = [1, 1, 1]} : vector<2x8x96xf32> to vector<2x1x96xf32>
    %280 = vector.shape_cast %279 : vector<2x1x96xf32> to vector<2x96xf32>
    %281 = vector.extract_strided_slice %280 {offsets = [0, 0], sizes = [2, 64], strides = [1, 1]} : vector<2x96xf32> to vector<2x64xf32>
    %cst_81 = arith.constant dense<0.000000e+00> : vector<2x64xf32>
    %282 = tpu.matmul %247, %12, %cst_81 {dimension_numbers = #tpu.dot_dimension_numbers<[1], [0], [0], [1], [0, 0, 1, 1], [], []>} : vector<2x32xf32>, vector<32x64xf32>, vector<2x64xf32> -> vector<2x64xf32>
    %283 = arith.addf %281, %282 : vector<2x64xf32>
    %284 = vector.broadcast %23 : vector<1x64xf32> to vector<2x64xf32>
    %285 = arith.addf %283, %284 : vector<2x64xf32>
    %286 = vector.extract_strided_slice %285 {offsets = [0, 0], sizes = [2, 32], strides = [1, 1]} : vector<2x64xf32> to vector<2x32xf32>
    %287 = arith.negf %286 : vector<2x32xf32>
    %288 = math.exp %287 : vector<2x32xf32>
    %cst_82 = arith.constant 1.000000e+00 : f32
    %289 = vector.broadcast %cst_82 : f32 to vector<2x32xf32>
    %290 = arith.addf %289, %288 : vector<2x32xf32>
    %291 = arith.divf %289, %290 : vector<2x32xf32>
    %292 = vector.extract_strided_slice %285 {offsets = [0, 32], sizes = [2, 32], strides = [1, 1]} : vector<2x64xf32> to vector<2x32xf32>
    %293 = arith.negf %292 : vector<2x32xf32>
    %294 = math.exp %293 : vector<2x32xf32>
    %cst_83 = arith.constant 1.000000e+00 : f32
    %295 = vector.broadcast %cst_83 : f32 to vector<2x32xf32>
    %296 = arith.addf %295, %294 : vector<2x32xf32>
    %297 = arith.divf %295, %296 : vector<2x32xf32>
    %298 = vector.extract_strided_slice %280 {offsets = [0, 64], sizes = [2, 32], strides = [1, 1]} : vector<2x96xf32> to vector<2x32xf32>
    %299 = arith.mulf %297, %247 : vector<2x32xf32>
    %cst_84 = arith.constant dense<0.000000e+00> : vector<2x32xf32>
    %300 = tpu.matmul %299, %18, %cst_84 {dimension_numbers = #tpu.dot_dimension_numbers<[1], [0], [0], [1], [0, 0, 1, 1], [], []>} : vector<2x32xf32>, vector<32x32xf32>, vector<2x32xf32> -> vector<2x32xf32>
    %301 = arith.addf %298, %300 : vector<2x32xf32>
    %302 = vector.broadcast %27 : vector<1x32xf32> to vector<2x32xf32>
    %303 = arith.addf %301, %302 : vector<2x32xf32>
    %304 = math.tanh %303 : vector<2x32xf32>
    %305 = arith.subf %247, %304 : vector<2x32xf32>
    %306 = arith.mulf %291, %305 : vector<2x32xf32>
    %307 = arith.addf %304, %306 : vector<2x32xf32>
    %cst_85 = arith.constant dense<0.000000e+00> : vector<2x96xf32>
    %308 = tpu.matmul %307, %9, %cst_85 {dimension_numbers = #tpu.dot_dimension_numbers<[1], [0], [0], [1], [0, 0, 1, 1], [], []>} : vector<2x32xf32>, vector<32x96xf32>, vector<2x96xf32> -> vector<2x96xf32>
    %309 = vector.extract_strided_slice %308 {offsets = [0, 0], sizes = [2, 64], strides = [1, 1]} : vector<2x96xf32> to vector<2x64xf32>
    %cst_86 = arith.constant dense<0.000000e+00> : vector<2x64xf32>
    %310 = tpu.matmul %275, %15, %cst_86 {dimension_numbers = #tpu.dot_dimension_numbers<[1], [0], [0], [1], [0, 0, 1, 1], [], []>} : vector<2x32xf32>, vector<32x64xf32>, vector<2x64xf32> -> vector<2x64xf32>
    %311 = arith.addf %309, %310 : vector<2x64xf32>
    %312 = vector.broadcast %25 : vector<1x64xf32> to vector<2x64xf32>
    %313 = arith.addf %311, %312 : vector<2x64xf32>
    %314 = vector.extract_strided_slice %313 {offsets = [0, 0], sizes = [2, 32], strides = [1, 1]} : vector<2x64xf32> to vector<2x32xf32>
    %315 = arith.negf %314 : vector<2x32xf32>
    %316 = math.exp %315 : vector<2x32xf32>
    %cst_87 = arith.constant 1.000000e+00 : f32
    %317 = vector.broadcast %cst_87 : f32 to vector<2x32xf32>
    %318 = arith.addf %317, %316 : vector<2x32xf32>
    %319 = arith.divf %317, %318 : vector<2x32xf32>
    %320 = vector.extract_strided_slice %313 {offsets = [0, 32], sizes = [2, 32], strides = [1, 1]} : vector<2x64xf32> to vector<2x32xf32>
    %321 = arith.negf %320 : vector<2x32xf32>
    %322 = math.exp %321 : vector<2x32xf32>
    %cst_88 = arith.constant 1.000000e+00 : f32
    %323 = vector.broadcast %cst_88 : f32 to vector<2x32xf32>
    %324 = arith.addf %323, %322 : vector<2x32xf32>
    %325 = arith.divf %323, %324 : vector<2x32xf32>
    %326 = vector.extract_strided_slice %308 {offsets = [0, 64], sizes = [2, 32], strides = [1, 1]} : vector<2x96xf32> to vector<2x32xf32>
    %327 = arith.mulf %325, %275 : vector<2x32xf32>
    %cst_89 = arith.constant dense<0.000000e+00> : vector<2x32xf32>
    %328 = tpu.matmul %327, %21, %cst_89 {dimension_numbers = #tpu.dot_dimension_numbers<[1], [0], [0], [1], [0, 0, 1, 1], [], []>} : vector<2x32xf32>, vector<32x32xf32>, vector<2x32xf32> -> vector<2x32xf32>
    %329 = arith.addf %326, %328 : vector<2x32xf32>
    %330 = vector.broadcast %29 : vector<1x32xf32> to vector<2x32xf32>
    %331 = arith.addf %329, %330 : vector<2x32xf32>
    %332 = math.tanh %331 : vector<2x32xf32>
    %333 = arith.subf %275, %332 : vector<2x32xf32>
    %334 = arith.mulf %319, %333 : vector<2x32xf32>
    %335 = arith.addf %332, %334 : vector<2x32xf32>
    %cst_90 = arith.constant dense<0.000000e+00> : vector<2x16xf32>
    %336 = tpu.matmul %335, %31, %cst_90 {dimension_numbers = #tpu.dot_dimension_numbers<[1], [0], [0], [1], [0, 0, 1, 1], [], []>} : vector<2x32xf32>, vector<32x16xf32>, vector<2x16xf32> -> vector<2x16xf32>
    %337 = vector.broadcast %32 : vector<1x16xf32> to vector<2x16xf32>
    %338 = arith.addf %336, %337 : vector<2x16xf32>
    %339 = vector.extract_strided_slice %38 {offsets = [0, 5, 0], sizes = [2, 1, 96], strides = [1, 1, 1]} : vector<2x8x96xf32> to vector<2x1x96xf32>
    %340 = vector.shape_cast %339 : vector<2x1x96xf32> to vector<2x96xf32>
    %341 = vector.extract_strided_slice %340 {offsets = [0, 0], sizes = [2, 64], strides = [1, 1]} : vector<2x96xf32> to vector<2x64xf32>
    %cst_91 = arith.constant dense<0.000000e+00> : vector<2x64xf32>
    %342 = tpu.matmul %307, %12, %cst_91 {dimension_numbers = #tpu.dot_dimension_numbers<[1], [0], [0], [1], [0, 0, 1, 1], [], []>} : vector<2x32xf32>, vector<32x64xf32>, vector<2x64xf32> -> vector<2x64xf32>
    %343 = arith.addf %341, %342 : vector<2x64xf32>
    %344 = vector.broadcast %23 : vector<1x64xf32> to vector<2x64xf32>
    %345 = arith.addf %343, %344 : vector<2x64xf32>
    %346 = vector.extract_strided_slice %345 {offsets = [0, 0], sizes = [2, 32], strides = [1, 1]} : vector<2x64xf32> to vector<2x32xf32>
    %347 = arith.negf %346 : vector<2x32xf32>
    %348 = math.exp %347 : vector<2x32xf32>
    %cst_92 = arith.constant 1.000000e+00 : f32
    %349 = vector.broadcast %cst_92 : f32 to vector<2x32xf32>
    %350 = arith.addf %349, %348 : vector<2x32xf32>
    %351 = arith.divf %349, %350 : vector<2x32xf32>
    %352 = vector.extract_strided_slice %345 {offsets = [0, 32], sizes = [2, 32], strides = [1, 1]} : vector<2x64xf32> to vector<2x32xf32>
    %353 = arith.negf %352 : vector<2x32xf32>
    %354 = math.exp %353 : vector<2x32xf32>
    %cst_93 = arith.constant 1.000000e+00 : f32
    %355 = vector.broadcast %cst_93 : f32 to vector<2x32xf32>
    %356 = arith.addf %355, %354 : vector<2x32xf32>
    %357 = arith.divf %355, %356 : vector<2x32xf32>
    %358 = vector.extract_strided_slice %340 {offsets = [0, 64], sizes = [2, 32], strides = [1, 1]} : vector<2x96xf32> to vector<2x32xf32>
    %359 = arith.mulf %357, %307 : vector<2x32xf32>
    %cst_94 = arith.constant dense<0.000000e+00> : vector<2x32xf32>
    %360 = tpu.matmul %359, %18, %cst_94 {dimension_numbers = #tpu.dot_dimension_numbers<[1], [0], [0], [1], [0, 0, 1, 1], [], []>} : vector<2x32xf32>, vector<32x32xf32>, vector<2x32xf32> -> vector<2x32xf32>
    %361 = arith.addf %358, %360 : vector<2x32xf32>
    %362 = vector.broadcast %27 : vector<1x32xf32> to vector<2x32xf32>
    %363 = arith.addf %361, %362 : vector<2x32xf32>
    %364 = math.tanh %363 : vector<2x32xf32>
    %365 = arith.subf %307, %364 : vector<2x32xf32>
    %366 = arith.mulf %351, %365 : vector<2x32xf32>
    %367 = arith.addf %364, %366 : vector<2x32xf32>
    %cst_95 = arith.constant dense<0.000000e+00> : vector<2x96xf32>
    %368 = tpu.matmul %367, %9, %cst_95 {dimension_numbers = #tpu.dot_dimension_numbers<[1], [0], [0], [1], [0, 0, 1, 1], [], []>} : vector<2x32xf32>, vector<32x96xf32>, vector<2x96xf32> -> vector<2x96xf32>
    %369 = vector.extract_strided_slice %368 {offsets = [0, 0], sizes = [2, 64], strides = [1, 1]} : vector<2x96xf32> to vector<2x64xf32>
    %cst_96 = arith.constant dense<0.000000e+00> : vector<2x64xf32>
    %370 = tpu.matmul %335, %15, %cst_96 {dimension_numbers = #tpu.dot_dimension_numbers<[1], [0], [0], [1], [0, 0, 1, 1], [], []>} : vector<2x32xf32>, vector<32x64xf32>, vector<2x64xf32> -> vector<2x64xf32>
    %371 = arith.addf %369, %370 : vector<2x64xf32>
    %372 = vector.broadcast %25 : vector<1x64xf32> to vector<2x64xf32>
    %373 = arith.addf %371, %372 : vector<2x64xf32>
    %374 = vector.extract_strided_slice %373 {offsets = [0, 0], sizes = [2, 32], strides = [1, 1]} : vector<2x64xf32> to vector<2x32xf32>
    %375 = arith.negf %374 : vector<2x32xf32>
    %376 = math.exp %375 : vector<2x32xf32>
    %cst_97 = arith.constant 1.000000e+00 : f32
    %377 = vector.broadcast %cst_97 : f32 to vector<2x32xf32>
    %378 = arith.addf %377, %376 : vector<2x32xf32>
    %379 = arith.divf %377, %378 : vector<2x32xf32>
    %380 = vector.extract_strided_slice %373 {offsets = [0, 32], sizes = [2, 32], strides = [1, 1]} : vector<2x64xf32> to vector<2x32xf32>
    %381 = arith.negf %380 : vector<2x32xf32>
    %382 = math.exp %381 : vector<2x32xf32>
    %cst_98 = arith.constant 1.000000e+00 : f32
    %383 = vector.broadcast %cst_98 : f32 to vector<2x32xf32>
    %384 = arith.addf %383, %382 : vector<2x32xf32>
    %385 = arith.divf %383, %384 : vector<2x32xf32>
    %386 = vector.extract_strided_slice %368 {offsets = [0, 64], sizes = [2, 32], strides = [1, 1]} : vector<2x96xf32> to vector<2x32xf32>
    %387 = arith.mulf %385, %335 : vector<2x32xf32>
    %cst_99 = arith.constant dense<0.000000e+00> : vector<2x32xf32>
    %388 = tpu.matmul %387, %21, %cst_99 {dimension_numbers = #tpu.dot_dimension_numbers<[1], [0], [0], [1], [0, 0, 1, 1], [], []>} : vector<2x32xf32>, vector<32x32xf32>, vector<2x32xf32> -> vector<2x32xf32>
    %389 = arith.addf %386, %388 : vector<2x32xf32>
    %390 = vector.broadcast %29 : vector<1x32xf32> to vector<2x32xf32>
    %391 = arith.addf %389, %390 : vector<2x32xf32>
    %392 = math.tanh %391 : vector<2x32xf32>
    %393 = arith.subf %335, %392 : vector<2x32xf32>
    %394 = arith.mulf %379, %393 : vector<2x32xf32>
    %395 = arith.addf %392, %394 : vector<2x32xf32>
    %cst_100 = arith.constant dense<0.000000e+00> : vector<2x16xf32>
    %396 = tpu.matmul %395, %31, %cst_100 {dimension_numbers = #tpu.dot_dimension_numbers<[1], [0], [0], [1], [0, 0, 1, 1], [], []>} : vector<2x32xf32>, vector<32x16xf32>, vector<2x16xf32> -> vector<2x16xf32>
    %397 = vector.broadcast %32 : vector<1x16xf32> to vector<2x16xf32>
    %398 = arith.addf %396, %397 : vector<2x16xf32>
    %399 = vector.extract_strided_slice %38 {offsets = [0, 6, 0], sizes = [2, 1, 96], strides = [1, 1, 1]} : vector<2x8x96xf32> to vector<2x1x96xf32>
    %400 = vector.shape_cast %399 : vector<2x1x96xf32> to vector<2x96xf32>
    %401 = vector.extract_strided_slice %400 {offsets = [0, 0], sizes = [2, 64], strides = [1, 1]} : vector<2x96xf32> to vector<2x64xf32>
    %cst_101 = arith.constant dense<0.000000e+00> : vector<2x64xf32>
    %402 = tpu.matmul %367, %12, %cst_101 {dimension_numbers = #tpu.dot_dimension_numbers<[1], [0], [0], [1], [0, 0, 1, 1], [], []>} : vector<2x32xf32>, vector<32x64xf32>, vector<2x64xf32> -> vector<2x64xf32>
    %403 = arith.addf %401, %402 : vector<2x64xf32>
    %404 = vector.broadcast %23 : vector<1x64xf32> to vector<2x64xf32>
    %405 = arith.addf %403, %404 : vector<2x64xf32>
    %406 = vector.extract_strided_slice %405 {offsets = [0, 0], sizes = [2, 32], strides = [1, 1]} : vector<2x64xf32> to vector<2x32xf32>
    %407 = arith.negf %406 : vector<2x32xf32>
    %408 = math.exp %407 : vector<2x32xf32>
    %cst_102 = arith.constant 1.000000e+00 : f32
    %409 = vector.broadcast %cst_102 : f32 to vector<2x32xf32>
    %410 = arith.addf %409, %408 : vector<2x32xf32>
    %411 = arith.divf %409, %410 : vector<2x32xf32>
    %412 = vector.extract_strided_slice %405 {offsets = [0, 32], sizes = [2, 32], strides = [1, 1]} : vector<2x64xf32> to vector<2x32xf32>
    %413 = arith.negf %412 : vector<2x32xf32>
    %414 = math.exp %413 : vector<2x32xf32>
    %cst_103 = arith.constant 1.000000e+00 : f32
    %415 = vector.broadcast %cst_103 : f32 to vector<2x32xf32>
    %416 = arith.addf %415, %414 : vector<2x32xf32>
    %417 = arith.divf %415, %416 : vector<2x32xf32>
    %418 = vector.extract_strided_slice %400 {offsets = [0, 64], sizes = [2, 32], strides = [1, 1]} : vector<2x96xf32> to vector<2x32xf32>
    %419 = arith.mulf %417, %367 : vector<2x32xf32>
    %cst_104 = arith.constant dense<0.000000e+00> : vector<2x32xf32>
    %420 = tpu.matmul %419, %18, %cst_104 {dimension_numbers = #tpu.dot_dimension_numbers<[1], [0], [0], [1], [0, 0, 1, 1], [], []>} : vector<2x32xf32>, vector<32x32xf32>, vector<2x32xf32> -> vector<2x32xf32>
    %421 = arith.addf %418, %420 : vector<2x32xf32>
    %422 = vector.broadcast %27 : vector<1x32xf32> to vector<2x32xf32>
    %423 = arith.addf %421, %422 : vector<2x32xf32>
    %424 = math.tanh %423 : vector<2x32xf32>
    %425 = arith.subf %367, %424 : vector<2x32xf32>
    %426 = arith.mulf %411, %425 : vector<2x32xf32>
    %427 = arith.addf %424, %426 : vector<2x32xf32>
    %cst_105 = arith.constant dense<0.000000e+00> : vector<2x96xf32>
    %428 = tpu.matmul %427, %9, %cst_105 {dimension_numbers = #tpu.dot_dimension_numbers<[1], [0], [0], [1], [0, 0, 1, 1], [], []>} : vector<2x32xf32>, vector<32x96xf32>, vector<2x96xf32> -> vector<2x96xf32>
    %429 = vector.extract_strided_slice %428 {offsets = [0, 0], sizes = [2, 64], strides = [1, 1]} : vector<2x96xf32> to vector<2x64xf32>
    %cst_106 = arith.constant dense<0.000000e+00> : vector<2x64xf32>
    %430 = tpu.matmul %395, %15, %cst_106 {dimension_numbers = #tpu.dot_dimension_numbers<[1], [0], [0], [1], [0, 0, 1, 1], [], []>} : vector<2x32xf32>, vector<32x64xf32>, vector<2x64xf32> -> vector<2x64xf32>
    %431 = arith.addf %429, %430 : vector<2x64xf32>
    %432 = vector.broadcast %25 : vector<1x64xf32> to vector<2x64xf32>
    %433 = arith.addf %431, %432 : vector<2x64xf32>
    %434 = vector.extract_strided_slice %433 {offsets = [0, 0], sizes = [2, 32], strides = [1, 1]} : vector<2x64xf32> to vector<2x32xf32>
    %435 = arith.negf %434 : vector<2x32xf32>
    %436 = math.exp %435 : vector<2x32xf32>
    %cst_107 = arith.constant 1.000000e+00 : f32
    %437 = vector.broadcast %cst_107 : f32 to vector<2x32xf32>
    %438 = arith.addf %437, %436 : vector<2x32xf32>
    %439 = arith.divf %437, %438 : vector<2x32xf32>
    %440 = vector.extract_strided_slice %433 {offsets = [0, 32], sizes = [2, 32], strides = [1, 1]} : vector<2x64xf32> to vector<2x32xf32>
    %441 = arith.negf %440 : vector<2x32xf32>
    %442 = math.exp %441 : vector<2x32xf32>
    %cst_108 = arith.constant 1.000000e+00 : f32
    %443 = vector.broadcast %cst_108 : f32 to vector<2x32xf32>
    %444 = arith.addf %443, %442 : vector<2x32xf32>
    %445 = arith.divf %443, %444 : vector<2x32xf32>
    %446 = vector.extract_strided_slice %428 {offsets = [0, 64], sizes = [2, 32], strides = [1, 1]} : vector<2x96xf32> to vector<2x32xf32>
    %447 = arith.mulf %445, %395 : vector<2x32xf32>
    %cst_109 = arith.constant dense<0.000000e+00> : vector<2x32xf32>
    %448 = tpu.matmul %447, %21, %cst_109 {dimension_numbers = #tpu.dot_dimension_numbers<[1], [0], [0], [1], [0, 0, 1, 1], [], []>} : vector<2x32xf32>, vector<32x32xf32>, vector<2x32xf32> -> vector<2x32xf32>
    %449 = arith.addf %446, %448 : vector<2x32xf32>
    %450 = vector.broadcast %29 : vector<1x32xf32> to vector<2x32xf32>
    %451 = arith.addf %449, %450 : vector<2x32xf32>
    %452 = math.tanh %451 : vector<2x32xf32>
    %453 = arith.subf %395, %452 : vector<2x32xf32>
    %454 = arith.mulf %439, %453 : vector<2x32xf32>
    %455 = arith.addf %452, %454 : vector<2x32xf32>
    %cst_110 = arith.constant dense<0.000000e+00> : vector<2x16xf32>
    %456 = tpu.matmul %455, %31, %cst_110 {dimension_numbers = #tpu.dot_dimension_numbers<[1], [0], [0], [1], [0, 0, 1, 1], [], []>} : vector<2x32xf32>, vector<32x16xf32>, vector<2x16xf32> -> vector<2x16xf32>
    %457 = vector.broadcast %32 : vector<1x16xf32> to vector<2x16xf32>
    %458 = arith.addf %456, %457 : vector<2x16xf32>
    %459 = vector.extract_strided_slice %38 {offsets = [0, 7, 0], sizes = [2, 1, 96], strides = [1, 1, 1]} : vector<2x8x96xf32> to vector<2x1x96xf32>
    %460 = vector.shape_cast %459 : vector<2x1x96xf32> to vector<2x96xf32>
    %461 = vector.extract_strided_slice %460 {offsets = [0, 0], sizes = [2, 64], strides = [1, 1]} : vector<2x96xf32> to vector<2x64xf32>
    %cst_111 = arith.constant dense<0.000000e+00> : vector<2x64xf32>
    %462 = tpu.matmul %427, %12, %cst_111 {dimension_numbers = #tpu.dot_dimension_numbers<[1], [0], [0], [1], [0, 0, 1, 1], [], []>} : vector<2x32xf32>, vector<32x64xf32>, vector<2x64xf32> -> vector<2x64xf32>
    %463 = arith.addf %461, %462 : vector<2x64xf32>
    %464 = vector.broadcast %23 : vector<1x64xf32> to vector<2x64xf32>
    %465 = arith.addf %463, %464 : vector<2x64xf32>
    %466 = vector.extract_strided_slice %465 {offsets = [0, 0], sizes = [2, 32], strides = [1, 1]} : vector<2x64xf32> to vector<2x32xf32>
    %467 = arith.negf %466 : vector<2x32xf32>
    %468 = math.exp %467 : vector<2x32xf32>
    %cst_112 = arith.constant 1.000000e+00 : f32
    %469 = vector.broadcast %cst_112 : f32 to vector<2x32xf32>
    %470 = arith.addf %469, %468 : vector<2x32xf32>
    %471 = arith.divf %469, %470 : vector<2x32xf32>
    %472 = vector.extract_strided_slice %465 {offsets = [0, 32], sizes = [2, 32], strides = [1, 1]} : vector<2x64xf32> to vector<2x32xf32>
    %473 = arith.negf %472 : vector<2x32xf32>
    %474 = math.exp %473 : vector<2x32xf32>
    %cst_113 = arith.constant 1.000000e+00 : f32
    %475 = vector.broadcast %cst_113 : f32 to vector<2x32xf32>
    %476 = arith.addf %475, %474 : vector<2x32xf32>
    %477 = arith.divf %475, %476 : vector<2x32xf32>
    %478 = vector.extract_strided_slice %460 {offsets = [0, 64], sizes = [2, 32], strides = [1, 1]} : vector<2x96xf32> to vector<2x32xf32>
    %479 = arith.mulf %477, %427 : vector<2x32xf32>
    %cst_114 = arith.constant dense<0.000000e+00> : vector<2x32xf32>
    %480 = tpu.matmul %479, %18, %cst_114 {dimension_numbers = #tpu.dot_dimension_numbers<[1], [0], [0], [1], [0, 0, 1, 1], [], []>} : vector<2x32xf32>, vector<32x32xf32>, vector<2x32xf32> -> vector<2x32xf32>
    %481 = arith.addf %478, %480 : vector<2x32xf32>
    %482 = vector.broadcast %27 : vector<1x32xf32> to vector<2x32xf32>
    %483 = arith.addf %481, %482 : vector<2x32xf32>
    %484 = math.tanh %483 : vector<2x32xf32>
    %485 = arith.subf %427, %484 : vector<2x32xf32>
    %486 = arith.mulf %471, %485 : vector<2x32xf32>
    %487 = arith.addf %484, %486 : vector<2x32xf32>
    %cst_115 = arith.constant dense<0.000000e+00> : vector<2x96xf32>
    %488 = tpu.matmul %487, %9, %cst_115 {dimension_numbers = #tpu.dot_dimension_numbers<[1], [0], [0], [1], [0, 0, 1, 1], [], []>} : vector<2x32xf32>, vector<32x96xf32>, vector<2x96xf32> -> vector<2x96xf32>
    %489 = vector.extract_strided_slice %488 {offsets = [0, 0], sizes = [2, 64], strides = [1, 1]} : vector<2x96xf32> to vector<2x64xf32>
    %cst_116 = arith.constant dense<0.000000e+00> : vector<2x64xf32>
    %490 = tpu.matmul %455, %15, %cst_116 {dimension_numbers = #tpu.dot_dimension_numbers<[1], [0], [0], [1], [0, 0, 1, 1], [], []>} : vector<2x32xf32>, vector<32x64xf32>, vector<2x64xf32> -> vector<2x64xf32>
    %491 = arith.addf %489, %490 : vector<2x64xf32>
    %492 = vector.broadcast %25 : vector<1x64xf32> to vector<2x64xf32>
    %493 = arith.addf %491, %492 : vector<2x64xf32>
    %494 = vector.extract_strided_slice %493 {offsets = [0, 0], sizes = [2, 32], strides = [1, 1]} : vector<2x64xf32> to vector<2x32xf32>
    %495 = arith.negf %494 : vector<2x32xf32>
    %496 = math.exp %495 : vector<2x32xf32>
    %cst_117 = arith.constant 1.000000e+00 : f32
    %497 = vector.broadcast %cst_117 : f32 to vector<2x32xf32>
    %498 = arith.addf %497, %496 : vector<2x32xf32>
    %499 = arith.divf %497, %498 : vector<2x32xf32>
    %500 = vector.extract_strided_slice %493 {offsets = [0, 32], sizes = [2, 32], strides = [1, 1]} : vector<2x64xf32> to vector<2x32xf32>
    %501 = arith.negf %500 : vector<2x32xf32>
    %502 = math.exp %501 : vector<2x32xf32>
    %cst_118 = arith.constant 1.000000e+00 : f32
    %503 = vector.broadcast %cst_118 : f32 to vector<2x32xf32>
    %504 = arith.addf %503, %502 : vector<2x32xf32>
    %505 = arith.divf %503, %504 : vector<2x32xf32>
    %506 = vector.extract_strided_slice %488 {offsets = [0, 64], sizes = [2, 32], strides = [1, 1]} : vector<2x96xf32> to vector<2x32xf32>
    %507 = arith.mulf %505, %455 : vector<2x32xf32>
    %cst_119 = arith.constant dense<0.000000e+00> : vector<2x32xf32>
    %508 = tpu.matmul %507, %21, %cst_119 {dimension_numbers = #tpu.dot_dimension_numbers<[1], [0], [0], [1], [0, 0, 1, 1], [], []>} : vector<2x32xf32>, vector<32x32xf32>, vector<2x32xf32> -> vector<2x32xf32>
    %509 = arith.addf %506, %508 : vector<2x32xf32>
    %510 = vector.broadcast %29 : vector<1x32xf32> to vector<2x32xf32>
    %511 = arith.addf %509, %510 : vector<2x32xf32>
    %512 = math.tanh %511 : vector<2x32xf32>
    %513 = arith.subf %455, %512 : vector<2x32xf32>
    %514 = arith.mulf %499, %513 : vector<2x32xf32>
    %515 = arith.addf %512, %514 : vector<2x32xf32>
    %cst_120 = arith.constant dense<0.000000e+00> : vector<2x16xf32>
    %516 = tpu.matmul %515, %31, %cst_120 {dimension_numbers = #tpu.dot_dimension_numbers<[1], [0], [0], [1], [0, 0, 1, 1], [], []>} : vector<2x32xf32>, vector<32x16xf32>, vector<2x16xf32> -> vector<2x16xf32>
    %517 = vector.broadcast %32 : vector<1x16xf32> to vector<2x16xf32>
    %518 = arith.addf %516, %517 : vector<2x16xf32>
    %c0_121 = arith.constant 0 : index
    %c0_122 = arith.constant 0 : index
    %c0_123 = arith.constant 0 : index
    %519 = vector.load %arg14[%c0_121, %c0_122, %c0_123] : memref<2x2x32xf32, #tpu.memory_space<vmem>>, vector<1x2x32xf32>
    %520 = vector.shape_cast %519 : vector<1x2x32xf32> to vector<2x32xf32>
    %521 = vector.shape_cast %487 : vector<2x32xf32> to vector<1x2x32xf32>
    tpu.vector_store %arg14[%c0_121, %c0_122, %c0_123], %521 {strides = array<i32>} : memref<2x2x32xf32, #tpu.memory_space<vmem>>, vector<1x2x32xf32>,
    %c1_124 = arith.constant 1 : index
    %c0_125 = arith.constant 0 : index
    %c0_126 = arith.constant 0 : index
    %522 = vector.load %arg14[%c1_124, %c0_125, %c0_126] : memref<2x2x32xf32, #tpu.memory_space<vmem>>, vector<1x2x32xf32>
    %523 = vector.shape_cast %522 : vector<1x2x32xf32> to vector<2x32xf32>
    %524 = vector.shape_cast %515 : vector<2x32xf32> to vector<1x2x32xf32>
    tpu.vector_store %arg14[%c1_124, %c0_125, %c0_126], %524 {strides = array<i32>} : memref<2x2x32xf32, #tpu.memory_space<vmem>>, vector<1x2x32xf32>,
    %525 = vector.shape_cast %98 : vector<2x16xf32> to vector<2x1x16xf32>
    %526 = vector.shape_cast %158 : vector<2x16xf32> to vector<2x1x16xf32>
    %527 = vector.shape_cast %218 : vector<2x16xf32> to vector<2x1x16xf32>
    %528 = vector.shape_cast %278 : vector<2x16xf32> to vector<2x1x16xf32>
    %529 = vector.shape_cast %338 : vector<2x16xf32> to vector<2x1x16xf32>
    %530 = vector.shape_cast %398 : vector<2x16xf32> to vector<2x1x16xf32>
    %531 = vector.shape_cast %458 : vector<2x16xf32> to vector<2x1x16xf32>
    %532 = vector.shape_cast %518 : vector<2x16xf32> to vector<2x1x16xf32>
    %533 = tpu.concatenate %525, %526, %527, %528, %529, %530, %531, %532 in 1 : vector<2x1x16xf32>, vector<2x1x16xf32>, vector<2x1x16xf32>, vector<2x1x16xf32>, vector<2x1x16xf32>, vector<2x1x16xf32>, vector<2x1x16xf32>, vector<2x1x16xf32> -> vector<2x8x16xf32>
    %c0_127 = arith.constant 0 : index
    %c0_128 = arith.constant 0 : index
    %c0_129 = arith.constant 0 : index
    %534 = vector.load %arg12[%c0_127, %c0_128, %c0_129] : memref<2x8x16xf32, #tpu.memory_space<vmem>>, vector<2x8x16xf32>
    tpu.vector_store %arg12[%c0_127, %c0_128, %c0_129], %533 {strides = array<i32>} : memref<2x8x16xf32, #tpu.memory_space<vmem>>, vector<2x8x16xf32>,
    %c0_i32_130 = arith.constant 0 : i32
    %535 = arith.cmpi eq, %arg1, %c0_i32_130 : i32
    %536 = arith.extui %535 : i1 to i32
    %c0_i32_131 = arith.constant 0 : i32
    %537 = arith.cmpi ne, %536, %c0_i32_131 : i32
    scf.if %537 {
      %538 = vector.shape_cast %487 : vector<2x32xf32> to vector<2x1x32xf32>
      %539 = vector.shape_cast %515 : vector<2x32xf32> to vector<2x1x32xf32>
      %540 = tpu.concatenate %538, %539 in 1 : vector<2x1x32xf32>, vector<2x1x32xf32> -> vector<2x2x32xf32>
      %c0_132 = arith.constant 0 : index
      %c0_133 = arith.constant 0 : index
      %c0_134 = arith.constant 0 : index
      %541 = vector.load %arg13[%c0_132, %c0_133, %c0_134] : memref<2x2x32xf32, #tpu.memory_space<vmem>>, vector<2x2x32xf32>
      tpu.vector_store %arg13[%c0_132, %c0_133, %c0_134], %540 {strides = array<i32>} : memref<2x2x32xf32, #tpu.memory_space<vmem>>, vector<2x2x32xf32>,
    } else {
    }
    return
  }
  func.func @transform_0(%arg0: i32, %arg1: i32) -> (i32, i32, i32) {
    %c0_i32 = arith.constant 0 : i32
    %c0_i32_0 = arith.constant 0 : i32
    return %arg0, %arg1, %c0_i32 : i32, i32, i32
  }
  func.func @transform_1(%arg0: i32, %arg1: i32) -> (i32, i32, i32) {
    %c0_i32 = arith.constant 0 : i32
    %c0_i32_0 = arith.constant 0 : i32
    %c0_i32_1 = arith.constant 0 : i32
    return %arg0, %c0_i32, %c0_i32_0 : i32, i32, i32
  }
  func.func @transform_2(%arg0: i32, %arg1: i32) -> (i32, i32) {
    %c0_i32 = arith.constant 0 : i32
    %c0_i32_0 = arith.constant 0 : i32
    %c0_i32_1 = arith.constant 0 : i32
    return %c0_i32, %c0_i32_0 : i32, i32
  }
  func.func @transform_3(%arg0: i32, %arg1: i32) -> (i32, i32, i32) {
    %c0_i32 = arith.constant 0 : i32
    %c0_i32_0 = arith.constant 0 : i32
    %c0_i32_1 = arith.constant 0 : i32
    %c0_i32_2 = arith.constant 0 : i32
    return %c0_i32, %c0_i32_0, %c0_i32_1 : i32, i32, i32
  }
  func.func @transform_4(%arg0: i32, %arg1: i32) -> (i32, i32, i32) {
    %c0_i32 = arith.constant 0 : i32
    %c0_i32_0 = arith.constant 0 : i32
    %c0_i32_1 = arith.constant 0 : i32
    %c0_i32_2 = arith.constant 0 : i32
    return %c0_i32, %c0_i32_0, %c0_i32_1 : i32, i32, i32
  }
  func.func @transform_5(%arg0: i32, %arg1: i32) -> (i32, i32, i32) {
    %c0_i32 = arith.constant 0 : i32
    %c0_i32_0 = arith.constant 0 : i32
    %c0_i32_1 = arith.constant 0 : i32
    %c0_i32_2 = arith.constant 0 : i32
    return %c0_i32, %c0_i32_0, %c0_i32_1 : i32, i32, i32
  }
  func.func @transform_6(%arg0: i32, %arg1: i32) -> (i32, i32, i32) {
    %c0_i32 = arith.constant 0 : i32
    %c0_i32_0 = arith.constant 0 : i32
    %c0_i32_1 = arith.constant 0 : i32
    %c0_i32_2 = arith.constant 0 : i32
    return %c0_i32, %c0_i32_0, %c0_i32_1 : i32, i32, i32
  }
  func.func @transform_7(%arg0: i32, %arg1: i32) -> (i32, i32, i32) {
    %c0_i32 = arith.constant 0 : i32
    %c0_i32_0 = arith.constant 0 : i32
    %c0_i32_1 = arith.constant 0 : i32
    %c0_i32_2 = arith.constant 0 : i32
    return %c0_i32, %c0_i32_0, %c0_i32_1 : i32, i32, i32
  }
  func.func @transform_8(%arg0: i32, %arg1: i32) -> (i32, i32) {
    %c0_i32 = arith.constant 0 : i32
    %c0_i32_0 = arith.constant 0 : i32
    %c0_i32_1 = arith.constant 0 : i32
    return %c0_i32, %c0_i32_0 : i32, i32
  }
  func.func @transform_9(%arg0: i32, %arg1: i32) -> (i32, i32) {
    %c0_i32 = arith.constant 0 : i32
    %c0_i32_0 = arith.constant 0 : i32
    %c0_i32_1 = arith.constant 0 : i32
    return %c0_i32, %c0_i32_0 : i32, i32
  }
  func.func @transform_10(%arg0: i32, %arg1: i32) -> (i32, i32, i32) {
    %c0_i32 = arith.constant 0 : i32
    %c0_i32_0 = arith.constant 0 : i32
    return %arg0, %arg1, %c0_i32 : i32, i32, i32
  }
  func.func @transform_11(%arg0: i32, %arg1: i32) -> (i32, i32, i32) {
    %c0_i32 = arith.constant 0 : i32
    %c0_i32_0 = arith.constant 0 : i32
    %c0_i32_1 = arith.constant 0 : i32
    return %arg0, %c0_i32, %c0_i32_0 : i32, i32, i32
  }
}

</mosaic_0001>

<bundles_post_ra>
// kernel: tpu_custom_call.1
= control target key start
LH: loop header
LB: loop body
LE: loop exit
PB: predicated region body
PF: predicated region fallthrough
CT: control target
= control target key end

     0   :  { %17 = vsyncpa [#allocation4], 0  ;;  %s7817_s0 = inlined_call_operand.hbm [shape: f32[2,8,16], index: 0, kind: input, shape index: {}]   ;;  %s7818_s1 = inlined_call_operand.hbm [shape: f32[2,2,32], index: 1, kind: input, shape index: {}]   ;;  %s7819_s2 = inlined_call_operand.hbm [shape: bf16[16,96], index: 2, kind: input, shape index: {}]   ;;  %s7820_s3 = inlined_call_operand.vmem [shape: bf16[2,32,96], index: 3, kind: input, shape index: {}]   ;;  %s7821_s4 = inlined_call_operand.hbm [shape: bf16[2,32,64], index: 4, kind: input, shape index: {}]   ;;  %s7822_s5 = inlined_call_operand.hbm [shape: bf16[2,32,32], index: 5, kind: input, shape index: {}]   ;;  %s7823_s6 = inlined_call_operand.vmem [shape: f32[2,1,64], index: 6, kind: input, shape index: {}]   ;;  %s7824_s7 = inlined_call_operand.vmem [shape: f32[2,1,32], index: 7, kind: input, shape index: {}]   ;;  %s7825_s8 = inlined_call_operand.vmem [shape: bf16[32,16], index: 8, kind: input, shape index: {}]   ;;  %s7826_s9 = inlined_call_operand.vmem [shape: f32[1,16], index: 9, kind: input, shape index: {}]   ;;  %s7827_s10 = inlined_call_operand.hbm [shape: f32[2,8,16], index: 10, kind: output, shape index: {0}]   ;;  %s7828_s11 = inlined_call_operand.hbm [shape: f32[2,2,32], index: 11, kind: output, shape index: {1}]  }
   0x1   :  { %18 = vsyncpa [#allocation7], 0 }
   0x2   :  { %19 = vsyncpa [#allocation10], 0 }
   0x3   :  { %20 = vsyncpa [#allocation5], 0 }
   0x4   :  { %21 = vsyncpa [#allocation14], 0  ;;  %s6667_s17 = smov [#allocation6]   ;;  %s6503_s21 = scalar_lea.hbm %s7818_s1, 64 }
   0x5   :  { %s39_s18 = sshll.u32 %s6667_s17, 4  ;;  %p6504_p0 = scmp.ne.s32.totalorder %s7818_s1, %s6503_s21  ;;  %s40_s18 = int_to_ptr.vmem [resolvable:$true] %s39_s18 }
   0x6   :  { %p6507_p1 = scmp.lt.u32.totalorder %s6503_s21, %s7818_s1 }
   0x8   :  { %p6509_p2 = pnand %p6507_p1, %p6504_p0 }
   0xa   :  { %6512 = shalt.err (!%p6509_p2)
}
   0xb   :  { %s6513_s26 = scalar_lea.vmem %s40_s18, 64  ;;  %p6518_p4 = scmp.lt.s32.totalorder %s40_s18, %s40_s18 }
   0xc   :  { %p6514_p3 = scmp.ne.s32.totalorder %s40_s18, %s6513_s26  ;;  %p6519_p5 = scmp.lt.s32.totalorder %s6513_s26, %s6513_s26 }
   0xe   :  { %p6520_p6 = por %p6519_p5, %p6518_p4 }
  0x10   :  { %p6521_p7 = pnand %p6520_p6, %p6514_p3 }
  0x12   :  { %6524 = shalt.err (!%p6521_p7)
}
  0x13   :  { %s6668_s27 = smov 32   ;;  %s6669_s28 = smov 2  }
  0x14   :  { %45 = dma.hbm_to_vmem [thread:$0]  %s7818_s1, 64, %s40_s18, [#allocation7], %s6668_s27, %s6668_s27, %s6669_s28  }
  0x15   :  { %s6670_s12 = smov [#allocation9]   ;;  %s6671_s14 = smov [#allocation3]  }
  0x16   :  { %s65_s13 = sshll.u32 %s6670_s12, 4  ;;  %s27_s15 = sshll.u32 %s6671_s14, 4  ;;  %s66_s13 = int_to_ptr.vmem [resolvable:$true] %s65_s13  ;;  %s28_s15 = int_to_ptr.vmem [resolvable:$true] %s27_s15 }
  0x17   :  { %s6525_s19 = scalar_lea.hbm %s7821_s4, 512 }
  0x18   :  { %p6526_p8 = scmp.ne.s32.totalorder %s7821_s4, %s6525_s19  ;;  %p6529_p9 = scmp.lt.u32.totalorder %s6525_s19, %s7821_s4 }
  0x1a   :  { %p6531_p10 = pnand %p6529_p9, %p6526_p8 }
  0x1c   :  { %6534 = shalt.err (!%p6531_p10)
}
  0x1d   :  { %s6535_s1 = scalar_lea.vmem %s66_s13, 512  ;;  %p6540_p12 = scmp.lt.s32.totalorder %s66_s13, %s66_s13 }
  0x1e   :  { %p6536_p11 = scmp.ne.s32.totalorder %s66_s13, %s6535_s1  ;;  %p6541_p13 = scmp.lt.s32.totalorder %s6535_s1, %s6535_s1 }
  0x20   :  { %p6542_p0 = por %p6541_p13, %p6540_p12 }
  0x22   :  { %p6543_p1 = pnand %p6542_p0, %p6536_p11 }
  0x24   :  { %6546 = shalt.err (!%p6543_p1)
}
  0x25   :  { %s6672_s18 = smov 64   ;;  %s6673_s24 = smov 4  }
  0x26   :  { %71 = dma.hbm_to_vmem [thread:$0]  %s7821_s4, 512, %s66_s13, [#allocation10], %s6672_s18, %s6672_s18, %s6673_s24  }
  0x27   :  { %s6547_s12 = scalar_lea.hbm %s7817_s0, 256 }
  0x28   :  { %p6548_p2 = scmp.ne.s32.totalorder %s7817_s0, %s6547_s12  ;;  %p6551_p3 = scmp.lt.u32.totalorder %s6547_s12, %s7817_s0 }
  0x2a   :  { %p6553_p4 = pnand %p6551_p3, %p6548_p2 }
  0x2c   :  { %6556 = shalt.err (!%p6553_p4)
}
  0x2d   :  { %s6557_s20 = scalar_lea.vmem %s28_s15, 256  ;;  %p6562_p6 = scmp.lt.s32.totalorder %s28_s15, %s28_s15 }
  0x2e   :  { %p6558_p5 = scmp.ne.s32.totalorder %s28_s15, %s6557_s20  ;;  %p6563_p7 = scmp.lt.s32.totalorder %s6557_s20, %s6557_s20 }
  0x30   :  { %p6564_p8 = por %p6563_p7, %p6562_p6 }
  0x32   :  { %p6565_p9 = pnand %p6564_p8, %p6558_p5 }
  0x34   :  { %6568 = shalt.err (!%p6565_p9)
}
  0x35   :  { %s6674_s4 = smov 128   ;;  %s6675_s13 = smov 8  }
  0x36   :  { %33 = dma.hbm_to_vmem [thread:$0]  %s7817_s0, 256, %s28_s15, [#allocation4], %s6674_s4, %s6674_s4, %s6675_s13  }
  0x37   :  { %s6676_s23 = smov [#allocation8]   ;;  %s6677_s25 = smov [#allocation11]  }
  0x38   :  { %s51_s1 = sshll.u32 %s6676_s23, 4  ;;  %s77_s26 = sshll.u32 %s6677_s25, 4  ;;  %s52_s1 = int_to_ptr.vmem [resolvable:$true] %s51_s1  ;;  %s78_s26 = int_to_ptr.vmem [resolvable:$true] %s77_s26 }
  0x39   :  { %s6569_s12 = scalar_lea.hbm %s7819_s2, 128 }
  0x3a   :  { %p6570_p10 = scmp.ne.s32.totalorder %s7819_s2, %s6569_s12  ;;  %p6573_p11 = scmp.lt.u32.totalorder %s6569_s12, %s7819_s2 }
  0x3c   :  { %p6575_p12 = pnand %p6573_p11, %p6570_p10 }
  0x3e   :  { %6578 = shalt.err (!%p6575_p12)
}
  0x3f   :  { %s6579_s0 = scalar_lea.vmem %s52_s1, 128  ;;  %p6584_p0 = scmp.lt.s32.totalorder %s52_s1, %s52_s1 }
  0x40   :  { %p6580_p13 = scmp.ne.s32.totalorder %s52_s1, %s6579_s0  ;;  %p6585_p1 = scmp.lt.s32.totalorder %s6579_s0, %s6579_s0 }
  0x42   :  { %p6586_p2 = por %p6585_p1, %p6584_p0 }
  0x44   :  { %p6587_p3 = pnand %p6586_p2, %p6580_p13 }
  0x46   :  { %6590 = shalt.err (!%p6587_p3)
}
  0x47   :  { %57 = dma.hbm_to_vmem [thread:$0]  %s7819_s2, 128, %s52_s1, [#allocation7], %s6672_s18, %s6672_s18, %s6673_s24  }
  0x48   :  { %s6591_s23 = scalar_lea.hbm %s7822_s5, 512 }
  0x49   :  { %p6592_p4 = scmp.ne.s32.totalorder %s7822_s5, %s6591_s23  ;;  %p6595_p5 = scmp.lt.u32.totalorder %s6591_s23, %s7822_s5 }
  0x4b   :  { %p6597_p6 = pnand %p6595_p5, %p6592_p4 }
  0x4d   :  { %6600 = shalt.err (!%p6597_p6)
}
  0x4e   :  { %s6601_s14 = scalar_lea.vmem %s78_s26, 512  ;;  %p6606_p8 = scmp.lt.s32.totalorder %s78_s26, %s78_s26 }
  0x4f   :  { %p6602_p7 = scmp.ne.s32.totalorder %s78_s26, %s6601_s14  ;;  %p6607_p9 = scmp.lt.s32.totalorder %s6601_s14, %s6601_s14 }
  0x51   :  { %p6608_p10 = por %p6607_p9, %p6606_p8 }
  0x53   :  { %p6609_p11 = pnand %p6608_p10, %p6602_p7 }
  0x55   :  { %6612 = shalt.err (!%p6609_p11)
}
  0x56   :  { %83 = dma.hbm_to_vmem [thread:$0]  %s7822_s5, 512, %s78_s26, [#allocation10], %s6672_s18, %s6672_s18, %s6673_s24  }
  0x57   :  { %6657 = dma.done.wait [#allocation4], 256  }
  0x58   :  { %6658 = vsyncadd [#allocation4], 4294967040 }
  0x59   :  { %6659 = dma.done.wait [#allocation7], 192  }
  0x5a   :  { %6660 = vsyncadd [#allocation7], 4294967104 }
  0x5b   :  { %6661 = dma.done.wait [#allocation10], 1024  }
  0x5c   :  { %6662 = vsyncadd [#allocation10], 4294966272  ;;  %v6678_v0 = vmov 0.0|0.0   ;;  %vm6679_vm0 = vmmov 0   ;;  %v6680_v1 = vmov 0.0   ;;  %v6823_v2 = vld [vmem:[#allocation9] sm:$0xff]  }
  0x5d   :  { %6038 = vmatprep.subr.bf16.mxu1 %v6678_v0  ;;  %5514 = vmatprep.mubr.msk.f32.mxu1 %vm6679_vm0, %v6680_v1  ;;  %v5245_v3 = vld [vmem:[#allocation8] sm:$0xff]   ;;  %vm194_vm1 = vcmask 130048   ;;  %v6826_v4 = vld [vmem:[#allocation9 + $0x8] sm:$0xff]   ;;  %v6829_v7 = vld [vmem:[#allocation6] sm:$0x3]  ;;  %vm116_vm2 = vcmask 1041409  }
  0x5e   :  { %6040 = vmatpush3.bf16.msra.mxu1 %v6823_v2  ;;  %6035 = vmatprep.subr.bf16.mxu0 %v5245_v3  ;;  %v188_v5 = vld [vmem:[#allocation3] sm:$0xff]  ;;  %v189_v6 = vld [vmem:[#allocation3 + $0x8] sm:$0xff]  ;;  %v6831_v8 = vld [vmem:[#allocation6 + $0x2] sm:$0x3]  ;;  %vm119_vm3 = vcmask 254976   ;;  %vm276_vm4 = vcmask 261120  }
  0x5f   :  { %6037 = vmatpush3.bf16.msra.mxu0 %v5245_v3  ;;  %6041 = vmatprep.subr.bf16.mxu1 %v6678_v0  ;;  %v115_v9 = vrot.slane %v6831_v8, 7  ;;  %v6856_v13 = vld [vmem:[#allocation11] sm:$0xff]   ;;  %v6860_v14 = vld [vmem:[#allocation11 + $0x8] sm:$0xff]   ;;  %s6681_s26 = smov 96   ;;  %v6896_v55 = vld [vmem:[#allocation9 + $0x10] sm:$0xff]   ;;  %vm121_vm5 = vcmask 1042434  }
  0x60   :  { %5503 = vmatprep.mubr.msk.f32.mxu0 %vm194_vm1, %v188_v5  ;;  %6044 = vmatprep.subr.bf16.mxu0 %v6678_v0  ;;  %v6871_v17 = vld [vmem:[%s7823_s6] ss:$0 sm:$0xff]  ;;  %v6901_v56 = vld [vmem:[%s7820_s3 + $0x10] sm:$0xff]   ;;  %vm125_vm6 = vcmask 256001   ;;  %v6911_v60 = vld [vmem:[#allocation9 + $0x18] sm:$0xff]   ;;  %vm5004_vm7 = vcmask 1040384  }
  0x61   :  { %v117_v10 = vsel %vm116_vm2, %v115_v9, %v6829_v7  ;;  %v5124_v43 = vld [vmem:[%s7824_s7] ss:$0 sm:$0xff]  ;;  %v122_v58 = vsel %vm121_vm5, %v115_v9, %v6829_v7  ;;  %v6916_v61 = vld [vmem:[%s7820_s3 + $0x18] sm:$0xff]   ;;  %vm5007_vm8 = vcmask 1041408   ;;  %vm5010_vm9 = vcmask 1042432  }
  0x62   :  { %6043 = vmatpush3.bf16.msra.mxu1 %v6826_v4  ;;  %5504 = vmatmul.mubr.msk.f32.vlgmr.msra.gmra.mrb[0].mxu0 %vm194_vm1, %v189_v6  ;;  %120 = vst.msk [vmem:[#allocation2] sm:$0x3] %vm119_vm3, %v117_v10  ;;  %vm5013_vm10 = vcmask 1043456   ;;  %vm5016_vm11 = vcmask 1044480   ;;  %vm5019_vm12 = vcmask 1045504   ;;  %vm4741_vm13 = vcmask 261127  }
  0x63   :  { %5525 = vmatprep.mubr.msk.f32.mxu0 %vm6679_vm0, %v6680_v1  ;;  %6050 = vmatprep.subr.bf16.mxu1 %v6678_v0  ;;  %126 = vst.msk [vmem:[#allocation2 + $0x1] sm:$0x6] %vm125_vm6, %v122_v58  ;;  %vm4743_vm14 = vcmask 253952  }
  0x64   :  { %6046 = vmatpush3.bf16.msra.mxu0 %v6856_v13 }
  0x65   :  { %6047 = vmatprep.subr.bf16.mxu0 %v6678_v0 }
  0x68   :  { %6049 = vmatpush3.bf16.msra.mxu0 %v6860_v14 }
  0x69   :  { %v6846_v11 = vld [vmem:[#allocation2] sm:$0x3]  ;;  %6056 = vmatprep.subr.bf16.mxu0 %v6678_v0 }
  0x6a   :  { %5515 = vmatmul.mubr.msk.f32.vlgmr.msra.gmra.mrb[0].mxu1 %vm276_vm4, %v6846_v11  ;;  %v376_v12 = vrot.slane %v6846_v11, 1  ;;  %v6924_v5 = vld [vmem:[#allocation2 + $0x2] sm:$0x3] }
  0x6b   :  { %5536 = vmatprep.mubr.msk.f32.mxu1 %vm6679_vm0, %v6680_v1  ;;  %6052 = vmatpush3.bf16.msra.mxu1 %v6901_v56 }
  0x6c   :  { %379 = vrot.lane.b32.xlu0 %v376_v12, %s6668_s27  ;;  %6053 = vmatprep.subr.bf16.mxu1 %v6678_v0 }
  0x6f   :  { %6055 = vmatpush3.bf16.msra.mxu1 %v6916_v61 }
  0x70   :  { %377 = vrot.lane.b32.xlu0 %v6846_v11, %s6668_s27  ;;  %6062 = vmatprep.subr.bf16.mxu1 %v6678_v0 }
  0xde   :  { %v380_v31 = vpop.permute.xlu0 %379 }
  0xe2   :  { %v378_v34 = vpop.permute.xlu0 %377 }
 0x135   :  { %v6864_v15 = vpop.f32.mrb[0].mxu0 }
 0x136   :  { %v6866_v16 = vpop.f32.mrb[1].mxu0 }
 0x13d   :  { %v346_v18 = vpop.f32.mrb[0].mxu1 }
 0x13e   :  { %v351_v19 = vrot.slane %v346_v18, 1  ;;  %v354_v20 = vadd.f32 %v346_v18, %v6866_v16  ;;  %v5516_v21 = vpop.f32.mrb[1].mxu1 }
 0x13f   :  { %v6949_v21 = vld [vmem:[#allocation11 + $0x18] sm:$0xff]  }
 0x140   :  { %v355_v22 = vadd.f32 %v6864_v15, %v351_v19  ;;  %v362_v23 = vadd.f32 %v6871_v17, %v354_v20  ;;  %v6945_v20 = vld [vmem:[#allocation11 + $0x10] sm:$0xff]  }
 0x142   :  { %v363_v24 = vadd.f32 %v6871_v17, %v355_v22  ;;  %v5121_v25 = vmul.f32 -1.442695, %v362_v23  ;;  %v6956_v22 = vld [vmem:[%s7823_s6 + $0x1] ss:$0 sm:$0xff] }
 0x144   :  { %6344 = vpow2.f32 %v5121_v25  ;;  %v5122_v26 = vmul.f32 -1.442695, %v363_v24 }
 0x146   :  { %6346 = vpow2.f32 %v5122_v26 }
 0x14e   :  { %v6345_v27 = vpop.eup %6344 }
 0x14f   :  { %v370_v28 = vadd.f32 1.0, %v6345_v27 }
 0x150   :  { %v6347_v29 = vpop.eup %6346 }
 0x151   :  { %v371_v30 = vadd.f32 1.0, %v6347_v29  ;;  %6348 = vrcp.f32 %v370_v28 }
 0x153   :  { %6350 = vrcp.f32 %v371_v30 }
 0x15b   :  { %v6349_v32 = vpop.eup %6348 }
 0x15c   :  { %v383_v37 = vmul.f32 %v6349_v32, %v378_v34  ;;  %v5130_v34 = vld [vmem:[%s7824_s7 + $0x1] ss:$0 sm:$0xff] }
 0x15d   :  { %v6351_v33 = vpop.eup %6350 }
 0x15e   :  { %v384_v35 = vmul.f32 %v6351_v33, %v380_v31 }
 0x160   :  { %v387_v36 = vrot.slane %v384_v35, 7 }
 0x162   :  { %v389_v38 = vsel %vm116_vm2, %v387_v36, %v383_v37 }
 0x163   :  { %390 = vrot.lane.b32.xlu1 %v389_v38, %s6681_s26 }
 0x1d5   :  { %v391_v39 = vpop.permute.xlu1 %390 }
 0x1d6   :  { %5526 = vmatmul.mubr.msk.f32.vlgmr.msra.gmra.mrb[2].mxu0 %vm276_vm4, %v391_v39 }
 0x1d7   :  { %5547 = vmatprep.mubr.msk.f32.mxu0 %vm6679_vm0, %v6680_v1  ;;  %6058 = vmatpush3.bf16.msra.mxu0 %v6896_v55 }
 0x1d8   :  { %6059 = vmatprep.subr.bf16.mxu0 %v6678_v0 }
 0x1db   :  { %6061 = vmatpush3.bf16.msra.mxu0 %v6911_v60 }
 0x1dc   :  { %6068 = vmatprep.subr.bf16.mxu0 %v6678_v0 }
 0x1de   :  { %5548 = vmatmul.mubr.msk.f32.vlgmr.msra.gmra.mrb[4].mxu0 %vm276_vm4, %v6924_v5 }
 0x1df   :  { %5569 = vmatprep.mubr.msk.f32.mxu0 %vm6679_vm0, %v6680_v1 }
 0x2a9   :  { %v460_v40 = vpop.f32.mrb[2].mxu0 }
 0x2aa   :  { %466 = vrot.lane.b32.xlu0 %v460_v40, %s6672_s18  ;;  %v5527_v41 = vpop.f32.mrb[3].mxu0  ;;  %v465_v42 = vrot.slane %v460_v40, 1 }
 0x2ac   :  { %468 = vrot.lane.b32.xlu1 %v465_v42, %s6672_s18 }
 0x2b0   :  { %479 = vrot.lane.b32.xlu1 %v5124_v43, %s6672_s18 }
 0x2b1   :  { %v657_v12 = vpop.f32.mrb[4].mxu0 }
 0x2b2   :  { %v5549_v18 = vpop.f32.mrb[5].mxu0 }
 0x31c   :  { %v467_v45 = vpop.permute.xlu0 %466 }
 0x31d   :  { %v472_v47 = vadd.f32 %v467_v45, %v6866_v16 }
 0x31e   :  { %v469_v44 = vpop.permute.xlu1 %468 }
 0x31f   :  { %v473_v46 = vadd.f32 %v6864_v15, %v469_v44 }
 0x322   :  { %v6890_v48 = vpop.permute.xlu1 %479 }
 0x323   :  { %v483_v49 = vadd.f32 %v6890_v48, %v473_v46  ;;  %v482_v50 = vadd.f32 %v6890_v48, %v472_v47 }
 0x325   :  { %6352 = vtanh.f32 %v483_v49  ;;  %v6990_v49 = vld [vmem:[%s7825_s8] sm:$0xff]  }
 0x326   :  { %6354 = vtanh.f32 %v482_v50  ;;  %6070 = vmatpush3.bf16.msra.mxu0 %v6990_v49 }
 0x327   :  { %6071 = vmatprep.subr.bf16.mxu0 %v6678_v0 }
 0x32f   :  { %v6353_v51 = vpop.eup %6352 }
 0x330   :  { %v488_v52 = vrot.slane %v6353_v51, 7  ;;  %v6355_v53 = vpop.eup %6354 }
 0x332   :  { %v489_v54 = vsel %vm116_vm2, %v488_v52, %v6355_v53  ;;  %v6998_v52 = vld [vmem:[%s7825_s8 + $0x8] sm:$0xff]  }
 0x333   :  { %490 = vrot.lane.b32.xlu0 %v489_v54, %s6672_s18  ;;  %6073 = vmatpush3.bf16.msra.mxu0 %v6998_v52 }
 0x334   :  { %6080 = vmatprep.subr.bf16.mxu0 %v6678_v0 }
 0x3a5   :  { %v491_v57 = vpop.permute.xlu0 %490 }
 0x3a6   :  { %v493_v59 = vsub.f32 %v6846_v11, %v491_v57 }
 0x3a8   :  { %v498_v62 = vmul.f32 %v6349_v32, %v493_v59  ;;  %v495_v63 = vrot.slane %v493_v59, 1 }
 0x3aa   :  { %502 = vrot.lane.b32.xlu0 %v498_v62, %s6672_s18  ;;  %v499_v3 = vmul.f32 %v6351_v33, %v495_v63 }
 0x3ac   :  { %504 = vrot.lane.b32.xlu1 %v499_v3, %s6672_s18 }
 0x3ae   :  { %675 = vrot.lane.b32.xlu0 %v6924_v5, %s6668_s27 }
 0x41c   :  { %v503_v6 = vpop.permute.xlu0 %502 }
 0x41d   :  { %v6934_v9 = vadd.f32 %v6355_v53, %v503_v6 }
 0x41e   :  { %v505_v7 = vpop.permute.xlu1 %504 }
 0x41f   :  { %v6932_v8 = vadd.f32 %v6353_v51, %v505_v7  ;;  %v951_v47 = vrot.slane %v6934_v9, 7 }
 0x420   :  { %v676_v30 = vpop.permute.xlu0 %675 }
 0x421   :  { %v512_v10 = vrot.slane %v6932_v8, 7 }
 0x423   :  { %v513_v11 = vsel %vm116_vm2, %v512_v10, %v6934_v9 }
 0x424   :  { %514 = vrot.lane.b32.xlu1 %v513_v11, %s6672_s18 }
 0x496   :  { %v515_v19 = vpop.permute.xlu1 %514 }
 0x497   :  { %5537 = vmatmul.mubr.msk.f32.vlgmr.msra.gmra.mrb[2].mxu1 %vm276_vm4, %v515_v19 }
 0x498   :  { %5558 = vmatprep.mubr.msk.f32.mxu1 %vm6679_vm0, %v6680_v1  ;;  %6064 = vmatpush3.bf16.msra.mxu1 %v6945_v20 }
 0x499   :  { %6065 = vmatprep.subr.bf16.mxu1 %v6678_v0 }
 0x49c   :  { %6067 = vmatpush3.bf16.msra.mxu1 %v6949_v21 }
 0x49d   :  { %6074 = vmatprep.subr.bf16.mxu1 %v6678_v0 }
 0x56a   :  { %v584_v23 = vpop.f32.mrb[2].mxu1 }
 0x56b   :  { %v661_v24 = vadd.f32 %v657_v12, %v584_v23  ;;  %v5538_v25 = vpop.f32.mrb[3].mxu1 }
 0x56d   :  { %v668_v26 = vadd.f32 %v6956_v22, %v661_v24 }
 0x56f   :  { %v5128_v27 = vmul.f32 -1.442695, %v668_v26 }
 0x571   :  { %6356 = vpow2.f32 %v5128_v27 }
 0x57b   :  { %v6357_v28 = vpop.eup %6356 }
 0x57c   :  { %v672_v29 = vadd.f32 1.0, %v6357_v28 }
 0x57e   :  { %6358 = vrcp.f32 %v672_v29 }
 0x588   :  { %v6359_v31 = vpop.eup %6358 }
 0x589   :  { %v678_v32 = vmul.f32 %v6359_v31, %v676_v30 }
 0x58b   :  { %680 = vrot.lane.b32.xlu1 %v678_v32, %s6681_s26 }
 0x58f   :  { %764 = vrot.lane.b32.xlu1 %v5130_v34, %s6672_s18 }
 0x5fd   :  { %v681_v33 = vpop.permute.xlu1 %680 }
 0x5fe   :  { %5559 = vmatmul.mubr.msk.f32.vlgmr.msra.gmra.mrb[4].mxu1 %vm276_vm4, %v681_v33 }
 0x5ff   :  { %6076 = vmatpush3.bf16.msra.mxu1 %v6823_v2  ;;  %5580 = vmatprep.mubr.msk.f32.mxu1 %vm6679_vm0, %v6680_v1 }
 0x600   :  { %6077 = vmatprep.subr.bf16.mxu1 %v6678_v0 }
 0x601   :  { %v6981_v43 = vpop.permute.xlu1 %764 }
 0x603   :  { %6079 = vmatpush3.bf16.msra.mxu1 %v6826_v4 }
 0x604   :  { %6086 = vmatprep.subr.bf16.mxu1 %v6678_v0 }
 0x606   :  { %5581 = vmatmul.mubr.msk.f32.vlgmr.msra.gmra.mrb[6].mxu1 %vm276_vm4, %v515_v19 }
 0x607   :  { %6088 = vmatpush3.bf16.msra.mxu1 %v6901_v56  ;;  %5602 = vmatprep.mubr.msk.f32.mxu1 %vm6679_vm0, %v6680_v1 }
 0x608   :  { %6089 = vmatprep.subr.bf16.mxu1 %v6678_v0 }
 0x60b   :  { %6091 = vmatpush3.bf16.msra.mxu1 %v6916_v61 }
 0x60c   :  { %6098 = vmatprep.subr.bf16.mxu1 %v6678_v0 }
 0x6d1   :  { %v750_v35 = vpop.f32.mrb[4].mxu1 }
 0x6d2   :  { %755 = vrot.lane.b32.xlu0 %v750_v35, %s6672_s18  ;;  %v5560_v36 = vpop.f32.mrb[5].mxu1 }
 0x6d9   :  { %v927_v37 = vpop.f32.mrb[6].mxu1 }
 0x6da   :  { %v932_v38 = vrot.slane %v927_v37, 7  ;;  %v936_v39 = vadd.f32 %v6864_v15, %v927_v37  ;;  %v5582_v40 = vpop.f32.mrb[7].mxu1 }
 0x6dc   :  { %v935_v41 = vadd.f32 %v932_v38, %v6866_v16  ;;  %v938_v57 = vadd.f32 %v6871_v17, %v936_v39 }
 0x6de   :  { %v937_v54 = vadd.f32 %v6871_v17, %v935_v41  ;;  %v5135_v59 = vmul.f32 -1.442695, %v938_v57 }
 0x6e0   :  { %v5134_v58 = vmul.f32 -1.442695, %v937_v54 }
 0x744   :  { %v756_v42 = vpop.permute.xlu0 %755 }
 0x745   :  { %v758_v44 = vadd.f32 %v756_v42, %v584_v23 }
 0x747   :  { %v767_v45 = vadd.f32 %v6981_v43, %v758_v44 }
 0x749   :  { %6360 = vtanh.f32 %v767_v45 }
 0x74a   :  { %6362 = vpow2.f32 %v5134_v58 }
 0x74b   :  { %6364 = vpow2.f32 %v5135_v59 }
 0x753   :  { %v6361_v46 = vpop.eup %6360 }
 0x754   :  { %770 = vrot.lane.b32.xlu0 %v6361_v46, %s6672_s18  ;;  %v6363_v62 = vpop.eup %6362 }
 0x755   :  { %v945_v63 = vadd.f32 1.0, %v6363_v62  ;;  %v6365_v3 = vpop.eup %6364 }
 0x757   :  { %6366 = vrcp.f32 %v945_v63 }
 0x758   :  { %952 = vrot.lane.b32.xlu0 %v951_v47, %s6681_s26 }
 0x761   :  { %v6367_v7 = vpop.eup %6366 }
 0x7c6   :  { %v771_v50 = vpop.permute.xlu0 %770 }
 0x7c7   :  { %v773_v51 = vsub.f32 %v6924_v5, %v771_v50  ;;  %v946_v5 = vadd.f32 1.0, %v6365_v3 }
 0x7c9   :  { %v774_v53 = vmul.f32 %v6359_v31, %v773_v51  ;;  %6368 = vrcp.f32 %v946_v5 }
 0x7ca   :  { %v953_v6 = vpop.permute.xlu0 %952 }
 0x7cb   :  { %776 = vrot.lane.b32.xlu1 %v774_v53, %s6672_s18  ;;  %v958_v12 = vmul.f32 %v6367_v7, %v953_v6 }
 0x7cd   :  { %v962_v23 = vrot.slane %v958_v12, 1 }
 0x7cf   :  { %954 = vrot.lane.b32.xlu1 %v512_v10, %s6681_s26 }
 0x7d3   :  { %v6369_v10 = vpop.eup %6368 }
 0x83d   :  { %v777_v11 = vpop.permute.xlu1 %776 }
 0x83e   :  { %v7008_v18 = vadd.f32 %v6361_v46, %v777_v11 }
 0x840   :  { %787 = vrot.lane.b32.xlu0 %v7008_v18, %s6672_s18 }
 0x841   :  { %v955_v19 = vpop.permute.xlu1 %954 }
 0x842   :  { %v959_v24 = vmul.f32 %v6369_v10, %v955_v19 }
 0x844   :  { %v963_v25 = vsel %vm116_vm2, %v959_v24, %v962_v23 }
 0x845   :  { %964 = vrot.lane.b32.xlu1 %v963_v25, %s6681_s26 }
 0x8b2   :  { %v788_v26 = vpop.permute.xlu0 %787 }
 0x8b3   :  { %5570 = vmatmul.mubr.msk.f32.vlgmr.msra.gmra.mrb[6].mxu0 %vm276_vm4, %v788_v26 }
 0x8b4   :  { %6082 = vmatpush3.bf16.msra.mxu0 %v6856_v13  ;;  %5591 = vmatprep.mubr.msk.f32.mxu0 %vm6679_vm0, %v6680_v1 }
 0x8b5   :  { %6083 = vmatprep.subr.bf16.mxu0 %v6678_v0 }
 0x8b7   :  { %v965_v27 = vpop.permute.xlu1 %964 }
 0x8b8   :  { %6085 = vmatpush3.bf16.msra.mxu0 %v6860_v14 }
 0x8b9   :  { %6092 = vmatprep.subr.bf16.mxu0 %v6678_v0 }
 0x8bb   :  { %5592 = vmatmul.mubr.msk.f32.vlgmr.msra.gmra.mrb[8].mxu0 %vm276_vm4, %v965_v27 }
 0x8bc   :  { %6094 = vmatpush3.bf16.msra.mxu0 %v6896_v55  ;;  %5613 = vmatprep.mubr.msk.f32.mxu0 %vm6679_vm0, %v6680_v1 }
 0x8bd   :  { %6095 = vmatprep.subr.bf16.mxu0 %v6678_v0 }
 0x8c0   :  { %6097 = vmatpush3.bf16.msra.mxu0 %v6911_v60 }
 0x8c1   :  { %6104 = vmatprep.subr.bf16.mxu0 %v6678_v0 }
 0x8c3   :  { %5614 = vmatmul.mubr.msk.f32.vlgmr.msra.gmra.mrb[10].mxu0 %vm276_vm4, %v788_v26 }
 0x8c4   :  { %6106 = vmatpush3.bf16.msra.mxu0 %v6990_v49  ;;  %5635 = vmatprep.mubr.msk.f32.mxu0 %vm6679_vm0, %v6680_v1 }
 0x8c5   :  { %6107 = vmatprep.subr.bf16.mxu0 %v6678_v0 }
 0x8c8   :  { %6109 = vmatpush3.bf16.msra.mxu0 %v6998_v52 }
 0x8c9   :  { %6116 = vmatprep.subr.bf16.mxu0 %v6678_v0 }
 0x986   :  { %v7035_v28 = vpop.f32.mrb[6].mxu0 }
 0x987   :  { %v5571_v29 = vpop.f32.mrb[7].mxu0 }
 0x98e   :  { %v1034_v30 = vpop.f32.mrb[8].mxu0 }
 0x98f   :  { %1042 = vrot.lane.b32.xlu1 %v1034_v30, %s6672_s18  ;;  %v5593_v31 = vpop.f32.mrb[9].mxu0  ;;  %v1039_v32 = vrot.slane %v1034_v30, 7 }
 0x991   :  { %1040 = vrot.lane.b32.xlu0 %v1039_v32, %s6672_s18 }
 0x996   :  { %v1226_v33 = vpop.f32.mrb[10].mxu0 }
 0x997   :  { %v5615_v34 = vpop.f32.mrb[11].mxu0 }
 0xa01   :  { %v1043_v35 = vpop.permute.xlu1 %1042 }
 0xa02   :  { %v1047_v36 = vadd.f32 %v6864_v15, %v1043_v35 }
 0xa03   :  { %v1041_v37 = vpop.permute.xlu0 %1040 }
 0xa04   :  { %v1049_v38 = vadd.f32 %v1047_v36, %v6890_v48  ;;  %v1046_v39 = vadd.f32 %v1041_v37, %v6866_v16 }
 0xa06   :  { %6370 = vtanh.f32 %v1049_v38  ;;  %v1048_v40 = vadd.f32 %v1046_v39, %v6890_v48 }
 0xa08   :  { %6372 = vtanh.f32 %v1048_v40 }
 0xa10   :  { %v6371_v41 = vpop.eup %6370 }
 0xa11   :  { %v1055_v42 = vrot.slane %v6371_v41, 1 }
 0xa12   :  { %v6373_v44 = vpop.eup %6372 }
 0xa13   :  { %v1059_v45 = vsub.f32 %v6932_v8, %v1055_v42  ;;  %v1054_v46 = vrot.slane %v6373_v44, 1 }
 0xa15   :  { %v1063_v47 = vrot.slane %v1059_v45, 7  ;;  %v1058_v50 = vsub.f32 %v6934_v9, %v1054_v46 }
 0xa17   :  { %1066 = vrot.lane.b32.xlu1 %v1063_v47, %s6672_s18  ;;  %v1062_v51 = vrot.slane %v1058_v50, 7 }
 0xa19   :  { %1064 = vrot.lane.b32.xlu0 %v1062_v51, %s6672_s18 }
 0xa89   :  { %v1067_v53 = vpop.permute.xlu1 %1066 }
 0xa8a   :  { %v1071_v54 = vmul.f32 %v6369_v10, %v1067_v53 }
 0xa8b   :  { %v1065_v57 = vpop.permute.xlu0 %1064 }
 0xa8c   :  { %1076 = vrot.lane.b32.xlu1 %v1071_v54, %s6672_s18  ;;  %v1070_v58 = vmul.f32 %v6367_v7, %v1065_v57 }
 0xa8e   :  { %1074 = vrot.lane.b32.xlu0 %v1070_v58, %s6672_s18 }
 0xa90   :  { %1238 = vrot.lane.b32.xlu1 %v7008_v18, %s6681_s26 }
 0xafe   :  { %v1077_v8 = vpop.permute.xlu1 %1076 }
 0xaff   :  { %v7053_v9 = vadd.f32 %v6371_v41, %v1077_v8 }
 0xb00   :  { %v1075_v59 = vpop.permute.xlu0 %1074 }
 0xb01   :  { %v7051_v62 = vadd.f32 %v6373_v44, %v1075_v59  ;;  %v1502_v46 = vrot.slane %v7053_v9, 7 }
 0xb02   :  { %v1239_v25 = vpop.permute.xlu1 %1238 }
 0xb03   :  { %v1084_v63 = vrot.slane %v7051_v62, 1  ;;  %v1501_v42 = vrot.slane %v7051_v62, 7 }
 0xb05   :  { %v1085_v3 = vsel %vm116_vm2, %v7053_v9, %v1084_v63 }
 0xb06   :  { %1086 = vrot.lane.b32.xlu0 %v1085_v3, %s6672_s18 }
 0xb78   :  { %v1087_v5 = vpop.permute.xlu0 %1086 }
 0xb79   :  { %5603 = vmatmul.mubr.msk.f32.vlgmr.msra.gmra.mrb[8].mxu1 %vm276_vm4, %v1087_v5 }
 0xb7a   :  { %6100 = vmatpush3.bf16.msra.mxu1 %v6945_v20  ;;  %5624 = vmatprep.mubr.msk.f32.mxu1 %vm6679_vm0, %v6680_v1 }
 0xb7b   :  { %6101 = vmatprep.subr.bf16.mxu1 %v6678_v0 }
 0xb7e   :  { %6103 = vmatpush3.bf16.msra.mxu1 %v6949_v21 }
 0xb7f   :  { %6110 = vmatprep.subr.bf16.mxu1 %v6678_v0 }
 0xc4c   :  { %v1156_v6 = vpop.f32.mrb[8].mxu1 }
 0xc4d   :  { %v1230_v7 = vadd.f32 %v1226_v33, %v1156_v6  ;;  %v5604_v11 = vpop.f32.mrb[9].mxu1 }
 0xc4f   :  { %v1231_v12 = vadd.f32 %v6956_v22, %v1230_v7 }
 0xc51   :  { %v5139_v10 = vmul.f32 -1.442695, %v1231_v12 }
 0xc53   :  { %6374 = vpow2.f32 %v5139_v10 }
 0xc5d   :  { %v6375_v19 = vpop.eup %6374 }
 0xc5e   :  { %v1235_v23 = vadd.f32 1.0, %v6375_v19 }
 0xc60   :  { %6376 = vrcp.f32 %v1235_v23 }
 0xc6a   :  { %v6377_v24 = vpop.eup %6376 }
 0xc6b   :  { %v1241_v26 = vmul.f32 %v6377_v24, %v1239_v25  ;;  %v6682_v25 = vmov 1966171168  }
 0xc6d   :  { %1243 = vrot.lane.b32.xlu0 %v1241_v26, %s6681_s26  ;;  %v4750_v26 = vunpack.c.l.s4 %v6682_v25 }
 0xcdf   :  { %v1244_v27 = vpop.permute.xlu0 %1243 }
 0xce0   :  { %5625 = vmatmul.mubr.msk.f32.vlgmr.msra.gmra.mrb[10].mxu1 %vm276_vm4, %v1244_v27  ;;  %v4752_v27 = vlaneseq }
 0xce1   :  { %6112 = vmatpush3.bf16.msra.mxu1 %v6823_v2  ;;  %5646 = vmatprep.mubr.msk.f32.mxu1 %vm6679_vm0, %v6680_v1 }
 0xce2   :  { %6113 = vmatprep.subr.bf16.mxu1 %v6678_v0 }
 0xce5   :  { %6115 = vmatpush3.bf16.msra.mxu1 %v6826_v4 }
 0xce6   :  { %6122 = vmatprep.subr.bf16.mxu1 %v6678_v0 }
 0xce8   :  { %5647 = vmatmul.mubr.msk.f32.vlgmr.msra.gmra.mrb[12].mxu1 %vm276_vm4, %v1087_v5 }
 0xce9   :  { %6124 = vmatpush3.bf16.msra.mxu1 %v6901_v56  ;;  %5668 = vmatprep.mubr.msk.f32.mxu1 %vm6679_vm0, %v6680_v1 }
 0xcea   :  { %6125 = vmatprep.subr.bf16.mxu1 %v6678_v0 }
 0xced   :  { %6127 = vmatpush3.bf16.msra.mxu1 %v6916_v61 }
 0xcee   :  { %6134 = vmatprep.subr.bf16.mxu1 %v6678_v0 }
 0xdb3   :  { %v1313_v29 = vpop.f32.mrb[10].mxu1 }
 0xdb4   :  { %1318 = vrot.lane.b32.xlu1 %v1313_v29, %s6672_s18  ;;  %v5626_v30 = vpop.f32.mrb[11].mxu1  ;;  %v4751_v29 = vunpack.c.0.s8 %v4750_v26 }
 0xdb5   :  { %v4753_v30 = vshrl.u32 %v4752_v27, 7 }
 0xdbb   :  { %v1476_v31 = vpop.f32.mrb[12].mxu1 }
 0xdbc   :  { %v1481_v32 = vrot.slane %v1476_v31, 6  ;;  %v1482_v33 = vrot.slane %v1476_v31, 7  ;;  %v5648_v34 = vpop.f32.mrb[13].mxu1  ;;  %v7131_v31 = vld [vmem:[%s7826_s9] ss:$0 sm:$0xff] }
 0xdbe   :  { %v1485_v35 = vadd.f32 %v1481_v32, %v6866_v16  ;;  %v1486_v36 = vadd.f32 %v6864_v15, %v1482_v33  ;;  %v858_v32 = vadd.f32 %v7131_v31, %v7035_v28  ;;  %v7135_v33 = vsub.s32 %v4751_v29, %v4753_v30 }
 0xdc0   :  { %v1487_v47 = vadd.f32 %v6871_v17, %v1485_v35  ;;  %v1488_v50 = vadd.f32 %v6871_v17, %v1486_v36  ;;  %v4755_v34 = vrot.slane %v858_v32, %v7135_v33 }
 0xdc2   :  { %v5143_v51 = vmul.f32 -1.442695, %v1487_v47 }
 0xe26   :  { %v1319_v37 = vpop.permute.xlu1 %1318 }
 0xe27   :  { %v1321_v38 = vadd.f32 %v1319_v37, %v1156_v6 }
 0xe29   :  { %v1322_v39 = vadd.f32 %v1321_v38, %v6981_v43 }
 0xe2b   :  { %6378 = vtanh.f32 %v1322_v39  ;;  %v7140_v39 = vsub.s32 0, %v4753_v30 }
 0xe2c   :  { %6380 = vpow2.f32 %v5143_v51 }
 0xe35   :  { %v6379_v40 = vpop.eup %6378 }
 0xe36   :  { %v1324_v41 = vsub.f32 %v7008_v18, %v6379_v40  ;;  %v5144_v18 = vmul.f32 -1.442695, %v1488_v50  ;;  %v6381_v53 = vpop.eup %6380 }
 0xe37   :  { %v1495_v57 = vadd.f32 1.0, %v6381_v53 }
 0xe38   :  { %1326 = vrot.lane.b32.xlu0 %v1324_v41, %s6672_s18  ;;  %6382 = vpow2.f32 %v5144_v18 }
 0xe39   :  { %6384 = vrcp.f32 %v1495_v57 }
 0xe3c   :  { %1503 = vrot.lane.b32.xlu0 %v1501_v42, %s6681_s26 }
 0xe42   :  { %v6383_v54 = vpop.eup %6382 }
 0xe43   :  { %v1496_v58 = vadd.f32 1.0, %v6383_v54  ;;  %v7097_v3 = vpop.eup %6384 }
 0xe45   :  { %6386 = vrcp.f32 %v1496_v58 }
 0xe4f   :  { %v7102_v6 = vpop.eup %6386 }
 0xeaa   :  { %v1327_v44 = vpop.permute.xlu0 %1326 }
 0xeab   :  { %v1329_v45 = vmul.f32 %v6377_v24, %v1327_v44  ;;  %v4763_v44 = vrot.slane %v4755_v34, %v7135_v33 }
 0xead   :  { %1331 = vrot.lane.b32.xlu1 %v1329_v45, %s6672_s18 }
 0xeae   :  { %v1504_v8 = vpop.permute.xlu0 %1503 }
 0xeaf   :  { %v1509_v5 = vmul.f32 %v7097_v3, %v1504_v8 }
 0xeb1   :  { %1505 = vrot.lane.b32.xlu1 %v1502_v46, %s6681_s26  ;;  %v1513_v12 = vrot.slane %v1509_v5, 2 }
 0xf1f   :  { %v1332_v59 = vpop.permute.xlu1 %1331 }
 0xf20   :  { %v7095_v63 = vadd.f32 %v6379_v40, %v1332_v59  ;;  %v4756_v40 = vcombine.high %v4755_v34, %v4755_v34 }
 0xf22   :  { %1336 = vrot.lane.b32.xlu0 %v7095_v63, %s6672_s18  ;;  %v4770_v46 = vrot.slane %v4756_v40, %v7135_v33 }
 0xf23   :  { %v1506_v7 = vpop.permute.xlu1 %1505 }
 0xf24   :  { %v1510_v11 = vmul.f32 %v7102_v6, %v1506_v7 }
 0xf26   :  { %v1514_v10 = vrot.slane %v1510_v11, 1 }
 0xf28   :  { %v1515_v19 = vsel %vm116_vm2, %v1514_v10, %v1513_v12 }
 0xf29   :  { %1516 = vrot.lane.b32.xlu1 %v1515_v19, %s6681_s26 }
 0xf94   :  { %v1337_v23 = vpop.permute.xlu0 %1336 }
 0xf95   :  { %5636 = vmatmul.mubr.msk.f32.vlgmr.msra.gmra.mrb[12].mxu0 %vm276_vm4, %v1337_v23 }
 0xf96   :  { %6118 = vmatpush3.bf16.msra.mxu0 %v6856_v13  ;;  %5657 = vmatprep.mubr.msk.f32.mxu0 %vm6679_vm0, %v6680_v1 }
 0xf97   :  { %6119 = vmatprep.subr.bf16.mxu0 %v6678_v0 }
 0xf9a   :  { %6121 = vmatpush3.bf16.msra.mxu0 %v6860_v14 }
 0xf9b   :  { %v1517_v24 = vpop.permute.xlu1 %1516  ;;  %6128 = vmatprep.subr.bf16.mxu0 %v6678_v0 }
 0xf9d   :  { %5658 = vmatmul.mubr.msk.f32.vlgmr.msra.gmra.mrb[14].mxu0 %vm276_vm4, %v1517_v24 }
 0xf9e   :  { %6130 = vmatpush3.bf16.msra.mxu0 %v6896_v55  ;;  %5679 = vmatprep.mubr.msk.f32.mxu0 %vm6679_vm0, %v6680_v1 }
 0xf9f   :  { %6131 = vmatprep.subr.bf16.mxu0 %v6678_v0 }
 0xfa2   :  { %6133 = vmatpush3.bf16.msra.mxu0 %v6911_v60 }
 0xfa3   :  { %6140 = vmatprep.subr.bf16.mxu0 %v6678_v0 }
 0xfa5   :  { %5680 = vmatmul.mubr.msk.f32.vlgmr.msra.gmra.mrb[16].mxu0 %vm276_vm4, %v1337_v23 }
 0xfa6   :  { %6142 = vmatpush3.bf16.msra.mxu0 %v6990_v49  ;;  %5701 = vmatprep.mubr.msk.f32.mxu0 %vm6679_vm0, %v6680_v1 }
 0xfa7   :  { %6143 = vmatprep.subr.bf16.mxu0 %v6678_v0 }
 0xfaa   :  { %6145 = vmatpush3.bf16.msra.mxu0 %v6998_v52 }
 0xfab   :  { %6152 = vmatprep.subr.bf16.mxu0 %v6678_v0 }
0x1068   :  { %v1406_v35 = vpop.f32.mrb[12].mxu0 }
0x1069   :  { %v1407_v36 = vadd.f32 %v7131_v31, %v1406_v35  ;;  %v5637_v37 = vpop.f32.mrb[13].mxu0 }
0x106b   :  { %v4780_v38 = vrot.slane %v1407_v36, %v7135_v33 }
0x106d   :  { %v4781_v41 = vcombine.high %v4780_v38, %v4780_v38  ;;  %v4788_v42 = vrot.slane %v4780_v38, %v7135_v33 }
0x106f   :  { %v4795_v28 = vrot.slane %v4781_v41, %v7135_v33  ;;  %v4937_v45 = vrot.slane %v4788_v42, %v7140_v39 }
0x1070   :  { %v1586_v47 = vpop.f32.mrb[14].mxu0 }
0x1071   :  { %v4941_v50 = vrot.slane %v4795_v28, %v7140_v39  ;;  %v5659_v51 = vpop.f32.mrb[15].mxu0  ;;  %v1592_v18 = vrot.slane %v1586_v47, 7  ;;  %v1591_v53 = vrot.slane %v1586_v47, 6  ;;  %v7149_v54 = vsel %vm5004_vm7, %v4763_v44, %v4937_v45 }
0x1073   :  { %1595 = vrot.lane.b32.xlu1 %v1592_v18, %s6672_s18  ;;  %1593 = vrot.lane.b32.xlu0 %v1591_v53, %s6672_s18  ;;  %v7154_v57 = vsel %vm5004_vm7, %v4770_v46, %v4941_v50 }
0x1078   :  { %v1780_v58 = vpop.f32.mrb[16].mxu0 }
0x1079   :  { %v5681_v8 = vpop.f32.mrb[17].mxu0 }
0x10e5   :  { %v1596_v59 = vpop.permute.xlu1 %1595  ;;  %v1594_v5 = vpop.permute.xlu0 %1593 }
0x10e6   :  { %v1600_v7 = vadd.f32 %v6864_v15, %v1596_v59  ;;  %v1599_v11 = vadd.f32 %v1594_v5, %v6866_v16 }
0x10e8   :  { %v1602_v12 = vadd.f32 %v1600_v7, %v6890_v48  ;;  %v1601_v10 = vadd.f32 %v1599_v11, %v6890_v48 }
0x10ea   :  { %6388 = vtanh.f32 %v1602_v12 }
0x10eb   :  { %6390 = vtanh.f32 %v1601_v10 }
0x10f4   :  { %v6389_v19 = vpop.eup %6388 }
0x10f5   :  { %v6391_v23 = vpop.eup %6390  ;;  %v1608_v24 = vrot.slane %v6389_v19, 1 }
0x10f6   :  { %v1607_v25 = vrot.slane %v6391_v23, 1 }
0x10f7   :  { %v1612_v26 = vsub.f32 %v7053_v9, %v1608_v24 }
0x10f8   :  { %v1611_v27 = vsub.f32 %v7051_v62, %v1607_v25 }
0x10f9   :  { %v1616_v29 = vrot.slane %v1612_v26, 7 }
0x10fa   :  { %v1615_v30 = vrot.slane %v1611_v27, 7 }
0x10fb   :  { %1619 = vrot.lane.b32.xlu1 %v1616_v29, %s6672_s18 }
0x10fc   :  { %1617 = vrot.lane.b32.xlu0 %v1615_v30, %s6672_s18 }
0x116d   :  { %v1620_v32 = vpop.permute.xlu1 %1619 }
0x116e   :  { %v1624_v34 = vmul.f32 %v7102_v6, %v1620_v32  ;;  %v1618_v35 = vpop.permute.xlu0 %1617 }
0x116f   :  { %v1623_v36 = vmul.f32 %v7097_v3, %v1618_v35 }
0x1170   :  { %1629 = vrot.lane.b32.xlu1 %v1624_v34, %s6672_s18 }
0x1171   :  { %1627 = vrot.lane.b32.xlu0 %v1623_v36, %s6672_s18 }
0x1174   :  { %1792 = vrot.lane.b32.xlu1 %v7095_v63, %s6681_s26 }
0x11e2   :  { %v1630_v62 = vpop.permute.xlu1 %1629 }
0x11e3   :  { %v7170_v9 = vadd.f32 %v6389_v19, %v1630_v62  ;;  %v1628_v37 = vpop.permute.xlu0 %1627 }
0x11e4   :  { %v7172_v38 = vadd.f32 %v6391_v23, %v1628_v37 }
0x11e5   :  { %v1638_v40 = vrot.slane %v7170_v9, 1  ;;  %v2056_v27 = vrot.slane %v7170_v9, 7 }
0x11e6   :  { %v1637_v6 = vrot.slane %v7172_v38, 2  ;;  %v1793_v18 = vpop.permute.xlu1 %1792  ;;  %v2055_v24 = vrot.slane %v7172_v38, 7 }
0x11e8   :  { %v1639_v41 = vsel %vm116_vm2, %v1638_v40, %v1637_v6 }
0x11e9   :  { %1640 = vrot.lane.b32.xlu0 %v1639_v41, %s6672_s18 }
0x125b   :  { %v1641_v3 = vpop.permute.xlu0 %1640 }
0x125c   :  { %5669 = vmatmul.mubr.msk.f32.vlgmr.msra.gmra.mrb[14].mxu1 %vm276_vm4, %v1641_v3 }
0x125d   :  { %6136 = vmatpush3.bf16.msra.mxu1 %v6945_v20  ;;  %5690 = vmatprep.mubr.msk.f32.mxu1 %vm6679_vm0, %v6680_v1 }
0x125e   :  { %6137 = vmatprep.subr.bf16.mxu1 %v6678_v0 }
0x1261   :  { %6139 = vmatpush3.bf16.msra.mxu1 %v6949_v21 }
0x1262   :  { %6146 = vmatprep.subr.bf16.mxu1 %v6678_v0 }
0x132f   :  { %v1710_v42 = vpop.f32.mrb[14].mxu1 }
0x1330   :  { %v1784_v44 = vadd.f32 %v1780_v58, %v1710_v42  ;;  %v5670_v28 = vpop.f32.mrb[15].mxu1 }
0x1332   :  { %v1785_v45 = vadd.f32 %v6956_v22, %v1784_v44 }
0x1334   :  { %v5148_v46 = vmul.f32 -1.442695, %v1785_v45 }
0x1336   :  { %6392 = vpow2.f32 %v5148_v46 }
0x1340   :  { %v6393_v47 = vpop.eup %6392 }
0x1341   :  { %v1789_v50 = vadd.f32 1.0, %v6393_v47 }
0x1343   :  { %6394 = vrcp.f32 %v1789_v50 }
0x134d   :  { %v6395_v51 = vpop.eup %6394 }
0x134e   :  { %v1795_v53 = vmul.f32 %v6395_v51, %v1793_v18 }
0x1350   :  { %1797 = vrot.lane.b32.xlu0 %v1795_v53, %s6681_s26 }
0x13c2   :  { %v1798_v8 = vpop.permute.xlu0 %1797 }
0x13c3   :  { %5691 = vmatmul.mubr.msk.f32.vlgmr.msra.gmra.mrb[16].mxu1 %vm276_vm4, %v1798_v8 }
0x13c4   :  { %6148 = vmatpush3.bf16.msra.mxu1 %v6823_v2  ;;  %5712 = vmatprep.mubr.msk.f32.mxu1 %vm6679_vm0, %v6680_v1 }
0x13c5   :  { %6149 = vmatprep.subr.bf16.mxu1 %v6678_v0 }
0x13c8   :  { %6151 = vmatpush3.bf16.msra.mxu1 %v6826_v4 }
0x13c9   :  { %6158 = vmatprep.subr.bf16.mxu1 %v6678_v0 }
0x13cb   :  { %5713 = vmatmul.mubr.msk.f32.vlgmr.msra.gmra.mrb[18].mxu1 %vm276_vm4, %v1641_v3 }
0x13cc   :  { %6160 = vmatpush3.bf16.msra.mxu1 %v6901_v56  ;;  %5734 = vmatprep.mubr.msk.f32.mxu1 %vm6679_vm0, %v6680_v1 }
0x13cd   :  { %6161 = vmatprep.subr.bf16.mxu1 %v6678_v0 }
0x13d0   :  { %6163 = vmatpush3.bf16.msra.mxu1 %v6916_v61 }
0x13d1   :  { %6170 = vmatprep.subr.bf16.mxu1 %v6678_v0 }
0x1496   :  { %v1867_v2 = vpop.f32.mrb[16].mxu1 }
0x1497   :  { %1872 = vrot.lane.b32.xlu1 %v1867_v2, %s6672_s18  ;;  %v5692_v58 = vpop.f32.mrb[17].mxu1 }
0x149e   :  { %v2030_v4 = vpop.f32.mrb[18].mxu1 }
0x149f   :  { %v2035_v59 = vrot.slane %v2030_v4, 5  ;;  %v2036_v5 = vrot.slane %v2030_v4, 6  ;;  %v5714_v7 = vpop.f32.mrb[19].mxu1 }
0x14a1   :  { %v2039_v11 = vadd.f32 %v2035_v59, %v6866_v16  ;;  %v2040_v56 = vadd.f32 %v6864_v15, %v2036_v5 }
0x14a3   :  { %v2041_v29 = vadd.f32 %v6871_v17, %v2039_v11  ;;  %v2042_v30 = vadd.f32 %v6871_v17, %v2040_v56 }
0x14a5   :  { %v5152_v32 = vmul.f32 -1.442695, %v2041_v29 }
0x1509   :  { %v1873_v12 = vpop.permute.xlu1 %1872 }
0x150a   :  { %v1875_v10 = vadd.f32 %v1873_v12, %v1710_v42 }
0x150c   :  { %v1876_v19 = vadd.f32 %v1875_v10, %v6981_v43 }
0x150e   :  { %6396 = vtanh.f32 %v1876_v19 }
0x150f   :  { %6398 = vpow2.f32 %v5152_v32 }
0x1518   :  { %v6397_v61 = vpop.eup %6396 }
0x1519   :  { %v1878_v23 = vsub.f32 %v7095_v63, %v6397_v61  ;;  %v5153_v63 = vmul.f32 -1.442695, %v2042_v30  ;;  %v6399_v34 = vpop.eup %6398 }
0x151a   :  { %v2049_v36 = vadd.f32 1.0, %v6399_v34 }
0x151b   :  { %1880 = vrot.lane.b32.xlu0 %v1878_v23, %s6672_s18  ;;  %6400 = vpow2.f32 %v5153_v63 }
0x151c   :  { %6402 = vrcp.f32 %v2049_v36 }
0x151f   :  { %2057 = vrot.lane.b32.xlu0 %v2055_v24, %s6681_s26 }
0x1525   :  { %v6401_v35 = vpop.eup %6400 }
0x1526   :  { %v2050_v62 = vadd.f32 1.0, %v6401_v35  ;;  %v7216_v41 = vpop.eup %6402 }
0x1528   :  { %6404 = vrcp.f32 %v2050_v62 }
0x1532   :  { %v7221_v17 = vpop.eup %6404 }
0x158d   :  { %v1881_v25 = vpop.permute.xlu0 %1880 }
0x158e   :  { %v1883_v26 = vmul.f32 %v6395_v51, %v1881_v25 }
0x1590   :  { %1885 = vrot.lane.b32.xlu1 %v1883_v26, %s6672_s18 }
0x1591   :  { %v2058_v37 = vpop.permute.xlu0 %2057 }
0x1592   :  { %v2063_v3 = vmul.f32 %v7216_v41, %v2058_v37 }
0x1594   :  { %2059 = vrot.lane.b32.xlu1 %v2056_v27, %s6681_s26  ;;  %v2067_v28 = vrot.slane %v2063_v3, 3 }
0x1602   :  { %v1886_v40 = vpop.permute.xlu1 %1885 }
0x1603   :  { %v7214_v6 = vadd.f32 %v6397_v61, %v1886_v40 }
0x1605   :  { %1890 = vrot.lane.b32.xlu0 %v7214_v6, %s6672_s18 }
0x1606   :  { %v2060_v42 = vpop.permute.xlu1 %2059 }
0x1607   :  { %v2064_v44 = vmul.f32 %v7221_v17, %v2060_v42 }
0x1609   :  { %v2068_v45 = vrot.slane %v2064_v44, 2 }
0x160b   :  { %v2069_v46 = vsel %vm116_vm2, %v2068_v45, %v2067_v28 }
0x160c   :  { %2070 = vrot.lane.b32.xlu1 %v2069_v46, %s6681_s26 }
0x1677   :  { %v1891_v47 = vpop.permute.xlu0 %1890 }
0x1678   :  { %5702 = vmatmul.mubr.msk.f32.vlgmr.msra.gmra.mrb[18].mxu0 %vm276_vm4, %v1891_v47 }
0x1679   :  { %6154 = vmatpush3.bf16.msra.mxu0 %v6856_v13  ;;  %5723 = vmatprep.mubr.msk.f32.mxu0 %vm6679_vm0, %v6680_v1 }
0x167a   :  { %6155 = vmatprep.subr.bf16.mxu0 %v6678_v0 }
0x167d   :  { %6157 = vmatpush3.bf16.msra.mxu0 %v6860_v14 }
0x167e   :  { %v2071_v50 = vpop.permute.xlu1 %2070  ;;  %6164 = vmatprep.subr.bf16.mxu0 %v6678_v0 }
0x1680   :  { %5724 = vmatmul.mubr.msk.f32.vlgmr.msra.gmra.mrb[20].mxu0 %vm276_vm4, %v2071_v50 }
0x1681   :  { %6166 = vmatpush3.bf16.msra.mxu0 %v6896_v55  ;;  %5745 = vmatprep.mubr.msk.f32.mxu0 %vm6679_vm0, %v6680_v1 }
0x1682   :  { %6167 = vmatprep.subr.bf16.mxu0 %v6678_v0 }
0x1685   :  { %6169 = vmatpush3.bf16.msra.mxu0 %v6911_v60 }
0x1686   :  { %6176 = vmatprep.subr.bf16.mxu0 %v6678_v0 }
0x1688   :  { %5746 = vmatmul.mubr.msk.f32.vlgmr.msra.gmra.mrb[22].mxu0 %vm276_vm4, %v1891_v47 }
0x1689   :  { %6178 = vmatpush3.bf16.msra.mxu0 %v6990_v49  ;;  %5767 = vmatprep.mubr.msk.f32.mxu0 %vm6679_vm0, %v6680_v1 }
0x168a   :  { %6179 = vmatprep.subr.bf16.mxu0 %v6678_v0 }
0x168d   :  { %6181 = vmatpush3.bf16.msra.mxu0 %v6998_v52 }
0x168e   :  { %6188 = vmatprep.subr.bf16.mxu0 %v6678_v0 }
0x174b   :  { %v1960_v13 = vpop.f32.mrb[18].mxu0 }
0x174c   :  { %v1961_v14 = vadd.f32 %v7131_v31, %v1960_v13  ;;  %v5703_v55 = vpop.f32.mrb[19].mxu0 }
0x174e   :  { %v4803_v60 = vrot.slane %v1961_v14, %v7135_v33 }
0x1750   :  { %v4804_v51 = vcombine.high %v4803_v60, %v4803_v60  ;;  %v4811_v18 = vrot.slane %v4803_v60, %v7135_v33  ;;  %v7307_v60 = vld [vmem:[%s7820_s3 + $0x10] sm:$0xff]  }
0x1752   :  { %v4818_v49 = vrot.slane %v4804_v51, %v7135_v33  ;;  %v4947_v53 = vrot.slane %v4811_v18, %v7140_v39  ;;  %v7316_v51 = vld [vmem:[%s7820_s3 + $0x18] sm:$0xff]  }
0x1753   :  { %v2140_v8 = vpop.f32.mrb[20].mxu0 }
0x1754   :  { %v4951_v2 = vrot.slane %v4818_v49, %v7140_v39  ;;  %v5725_v58 = vpop.f32.mrb[21].mxu0  ;;  %v2146_v4 = vrot.slane %v2140_v8, 6  ;;  %v2145_v59 = vrot.slane %v2140_v8, 5  ;;  %v7254_v5 = vsel %vm5007_vm8, %v7149_v54, %v4947_v53 }
0x1756   :  { %2149 = vrot.lane.b32.xlu1 %v2146_v4, %s6672_s18  ;;  %2147 = vrot.lane.b32.xlu0 %v2145_v59, %s6672_s18  ;;  %v7259_v7 = vsel %vm5007_vm8, %v7154_v57, %v4951_v2 }
0x175b   :  { %v2334_v11 = vpop.f32.mrb[22].mxu0 }
0x175c   :  { %v5747_v56 = vpop.f32.mrb[23].mxu0 }
0x17c8   :  { %v2150_v12 = vpop.permute.xlu1 %2149  ;;  %v2148_v10 = vpop.permute.xlu0 %2147 }
0x17c9   :  { %v2154_v19 = vadd.f32 %v6864_v15, %v2150_v12  ;;  %v2153_v61 = vadd.f32 %v2148_v10, %v6866_v16 }
0x17cb   :  { %v2156_v23 = vadd.f32 %v2154_v19, %v6890_v48  ;;  %v2155_v54 = vadd.f32 %v2153_v61, %v6890_v48 }
0x17cd   :  { %6406 = vtanh.f32 %v2156_v23 }
0x17ce   :  { %6408 = vtanh.f32 %v2155_v54 }
0x17d7   :  { %v6407_v24 = vpop.eup %6406 }
0x17d8   :  { %v6409_v25 = vpop.eup %6408  ;;  %v2162_v26 = vrot.slane %v6407_v24, 1 }
0x17d9   :  { %v2161_v27 = vrot.slane %v6409_v25, 1 }
0x17da   :  { %v2166_v57 = vsub.f32 %v7170_v9, %v2162_v26 }
0x17db   :  { %v2165_v29 = vsub.f32 %v7172_v38, %v2161_v27 }
0x17dc   :  { %v2170_v30 = vrot.slane %v2166_v57, 7 }
0x17dd   :  { %v2169_v32 = vrot.slane %v2165_v29, 7 }
0x17de   :  { %2173 = vrot.lane.b32.xlu1 %v2170_v30, %s6672_s18 }
0x17df   :  { %2171 = vrot.lane.b32.xlu0 %v2169_v32, %s6672_s18 }
0x1850   :  { %v2174_v63 = vpop.permute.xlu1 %2173 }
0x1851   :  { %v2178_v34 = vmul.f32 %v7221_v17, %v2174_v63  ;;  %v2172_v35 = vpop.permute.xlu0 %2171 }
0x1852   :  { %v2177_v36 = vmul.f32 %v7216_v41, %v2172_v35 }
0x1853   :  { %2183 = vrot.lane.b32.xlu1 %v2178_v34, %s6672_s18 }
0x1854   :  { %2181 = vrot.lane.b32.xlu0 %v2177_v36, %s6672_s18 }
0x1857   :  { %2346 = vrot.lane.b32.xlu1 %v7214_v6, %s6681_s26 }
0x18c5   :  { %v2184_v9 = vpop.permute.xlu1 %2183 }
0x18c6   :  { %v7275_v38 = vadd.f32 %v6407_v24, %v2184_v9  ;;  %v2182_v62 = vpop.permute.xlu0 %2181 }
0x18c7   :  { %v7277_v37 = vadd.f32 %v6409_v25, %v2182_v62  ;;  %v7334_v25 = vld [vmem:[%s7823_s6] ss:$0 sm:$0xff] }
0x18c8   :  { %v2192_v40 = vrot.slane %v7275_v38, 2  ;;  %v2610_v24 = vrot.slane %v7275_v38, 7 }
0x18c9   :  { %v2191_v3 = vrot.slane %v7277_v37, 3  ;;  %v2347_v13 = vpop.permute.xlu1 %2346  ;;  %v2609_v61 = vrot.slane %v7277_v37, 7 }
0x18cb   :  { %v2193_v17 = vsel %vm116_vm2, %v2192_v40, %v2191_v3 }
0x18cc   :  { %2194 = vrot.lane.b32.xlu0 %v2193_v17, %s6672_s18 }
0x193e   :  { %v2195_v41 = vpop.permute.xlu0 %2194 }
0x193f   :  { %5735 = vmatmul.mubr.msk.f32.vlgmr.msra.gmra.mrb[20].mxu1 %vm276_vm4, %v2195_v41 }
0x1940   :  { %6172 = vmatpush3.bf16.msra.mxu1 %v6945_v20  ;;  %5756 = vmatprep.mubr.msk.f32.mxu1 %vm6679_vm0, %v6680_v1 }
0x1941   :  { %6173 = vmatprep.subr.bf16.mxu1 %v6678_v0 }
0x1944   :  { %6175 = vmatpush3.bf16.msra.mxu1 %v6949_v21  ;;  %v7293_v21 = vld [vmem:[#allocation9] sm:$0xff]  }
0x1945   :  { %6182 = vmatprep.subr.bf16.mxu1 %v6678_v0 }
0x1a12   :  { %v2264_v42 = vpop.f32.mrb[20].mxu1 }
0x1a13   :  { %v2338_v44 = vadd.f32 %v2334_v11, %v2264_v42  ;;  %v5736_v28 = vpop.f32.mrb[21].mxu1 }
0x1a15   :  { %v2339_v45 = vadd.f32 %v6956_v22, %v2338_v44  ;;  %v7299_v22 = vld [vmem:[#allocation9 + $0x8] sm:$0xff]  }
0x1a17   :  { %v5157_v46 = vmul.f32 -1.442695, %v2339_v45  ;;  %v7351_v45 = vld [vmem:[#allocation11] sm:$0xff]  }
0x1a19   :  { %6410 = vpow2.f32 %v5157_v46  ;;  %v7357_v46 = vld [vmem:[#allocation11 + $0x8] sm:$0xff]  }
0x1a23   :  { %v6411_v47 = vpop.eup %6410 }
0x1a24   :  { %v2343_v50 = vadd.f32 1.0, %v6411_v47 }
0x1a26   :  { %6412 = vrcp.f32 %v2343_v50  ;;  %v7362_v50 = vld [vmem:[#allocation9 + $0x10] sm:$0xff]  }
0x1a30   :  { %v6413_v20 = vpop.eup %6412 }
0x1a31   :  { %v2349_v14 = vmul.f32 %v6413_v20, %v2347_v13  ;;  %v7376_v13 = vld [vmem:[%s7825_s8] sm:$0xff]  }
0x1a33   :  { %2351 = vrot.lane.b32.xlu0 %v2349_v14, %s6681_s26 }
0x1aa5   :  { %v2352_v55 = vpop.permute.xlu0 %2351 }
0x1aa6   :  { %5757 = vmatmul.mubr.msk.f32.vlgmr.msra.gmra.mrb[22].mxu1 %vm276_vm4, %v2352_v55 }
0x1aa7   :  { %6184 = vmatpush3.bf16.msra.mxu1 %v7293_v21  ;;  %5778 = vmatprep.mubr.msk.f32.mxu1 %vm6679_vm0, %v6680_v1 }
0x1aa8   :  { %6185 = vmatprep.subr.bf16.mxu1 %v6678_v0 }
0x1aab   :  { %6187 = vmatpush3.bf16.msra.mxu1 %v7299_v22 }
0x1aac   :  { %6194 = vmatprep.subr.bf16.mxu1 %v6678_v0 }
0x1aae   :  { %5779 = vmatmul.mubr.msk.f32.vlgmr.msra.gmra.mrb[24].mxu1 %vm276_vm4, %v2195_v41 }
0x1aaf   :  { %6196 = vmatpush3.bf16.msra.mxu1 %v7307_v60  ;;  %5800 = vmatprep.mubr.msk.f32.mxu1 %vm6679_vm0, %v6680_v1 }
0x1ab0   :  { %6197 = vmatprep.subr.bf16.mxu1 %v6678_v0 }
0x1ab3   :  { %6199 = vmatpush3.bf16.msra.mxu1 %v7316_v51 }
0x1ab4   :  { %6206 = vmatprep.subr.bf16.mxu1 %v6678_v0 }
0x1b79   :  { %v2421_v18 = vpop.f32.mrb[22].mxu1 }
0x1b7a   :  { %2426 = vrot.lane.b32.xlu1 %v2421_v18, %s6672_s18  ;;  %v5758_v49 = vpop.f32.mrb[23].mxu1 }
0x1b81   :  { %v2584_v53 = vpop.f32.mrb[24].mxu1 }
0x1b82   :  { %v2589_v8 = vrot.slane %v2584_v53, 4  ;;  %v2590_v2 = vrot.slane %v2584_v53, 5  ;;  %v5780_v58 = vpop.f32.mrb[25].mxu1 }
0x1b84   :  { %v2593_v4 = vadd.f32 %v2589_v8, %v6866_v16  ;;  %v2594_v59 = vadd.f32 %v6864_v15, %v2590_v2 }
0x1b86   :  { %v2596_v26 = vadd.f32 %v7334_v25, %v2594_v59 }
0x1b88   :  { %v5162_v57 = vmul.f32 -1.442695, %v2596_v26 }
0x1bec   :  { %v2427_v11 = vpop.permute.xlu1 %2426 }
0x1bed   :  { %v2429_v56 = vadd.f32 %v2427_v11, %v2264_v42 }
0x1bef   :  { %v2430_v12 = vadd.f32 %v2429_v56, %v6981_v43 }
0x1bf1   :  { %6414 = vtanh.f32 %v2430_v12 }
0x1bfb   :  { %v6415_v10 = vpop.eup %6414 }
0x1bfc   :  { %v2432_v19 = vsub.f32 %v7214_v6, %v6415_v10  ;;  %v2595_v6 = vadd.f32 %v7334_v25, %v2593_v4 }
0x1bfe   :  { %2434 = vrot.lane.b32.xlu0 %v2432_v19, %s6672_s18  ;;  %v5161_v27 = vmul.f32 -1.442695, %v2595_v6 }
0x1c00   :  { %6416 = vpow2.f32 %v5161_v27 }
0x1c01   :  { %6418 = vpow2.f32 %v5162_v57 }
0x1c02   :  { %2611 = vrot.lane.b32.xlu0 %v2609_v61, %s6681_s26 }
0x1c0a   :  { %v6417_v29 = vpop.eup %6416 }
0x1c0b   :  { %v6419_v30 = vpop.eup %6418  ;;  %v2603_v32 = vadd.f32 1.0, %v6417_v29 }
0x1c0c   :  { %v2604_v63 = vadd.f32 1.0, %v6419_v30 }
0x1c0d   :  { %6420 = vrcp.f32 %v2603_v32 }
0x1c0e   :  { %6422 = vrcp.f32 %v2604_v63 }
0x1c17   :  { %v7340_v9 = vpop.eup %6420 }
0x1c18   :  { %v7345_v40 = vpop.eup %6422 }
0x1c70   :  { %v2435_v23 = vpop.permute.xlu0 %2434 }
0x1c71   :  { %v2437_v54 = vmul.f32 %v6413_v20, %v2435_v23  ;;  %v7368_v20 = vld [vmem:[#allocation9 + $0x18] sm:$0xff]  }
0x1c73   :  { %2439 = vrot.lane.b32.xlu1 %v2437_v54, %s6672_s18 }
0x1c74   :  { %v2612_v34 = vpop.permute.xlu0 %2611 }
0x1c75   :  { %v2617_v62 = vmul.f32 %v7340_v9, %v2612_v34 }
0x1c77   :  { %2613 = vrot.lane.b32.xlu1 %v2610_v24, %s6681_s26  ;;  %v2621_v41 = vrot.slane %v2617_v62, 4 }
0x1ce5   :  { %v2440_v35 = vpop.permute.xlu1 %2439 }
0x1ce6   :  { %v7338_v36 = vadd.f32 %v6415_v10, %v2440_v35 }
0x1ce8   :  { %2444 = vrot.lane.b32.xlu0 %v7338_v36, %s6672_s18 }
0x1ce9   :  { %v2614_v3 = vpop.permute.xlu1 %2613 }
0x1cea   :  { %v2618_v17 = vmul.f32 %v7345_v40, %v2614_v3 }
0x1cec   :  { %v2622_v42 = vrot.slane %v2618_v17, 3 }
0x1cee   :  { %v2623_v44 = vsel %vm116_vm2, %v2622_v42, %v2621_v41 }
0x1cef   :  { %2624 = vrot.lane.b32.xlu1 %v2623_v44, %s6681_s26 }
0x1d5a   :  { %v2445_v28 = vpop.permute.xlu0 %2444 }
0x1d5b   :  { %5768 = vmatmul.mubr.msk.f32.vlgmr.msra.gmra.mrb[24].mxu0 %vm276_vm4, %v2445_v28 }
0x1d5c   :  { %6190 = vmatpush3.bf16.msra.mxu0 %v7351_v45  ;;  %5789 = vmatprep.mubr.msk.f32.mxu0 %vm6679_vm0, %v6680_v1 }
0x1d5d   :  { %6191 = vmatprep.subr.bf16.mxu0 %v6678_v0 }
0x1d60   :  { %6193 = vmatpush3.bf16.msra.mxu0 %v7357_v46 }
0x1d61   :  { %v2625_v47 = vpop.permute.xlu1 %2624  ;;  %6200 = vmatprep.subr.bf16.mxu0 %v6678_v0 }
0x1d63   :  { %5790 = vmatmul.mubr.msk.f32.vlgmr.msra.gmra.mrb[26].mxu0 %vm276_vm4, %v2625_v47  ;;  %v7421_v47 = vld [vmem:[#allocation11 + $0x10] sm:$0xff]  }
0x1d64   :  { %6202 = vmatpush3.bf16.msra.mxu0 %v7362_v50  ;;  %5811 = vmatprep.mubr.msk.f32.mxu0 %vm6679_vm0, %v6680_v1 }
0x1d65   :  { %6203 = vmatprep.subr.bf16.mxu0 %v6678_v0 }
0x1d68   :  { %6205 = vmatpush3.bf16.msra.mxu0 %v7368_v20 }
0x1d69   :  { %6212 = vmatprep.subr.bf16.mxu0 %v6678_v0 }
0x1d6b   :  { %5812 = vmatmul.mubr.msk.f32.vlgmr.msra.gmra.mrb[28].mxu0 %vm276_vm4, %v2445_v28 }
0x1d6c   :  { %6214 = vmatpush3.bf16.msra.mxu0 %v7376_v13  ;;  %5833 = vmatprep.mubr.msk.f32.mxu0 %vm6679_vm0, %v6680_v1 }
0x1d6d   :  { %6215 = vmatprep.subr.bf16.mxu0 %v6678_v0 }
0x1d70   :  { %6217 = vmatpush3.bf16.msra.mxu0 %v6998_v52 }
0x1d71   :  { %6224 = vmatprep.subr.bf16.mxu0 %v6678_v0 }
0x1e2e   :  { %v2514_v14 = vpop.f32.mrb[24].mxu0 }
0x1e2f   :  { %v2515_v55 = vadd.f32 %v7131_v31, %v2514_v14  ;;  %v5769_v18 = vpop.f32.mrb[25].mxu0  ;;  %v7427_v14 = vld [vmem:[#allocation11 + $0x18] sm:$0xff]  }
0x1e31   :  { %v4826_v49 = vrot.slane %v2515_v55, %v7135_v33 }
0x1e33   :  { %v4827_v53 = vcombine.high %v4826_v49, %v4826_v49  ;;  %v4834_v8 = vrot.slane %v4826_v49, %v7135_v33 }
0x1e35   :  { %v4841_v2 = vrot.slane %v4827_v53, %v7135_v33  ;;  %v4957_v58 = vrot.slane %v4834_v8, %v7140_v39  ;;  %v7434_v53 = vld [vmem:[%s7823_s6 + $0x1] ss:$0 sm:$0xff] }
0x1e36   :  { %v2694_v4 = vpop.f32.mrb[26].mxu0 }
0x1e37   :  { %v4961_v59 = vrot.slane %v4841_v2, %v7140_v39  ;;  %v5791_v52 = vpop.f32.mrb[27].mxu0  ;;  %v2700_v11 = vrot.slane %v2694_v4, 5  ;;  %v2699_v56 = vrot.slane %v2694_v4, 4  ;;  %v7391_v12 = vsel %vm5010_vm9, %v7254_v5, %v4957_v58 }
0x1e39   :  { %2703 = vrot.lane.b32.xlu1 %v2700_v11, %s6672_s18  ;;  %2701 = vrot.lane.b32.xlu0 %v2699_v56, %s6672_s18  ;;  %v7396_v10 = vsel %vm5010_vm9, %v7259_v7, %v4961_v59 }
0x1e3e   :  { %v2888_v19 = vpop.f32.mrb[28].mxu0 }
0x1e3f   :  { %v5813_v61 = vpop.f32.mrb[29].mxu0 }
0x1eab   :  { %v2704_v23 = vpop.permute.xlu1 %2703  ;;  %v2702_v54 = vpop.permute.xlu0 %2701 }
0x1eac   :  { %v2708_v24 = vadd.f32 %v6864_v15, %v2704_v23  ;;  %v2707_v6 = vadd.f32 %v2702_v54, %v6866_v16 }
0x1eae   :  { %v2710_v26 = vadd.f32 %v2708_v24, %v6890_v48  ;;  %v2709_v5 = vadd.f32 %v2707_v6, %v6890_v48 }
0x1eb0   :  { %6424 = vtanh.f32 %v2710_v26 }
0x1eb1   :  { %6426 = vtanh.f32 %v2709_v5 }
0x1eba   :  { %v6425_v27 = vpop.eup %6424 }
0x1ebb   :  { %v6427_v57 = vpop.eup %6426  ;;  %v2716_v29 = vrot.slane %v6425_v27, 1 }
0x1ebc   :  { %v2715_v30 = vrot.slane %v6427_v57, 1 }
0x1ebd   :  { %v2720_v7 = vsub.f32 %v7275_v38, %v2716_v29 }
0x1ebe   :  { %v2719_v32 = vsub.f32 %v7277_v37, %v2715_v30 }
0x1ebf   :  { %v2724_v63 = vrot.slane %v2720_v7, 7 }
0x1ec0   :  { %v2723_v34 = vrot.slane %v2719_v32, 7 }
0x1ec1   :  { %2727 = vrot.lane.b32.xlu1 %v2724_v63, %s6672_s18 }
0x1ec2   :  { %2725 = vrot.lane.b32.xlu0 %v2723_v34, %s6672_s18 }
0x1f33   :  { %v2728_v35 = vpop.permute.xlu1 %2727 }
0x1f34   :  { %v2732_v62 = vmul.f32 %v7345_v40, %v2728_v35  ;;  %v2726_v3 = vpop.permute.xlu0 %2725 }
0x1f35   :  { %v2731_v17 = vmul.f32 %v7340_v9, %v2726_v3 }
0x1f36   :  { %2737 = vrot.lane.b32.xlu1 %v2732_v62, %s6672_s18 }
0x1f37   :  { %2735 = vrot.lane.b32.xlu0 %v2731_v17, %s6672_s18 }
0x1f3a   :  { %2900 = vrot.lane.b32.xlu1 %v7338_v36, %s6681_s26 }
0x1fa8   :  { %v2738_v38 = vpop.permute.xlu1 %2737 }
0x1fa9   :  { %v7412_v37 = vadd.f32 %v6425_v27, %v2738_v38  ;;  %v2736_v41 = vpop.permute.xlu0 %2735 }
0x1faa   :  { %v7414_v42 = vadd.f32 %v6427_v57, %v2736_v41 }
0x1fab   :  { %v2746_v44 = vrot.slane %v7412_v37, 3  ;;  %v3164_v35 = vrot.slane %v7412_v37, 7 }
0x1fac   :  { %v2745_v40 = vrot.slane %v7414_v42, 4  ;;  %v2901_v52 = vpop.permute.xlu1 %2900  ;;  %v3163_v32 = vrot.slane %v7414_v42, 7 }
0x1fae   :  { %v2747_v28 = vsel %vm116_vm2, %v2746_v44, %v2745_v40 }
0x1faf   :  { %2748 = vrot.lane.b32.xlu0 %v2747_v28, %s6672_s18 }
0x2021   :  { %v2749_v9 = vpop.permute.xlu0 %2748 }
0x2022   :  { %5801 = vmatmul.mubr.msk.f32.vlgmr.msra.gmra.mrb[26].mxu1 %vm276_vm4, %v2749_v9 }
0x2023   :  { %6208 = vmatpush3.bf16.msra.mxu1 %v7421_v47  ;;  %5822 = vmatprep.mubr.msk.f32.mxu1 %vm6679_vm0, %v6680_v1 }
0x2024   :  { %6209 = vmatprep.subr.bf16.mxu1 %v6678_v0 }
0x2027   :  { %6211 = vmatpush3.bf16.msra.mxu1 %v7427_v14 }
0x2028   :  { %6218 = vmatprep.subr.bf16.mxu1 %v6678_v0 }
0x20f5   :  { %v2818_v55 = vpop.f32.mrb[26].mxu1 }
0x20f6   :  { %v2892_v18 = vadd.f32 %v2888_v19, %v2818_v55  ;;  %v5802_v49 = vpop.f32.mrb[27].mxu1 }
0x20f8   :  { %v2893_v8 = vadd.f32 %v7434_v53, %v2892_v18 }
0x20fa   :  { %v5166_v2 = vmul.f32 -1.442695, %v2893_v8 }
0x20fc   :  { %6428 = vpow2.f32 %v5166_v2 }
0x2106   :  { %v6429_v58 = vpop.eup %6428 }
0x2107   :  { %v2897_v4 = vadd.f32 1.0, %v6429_v58 }
0x2109   :  { %6430 = vrcp.f32 %v2897_v4 }
0x2113   :  { %v6431_v59 = vpop.eup %6430 }
0x2114   :  { %v2903_v11 = vmul.f32 %v6431_v59, %v2901_v52 }
0x2116   :  { %2905 = vrot.lane.b32.xlu0 %v2903_v11, %s6681_s26 }
0x2188   :  { %v2906_v56 = vpop.permute.xlu0 %2905 }
0x2189   :  { %5823 = vmatmul.mubr.msk.f32.vlgmr.msra.gmra.mrb[28].mxu1 %vm276_vm4, %v2906_v56 }
0x218a   :  { %6220 = vmatpush3.bf16.msra.mxu1 %v7293_v21  ;;  %5844 = vmatprep.mubr.msk.f32.mxu1 %vm6679_vm0, %v6680_v1 }
0x218b   :  { %6221 = vmatprep.subr.bf16.mxu1 %v6678_v0 }
0x218e   :  { %6223 = vmatpush3.bf16.msra.mxu1 %v7299_v22 }
0x218f   :  { %6230 = vmatprep.subr.bf16.mxu1 %v6678_v0 }
0x2191   :  { %5845 = vmatmul.mubr.msk.f32.vlgmr.msra.gmra.mrb[30].mxu1 %vm276_vm4, %v2749_v9 }
0x2192   :  { %6232 = vmatpush3.bf16.msra.mxu1 %v7307_v60  ;;  %5866 = vmatprep.mubr.msk.f32.mxu1 %vm6679_vm0, %v6680_v1 }
0x2193   :  { %6233 = vmatprep.subr.bf16.mxu1 %v6678_v0 }
0x2196   :  { %6235 = vmatpush3.bf16.msra.mxu1 %v7316_v51 }
0x2197   :  { %6242 = vmatprep.subr.bf16.mxu1 %v6678_v0 }
0x225c   :  { %v2975_v19 = vpop.f32.mrb[28].mxu1 }
0x225d   :  { %2980 = vrot.lane.b32.xlu1 %v2975_v19, %s6672_s18  ;;  %v5824_v61 = vpop.f32.mrb[29].mxu1  ;;  %v7499_v19 = vld [vmem:[%s7825_s8 + $0x8] sm:$0xff]  }
0x2264   :  { %v3138_v23 = vpop.f32.mrb[30].mxu1 }
0x2265   :  { %v3143_v54 = vrot.slane %v3138_v23, 3  ;;  %v3144_v24 = vrot.slane %v3138_v23, 4  ;;  %v5846_v6 = vpop.f32.mrb[31].mxu1 }
0x2267   :  { %v3147_v26 = vadd.f32 %v3143_v54, %v6866_v16  ;;  %v3148_v5 = vadd.f32 %v6864_v15, %v3144_v24 }
0x2269   :  { %v3149_v62 = vadd.f32 %v7334_v25, %v3147_v26  ;;  %v3150_v3 = vadd.f32 %v7334_v25, %v3148_v5 }
0x226b   :  { %v5170_v17 = vmul.f32 -1.442695, %v3149_v62 }
0x22cf   :  { %v2981_v27 = vpop.permute.xlu1 %2980 }
0x22d0   :  { %v2983_v57 = vadd.f32 %v2981_v27, %v2818_v55 }
0x22d2   :  { %v2984_v29 = vadd.f32 %v2983_v57, %v6981_v43 }
0x22d4   :  { %6432 = vtanh.f32 %v2984_v29 }
0x22d5   :  { %6434 = vpow2.f32 %v5170_v17 }
0x22de   :  { %v6433_v30 = vpop.eup %6432 }
0x22df   :  { %v2986_v7 = vsub.f32 %v7338_v36, %v6433_v30  ;;  %v5171_v36 = vmul.f32 -1.442695, %v3150_v3  ;;  %v6435_v38 = vpop.eup %6434 }
0x22e0   :  { %v3157_v44 = vadd.f32 1.0, %v6435_v38 }
0x22e1   :  { %2988 = vrot.lane.b32.xlu0 %v2986_v7, %s6672_s18  ;;  %6436 = vpow2.f32 %v5171_v36 }
0x22e2   :  { %6438 = vrcp.f32 %v3157_v44 }
0x22e5   :  { %3165 = vrot.lane.b32.xlu0 %v3163_v32, %s6681_s26 }
0x22eb   :  { %v6437_v41 = vpop.eup %6436 }
0x22ec   :  { %v3158_v40 = vadd.f32 1.0, %v6437_v41  ;;  %v7467_v18 = vpop.eup %6438 }
0x22ee   :  { %6440 = vrcp.f32 %v3158_v40 }
0x22f8   :  { %v7472_v8 = vpop.eup %6440 }
0x2353   :  { %v2989_v63 = vpop.permute.xlu0 %2988 }
0x2354   :  { %v2991_v34 = vmul.f32 %v6431_v59, %v2989_v63 }
0x2356   :  { %2993 = vrot.lane.b32.xlu1 %v2991_v34, %s6672_s18 }
0x2357   :  { %v3166_v28 = vpop.permute.xlu0 %3165 }
0x2358   :  { %v3171_v49 = vmul.f32 %v7467_v18, %v3166_v28 }
0x235a   :  { %3167 = vrot.lane.b32.xlu1 %v3164_v35, %s6681_s26  ;;  %v3175_v4 = vrot.slane %v3171_v49, 5 }
0x23c8   :  { %v2994_v9 = vpop.permute.xlu1 %2993 }
0x23c9   :  { %v7465_v55 = vadd.f32 %v6433_v30, %v2994_v9 }
0x23cb   :  { %2998 = vrot.lane.b32.xlu0 %v7465_v55, %s6672_s18 }
0x23cc   :  { %v3168_v2 = vpop.permute.xlu1 %3167 }
0x23cd   :  { %v3172_v58 = vmul.f32 %v7472_v8, %v3168_v2 }
0x23cf   :  { %v3176_v59 = vrot.slane %v3172_v58, 4 }
0x23d1   :  { %v3177_v52 = vsel %vm116_vm2, %v3176_v59, %v3175_v4 }
0x23d2   :  { %3178 = vrot.lane.b32.xlu1 %v3177_v52, %s6681_s26 }
0x243d   :  { %v2999_v11 = vpop.permute.xlu0 %2998 }
0x243e   :  { %5834 = vmatmul.mubr.msk.f32.vlgmr.msra.gmra.mrb[30].mxu0 %vm276_vm4, %v2999_v11 }
0x243f   :  { %6226 = vmatpush3.bf16.msra.mxu0 %v7351_v45  ;;  %5855 = vmatprep.mubr.msk.f32.mxu0 %vm6679_vm0, %v6680_v1 }
0x2440   :  { %6227 = vmatprep.subr.bf16.mxu0 %v6678_v0 }
0x2443   :  { %6229 = vmatpush3.bf16.msra.mxu0 %v7357_v46 }
0x2444   :  { %v3179_v56 = vpop.permute.xlu1 %3178  ;;  %6236 = vmatprep.subr.bf16.mxu0 %v6678_v0 }
0x2446   :  { %5856 = vmatmul.mubr.msk.f32.vlgmr.msra.gmra.mrb[32].mxu0 %vm276_vm4, %v3179_v56 }
0x2447   :  { %6238 = vmatpush3.bf16.msra.mxu0 %v7362_v50  ;;  %5877 = vmatprep.mubr.msk.f32.mxu0 %vm6679_vm0, %v6680_v1 }
0x2448   :  { %6239 = vmatprep.subr.bf16.mxu0 %v6678_v0 }
0x244b   :  { %6241 = vmatpush3.bf16.msra.mxu0 %v7368_v20 }
0x244c   :  { %6248 = vmatprep.subr.bf16.mxu0 %v6678_v0 }
0x244e   :  { %5878 = vmatmul.mubr.msk.f32.vlgmr.msra.gmra.mrb[34].mxu0 %vm276_vm4, %v2999_v11 }
0x244f   :  { %6250 = vmatpush3.bf16.msra.mxu0 %v7376_v13  ;;  %5899 = vmatprep.mubr.msk.f32.mxu0 %vm6679_vm0, %v6680_v1 }
0x2450   :  { %6251 = vmatprep.subr.bf16.mxu0 %v6678_v0 }
0x2453   :  { %6253 = vmatpush3.bf16.msra.mxu0 %v7499_v19 }
0x2454   :  { %6260 = vmatprep.subr.bf16.mxu0 %v6678_v0 }
0x2511   :  { %v3068_v61 = vpop.f32.mrb[30].mxu0 }
0x2512   :  { %v3069_v23 = vadd.f32 %v7131_v31, %v3068_v61  ;;  %v5835_v54 = vpop.f32.mrb[31].mxu0 }
0x2514   :  { %v4849_v24 = vrot.slane %v3069_v23, %v7135_v33 }
0x2516   :  { %v4850_v6 = vcombine.high %v4849_v24, %v4849_v24  ;;  %v4857_v26 = vrot.slane %v4849_v24, %v7135_v33 }
0x2518   :  { %v4864_v5 = vrot.slane %v4850_v6, %v7135_v33  ;;  %v4967_v27 = vrot.slane %v4857_v26, %v7140_v39 }
0x2519   :  { %v3248_v57 = vpop.f32.mrb[32].mxu0 }
0x251a   :  { %v4971_v29 = vrot.slane %v4864_v5, %v7140_v39  ;;  %v5857_v30 = vpop.f32.mrb[33].mxu0  ;;  %v3254_v7 = vrot.slane %v3248_v57, 4  ;;  %v3253_v32 = vrot.slane %v3248_v57, 3  ;;  %v7510_v63 = vsel %vm5013_vm10, %v7391_v12, %v4967_v27 }
0x251c   :  { %3257 = vrot.lane.b32.xlu1 %v3254_v7, %s6672_s18  ;;  %3255 = vrot.lane.b32.xlu0 %v3253_v32, %s6672_s18  ;;  %v7515_v31 = vsel %vm5013_vm10, %v7396_v10, %v4971_v29 }
0x2521   :  { %v3442_v34 = vpop.f32.mrb[34].mxu0 }
0x2522   :  { %v5879_v35 = vpop.f32.mrb[35].mxu0 }
0x258e   :  { %v3258_v62 = vpop.permute.xlu1 %3257  ;;  %v3256_v3 = vpop.permute.xlu0 %3255 }
0x258f   :  { %v3262_v17 = vadd.f32 %v6864_v15, %v3258_v62  ;;  %v3261_v36 = vadd.f32 %v3256_v3, %v6866_v16 }
0x2591   :  { %v3264_v38 = vadd.f32 %v3262_v17, %v6890_v48  ;;  %v3263_v12 = vadd.f32 %v3261_v36, %v6890_v48 }
0x2593   :  { %6442 = vtanh.f32 %v3264_v38 }
0x2594   :  { %6444 = vtanh.f32 %v3263_v12 }
0x259d   :  { %v6443_v41 = vpop.eup %6442 }
0x259e   :  { %v6445_v44 = vpop.eup %6444  ;;  %v3270_v40 = vrot.slane %v6443_v41, 1 }
0x259f   :  { %v3269_v28 = vrot.slane %v6445_v44, 1 }
0x25a0   :  { %v3274_v10 = vsub.f32 %v7412_v37, %v3270_v40 }
0x25a1   :  { %v3273_v9 = vsub.f32 %v7414_v42, %v3269_v28 }
0x25a2   :  { %v3278_v49 = vrot.slane %v3274_v10, 7 }
0x25a3   :  { %v3277_v2 = vrot.slane %v3273_v9, 7 }
0x25a4   :  { %3281 = vrot.lane.b32.xlu1 %v3278_v49, %s6672_s18 }
0x25a5   :  { %3279 = vrot.lane.b32.xlu0 %v3277_v2, %s6672_s18 }
0x2616   :  { %v3282_v58 = vpop.permute.xlu1 %3281 }
0x2617   :  { %v3286_v4 = vmul.f32 %v7472_v8, %v3282_v58  ;;  %v3280_v59 = vpop.permute.xlu0 %3279 }
0x2618   :  { %v3285_v52 = vmul.f32 %v7467_v18, %v3280_v59 }
0x2619   :  { %3291 = vrot.lane.b32.xlu1 %v3286_v4, %s6672_s18 }
0x261a   :  { %3289 = vrot.lane.b32.xlu0 %v3285_v52, %s6672_s18 }
0x261d   :  { %3454 = vrot.lane.b32.xlu1 %v7465_v55, %s6681_s26 }
0x268b   :  { %v3292_v37 = vpop.permute.xlu1 %3291 }
0x268c   :  { %v7531_v42 = vadd.f32 %v6443_v41, %v3292_v37  ;;  %v3290_v11 = vpop.permute.xlu0 %3289 }
0x268d   :  { %v7533_v56 = vadd.f32 %v6445_v44, %v3290_v11 }
0x268e   :  { %v3300_v61 = vrot.slane %v7531_v42, 4  ;;  %v3718_v58 = vrot.slane %v7531_v42, 7 }
0x268f   :  { %v3299_v8 = vrot.slane %v7533_v56, 5  ;;  %v3455_v30 = vpop.permute.xlu1 %3454  ;;  %v3717_v9 = vrot.slane %v7533_v56, 7 }
0x2691   :  { %v3301_v23 = vsel %vm116_vm2, %v3300_v61, %v3299_v8 }
0x2692   :  { %3302 = vrot.lane.b32.xlu0 %v3301_v23, %s6672_s18 }
0x2704   :  { %v3303_v18 = vpop.permute.xlu0 %3302 }
0x2705   :  { %5867 = vmatmul.mubr.msk.f32.vlgmr.msra.gmra.mrb[32].mxu1 %vm276_vm4, %v3303_v18 }
0x2706   :  { %6244 = vmatpush3.bf16.msra.mxu1 %v7421_v47  ;;  %5888 = vmatprep.mubr.msk.f32.mxu1 %vm6679_vm0, %v6680_v1 }
0x2707   :  { %6245 = vmatprep.subr.bf16.mxu1 %v6678_v0 }
0x270a   :  { %6247 = vmatpush3.bf16.msra.mxu1 %v7427_v14 }
0x270b   :  { %6254 = vmatprep.subr.bf16.mxu1 %v6678_v0 }
0x27d8   :  { %v3372_v54 = vpop.f32.mrb[32].mxu1 }
0x27d9   :  { %v3446_v24 = vadd.f32 %v3442_v34, %v3372_v54  ;;  %v5868_v6 = vpop.f32.mrb[33].mxu1 }
0x27db   :  { %v3447_v26 = vadd.f32 %v7434_v53, %v3446_v24 }
0x27dd   :  { %v5175_v5 = vmul.f32 -1.442695, %v3447_v26 }
0x27df   :  { %6446 = vpow2.f32 %v5175_v5 }
0x27e9   :  { %v6447_v27 = vpop.eup %6446 }
0x27ea   :  { %v3451_v57 = vadd.f32 1.0, %v6447_v27 }
0x27ec   :  { %6448 = vrcp.f32 %v3451_v57 }
0x27f6   :  { %v6449_v29 = vpop.eup %6448 }
0x27f7   :  { %v3457_v7 = vmul.f32 %v6449_v29, %v3455_v30 }
0x27f9   :  { %3459 = vrot.lane.b32.xlu0 %v3457_v7, %s6681_s26 }
0x286b   :  { %v3460_v32 = vpop.permute.xlu0 %3459 }
0x286c   :  { %5889 = vmatmul.mubr.msk.f32.vlgmr.msra.gmra.mrb[34].mxu1 %vm276_vm4, %v3460_v32 }
0x286d   :  { %6256 = vmatpush3.bf16.msra.mxu1 %v7293_v21  ;;  %5910 = vmatprep.mubr.msk.f32.mxu1 %vm6679_vm0, %v6680_v1 }
0x286e   :  { %6257 = vmatprep.subr.bf16.mxu1 %v6678_v0 }
0x2871   :  { %6259 = vmatpush3.bf16.msra.mxu1 %v7299_v22 }
0x2872   :  { %6266 = vmatprep.subr.bf16.mxu1 %v6678_v0 }
0x2874   :  { %5911 = vmatmul.mubr.msk.f32.vlgmr.msra.gmra.mrb[36].mxu1 %vm276_vm4, %v3303_v18 }
0x2875   :  { %6268 = vmatpush3.bf16.msra.mxu1 %v7307_v60  ;;  %5932 = vmatprep.mubr.msk.f32.mxu1 %vm6679_vm0, %v6680_v1 }
0x2876   :  { %6269 = vmatprep.subr.bf16.mxu1 %v6678_v0 }
0x2879   :  { %6271 = vmatpush3.bf16.msra.mxu1 %v7316_v51 }
0x287a   :  { %6278 = vmatprep.subr.bf16.mxu1 %v6678_v0 }
0x293f   :  { %v3529_v34 = vpop.f32.mrb[34].mxu1 }
0x2940   :  { %3534 = vrot.lane.b32.xlu1 %v3529_v34, %s6672_s18  ;;  %v5890_v35 = vpop.f32.mrb[35].mxu1 }
0x2941   :  { %v7611_v35 = vld [vmem:[%s7826_s9] ss:$0 sm:$0xff]  ;;  %s6683_s9 = smov [#allocation13]  }
0x2947   :  { %v3692_v62 = vpop.f32.mrb[36].mxu1 }
0x2948   :  { %v3697_v3 = vrot.slane %v3692_v62, 2  ;;  %v3698_v17 = vrot.slane %v3692_v62, 3  ;;  %v5912_v36 = vpop.f32.mrb[37].mxu1 }
0x294a   :  { %v3701_v38 = vadd.f32 %v3697_v3, %v6866_v16  ;;  %v3702_v12 = vadd.f32 %v6864_v15, %v3698_v17 }
0x294c   :  { %v3703_v4 = vadd.f32 %v7334_v25, %v3701_v38  ;;  %v3704_v59 = vadd.f32 %v7334_v25, %v3702_v12 }
0x294e   :  { %v5179_v52 = vmul.f32 -1.442695, %v3703_v4 }
0x29b2   :  { %v3535_v41 = vpop.permute.xlu1 %3534 }
0x29b3   :  { %v3537_v44 = vadd.f32 %v3535_v41, %v3372_v54 }
0x29b5   :  { %v3538_v40 = vadd.f32 %v3537_v44, %v6981_v43 }
0x29b7   :  { %6450 = vtanh.f32 %v3538_v40 }
0x29b8   :  { %6452 = vpow2.f32 %v5179_v52 }
0x29c1   :  { %v6451_v28 = vpop.eup %6450 }
0x29c2   :  { %v3540_v10 = vsub.f32 %v7465_v55, %v6451_v28  ;;  %v5180_v55 = vmul.f32 -1.442695, %v3704_v59  ;;  %v6453_v37 = vpop.eup %6452 }
0x29c3   :  { %v3711_v61 = vadd.f32 1.0, %v6453_v37 }
0x29c4   :  { %3542 = vrot.lane.b32.xlu0 %v3540_v10, %s6672_s18  ;;  %6454 = vpow2.f32 %v5180_v55 }
0x29c5   :  { %6456 = vrcp.f32 %v3711_v61 }
0x29c8   :  { %3719 = vrot.lane.b32.xlu0 %v3717_v9, %s6681_s26 }
0x29ce   :  { %v6455_v11 = vpop.eup %6454 }
0x29cf   :  { %v3712_v8 = vadd.f32 1.0, %v6455_v11  ;;  %v7577_v24 = vpop.eup %6456 }
0x29d1   :  { %6458 = vrcp.f32 %v3712_v8 }
0x29db   :  { %v7582_v26 = vpop.eup %6458 }
0x2a36   :  { %v3543_v49 = vpop.permute.xlu0 %3542 }
0x2a37   :  { %v3545_v2 = vmul.f32 %v6449_v29, %v3543_v49 }
0x2a39   :  { %3547 = vrot.lane.b32.xlu1 %v3545_v2, %s6672_s18 }
0x2a3a   :  { %v3720_v23 = vpop.permute.xlu0 %3719 }
0x2a3b   :  { %v3725_v6 = vmul.f32 %v7577_v24, %v3720_v23 }
0x2a3d   :  { %3721 = vrot.lane.b32.xlu1 %v3718_v58, %s6681_s26  ;;  %v3729_v57 = vrot.slane %v3725_v6, 6 }
0x2aab   :  { %v3548_v18 = vpop.permute.xlu1 %3547 }
0x2aac   :  { %v7575_v54 = vadd.f32 %v6451_v28, %v3548_v18 }
0x2aae   :  { %3552 = vrot.lane.b32.xlu0 %v7575_v54, %s6672_s18 }
0x2aaf   :  { %v3722_v5 = vpop.permute.xlu1 %3721 }
0x2ab0   :  { %v3726_v27 = vmul.f32 %v7582_v26, %v3722_v5 }
0x2ab2   :  { %v3730_v29 = vrot.slane %v3726_v27, 5 }
0x2ab4   :  { %v3731_v30 = vsel %vm116_vm2, %v3730_v29, %v3729_v57 }
0x2ab5   :  { %3732 = vrot.lane.b32.xlu1 %v3731_v30, %s6681_s26 }
0x2b20   :  { %v3553_v7 = vpop.permute.xlu0 %3552 }
0x2b21   :  { %5900 = vmatmul.mubr.msk.f32.vlgmr.msra.gmra.mrb[36].mxu0 %vm276_vm4, %v3553_v7 }
0x2b22   :  { %6262 = vmatpush3.bf16.msra.mxu0 %v7351_v45  ;;  %5921 = vmatprep.mubr.msk.f32.mxu0 %vm6679_vm0, %v6680_v1 }
0x2b23   :  { %6263 = vmatprep.subr.bf16.mxu0 %v6678_v0 }
0x2b26   :  { %6265 = vmatpush3.bf16.msra.mxu0 %v7357_v46 }
0x2b27   :  { %v3733_v32 = vpop.permute.xlu1 %3732  ;;  %6272 = vmatprep.subr.bf16.mxu0 %v6678_v0 }
0x2b29   :  { %5922 = vmatmul.mubr.msk.f32.vlgmr.msra.gmra.mrb[38].mxu0 %vm276_vm4, %v3733_v32 }
0x2b2a   :  { %6274 = vmatpush3.bf16.msra.mxu0 %v7362_v50  ;;  %5943 = vmatprep.mubr.msk.f32.mxu0 %vm6679_vm0, %v6680_v1 }
0x2b2b   :  { %6275 = vmatprep.subr.bf16.mxu0 %v6678_v0 }
0x2b2e   :  { %6277 = vmatpush3.bf16.msra.mxu0 %v7368_v20 }
0x2b2f   :  { %6284 = vmatprep.subr.bf16.mxu0 %v6678_v0 }
0x2b31   :  { %5944 = vmatmul.mubr.msk.f32.vlgmr.msra.gmra.mrb[40].mxu0 %vm276_vm4, %v3553_v7 }
0x2b32   :  { %6286 = vmatpush3.bf16.msra.mxu0 %v7376_v13  ;;  %5965 = vmatprep.mubr.msk.f32.mxu0 %vm6679_vm0, %v6680_v1 }
0x2b33   :  { %6287 = vmatprep.subr.bf16.mxu0 %v6678_v0 }
0x2b36   :  { %6289 = vmatpush3.bf16.msra.mxu0 %v7499_v19 }
0x2b37   :  { %6296 = vmatprep.subr.bf16.mxu0 %v6678_v0 }
0x2bf4   :  { %v3622_v34 = vpop.f32.mrb[36].mxu0 }
0x2bf5   :  { %v3623_v62 = vadd.f32 %v7611_v35, %v3622_v34  ;;  %v5901_v3 = vpop.f32.mrb[37].mxu0 }
0x2bf7   :  { %v4872_v17 = vrot.slane %v3623_v62, %v7135_v33 }
0x2bf9   :  { %v4873_v36 = vcombine.high %v4872_v17, %v4872_v17  ;;  %v4880_v38 = vrot.slane %v4872_v17, %v7135_v33 }
0x2bfb   :  { %v4887_v12 = vrot.slane %v4873_v36, %v7135_v33  ;;  %v4977_v41 = vrot.slane %v4880_v38, %v7140_v39 }
0x2bfc   :  { %v3802_v44 = vpop.f32.mrb[38].mxu0 }
0x2bfd   :  { %v4981_v40 = vrot.slane %v4887_v12, %v7140_v39  ;;  %v3807_v28 = vrot.slane %v3802_v44, 2  ;;  %v3808_v10 = vrot.slane %v3802_v44, 3  ;;  %v5923_v9 = vpop.f32.mrb[39].mxu0  ;;  %v7620_v49 = vsel %vm5016_vm11, %v7510_v63, %v4977_v41 }
0x2bff   :  { %3811 = vrot.lane.b32.xlu1 %v3808_v10, %s6672_s18  ;;  %3809 = vrot.lane.b32.xlu0 %v3807_v28, %s6672_s18  ;;  %v7625_v2 = vsel %vm5016_vm11, %v7515_v31, %v4981_v40 }
0x2c04   :  { %v3996_v58 = vpop.f32.mrb[40].mxu0 }
0x2c05   :  { %v5945_v4 = vpop.f32.mrb[41].mxu0 }
0x2c71   :  { %v3812_v59 = vpop.permute.xlu1 %3811  ;;  %v3810_v52 = vpop.permute.xlu0 %3809 }
0x2c72   :  { %v3816_v55 = vadd.f32 %v6864_v15, %v3812_v59  ;;  %v3815_v37 = vadd.f32 %v3810_v52, %v6866_v16 }
0x2c74   :  { %v3818_v11 = vadd.f32 %v3816_v55, %v6890_v48  ;;  %v3817_v63 = vadd.f32 %v3815_v37, %v6890_v48 }
0x2c76   :  { %6460 = vtanh.f32 %v3818_v11 }
0x2c77   :  { %6462 = vtanh.f32 %v3817_v63 }
0x2c80   :  { %v6461_v61 = vpop.eup %6460 }
0x2c81   :  { %v6463_v8 = vpop.eup %6462  ;;  %v3824_v23 = vrot.slane %v6461_v61, 1 }
0x2c82   :  { %v3823_v18 = vrot.slane %v6463_v8, 1 }
0x2c83   :  { %v3828_v31 = vsub.f32 %v7531_v42, %v3824_v23 }
0x2c84   :  { %v3827_v6 = vsub.f32 %v7533_v56, %v3823_v18 }
0x2c85   :  { %v3832_v5 = vrot.slane %v3828_v31, 7 }
0x2c86   :  { %v3831_v27 = vrot.slane %v3827_v6, 7 }
0x2c87   :  { %3835 = vrot.lane.b32.xlu1 %v3832_v5, %s6672_s18 }
0x2c88   :  { %3833 = vrot.lane.b32.xlu0 %v3831_v27, %s6672_s18 }
0x2cf9   :  { %v3836_v57 = vpop.permute.xlu1 %3835 }
0x2cfa   :  { %v3840_v29 = vmul.f32 %v7582_v26, %v3836_v57  ;;  %v3834_v30 = vpop.permute.xlu0 %3833 }
0x2cfb   :  { %v3839_v7 = vmul.f32 %v7577_v24, %v3834_v30 }
0x2cfc   :  { %3845 = vrot.lane.b32.xlu1 %v3840_v29, %s6672_s18 }
0x2cfd   :  { %3843 = vrot.lane.b32.xlu0 %v3839_v7, %s6672_s18 }
0x2d00   :  { %4008 = vrot.lane.b32.xlu1 %v7575_v54, %s6681_s26 }
0x2d6e   :  { %v3846_v42 = vpop.permute.xlu1 %3845 }
0x2d6f   :  { %v7641_v56 = vadd.f32 %v6461_v61, %v3846_v42  ;;  %v3844_v32 = vpop.permute.xlu0 %3843 }
0x2d70   :  { %v7643_v34 = vadd.f32 %v6463_v8, %v3844_v32 }
0x2d71   :  { %v3854_v62 = vrot.slane %v7641_v56, 5  ;;  %v4272_v6 = vrot.slane %v7641_v56, 7 }
0x2d72   :  { %v3853_v26 = vrot.slane %v7643_v34, 6  ;;  %v4009_v10 = vpop.permute.xlu1 %4008  ;;  %v4271_v23 = vrot.slane %v7643_v34, 7 }
0x2d74   :  { %v3855_v3 = vsel %vm116_vm2, %v3854_v62, %v3853_v26 }
0x2d75   :  { %3856 = vrot.lane.b32.xlu0 %v3855_v3, %s6672_s18 }
0x2de7   :  { %v3857_v24 = vpop.permute.xlu0 %3856 }
0x2de8   :  { %5933 = vmatmul.mubr.msk.f32.vlgmr.msra.gmra.mrb[38].mxu1 %vm276_vm4, %v3857_v24 }
0x2de9   :  { %6280 = vmatpush3.bf16.msra.mxu1 %v7421_v47  ;;  %5954 = vmatprep.mubr.msk.f32.mxu1 %vm6679_vm0, %v6680_v1 }
0x2dea   :  { %6281 = vmatprep.subr.bf16.mxu1 %v6678_v0 }
0x2ded   :  { %6283 = vmatpush3.bf16.msra.mxu1 %v7427_v14 }
0x2dee   :  { %6290 = vmatprep.subr.bf16.mxu1 %v6678_v0 }
0x2ebb   :  { %v3926_v17 = vpop.f32.mrb[38].mxu1 }
0x2ebc   :  { %v4000_v36 = vadd.f32 %v3996_v58, %v3926_v17  ;;  %v5934_v38 = vpop.f32.mrb[39].mxu1 }
0x2ebe   :  { %v4001_v12 = vadd.f32 %v7434_v53, %v4000_v36 }
0x2ec0   :  { %v5184_v41 = vmul.f32 -1.442695, %v4001_v12 }
0x2ec2   :  { %6464 = vpow2.f32 %v5184_v41 }
0x2ecc   :  { %v6465_v44 = vpop.eup %6464 }
0x2ecd   :  { %v4005_v40 = vadd.f32 1.0, %v6465_v44 }
0x2ecf   :  { %6466 = vrcp.f32 %v4005_v40 }
0x2ed9   :  { %v6467_v28 = vpop.eup %6466 }
0x2eda   :  { %v4011_v9 = vmul.f32 %v6467_v28, %v4009_v10 }
0x2edc   :  { %4013 = vrot.lane.b32.xlu0 %v4011_v9, %s6681_s26 }
0x2f4e   :  { %v4014_v4 = vpop.permute.xlu0 %4013 }
0x2f4f   :  { %5955 = vmatmul.mubr.msk.f32.vlgmr.msra.gmra.mrb[40].mxu1 %vm276_vm4, %v4014_v4 }
0x2f50   :  { %6292 = vmatpush3.bf16.msra.mxu1 %v7293_v21  ;;  %5976 = vmatprep.mubr.msk.f32.mxu1 %vm6679_vm0, %v6680_v1 }
0x2f51   :  { %6293 = vmatprep.subr.bf16.mxu1 %v6678_v0 }
0x2f54   :  { %6295 = vmatpush3.bf16.msra.mxu1 %v7299_v22 }
0x2f55   :  { %6302 = vmatprep.subr.bf16.mxu1 %v6678_v0 }
0x2f57   :  { %5977 = vmatmul.mubr.msk.f32.vlgmr.msra.gmra.mrb[42].mxu1 %vm276_vm4, %v3857_v24 }
0x2f58   :  { %6304 = vmatpush3.bf16.msra.mxu1 %v7307_v60  ;;  %5998 = vmatprep.mubr.msk.f32.mxu1 %vm6679_vm0, %v6680_v1 }
0x2f59   :  { %6305 = vmatprep.subr.bf16.mxu1 %v6678_v0 }
0x2f5c   :  { %6307 = vmatpush3.bf16.msra.mxu1 %v7316_v51 }
0x2f5d   :  { %6314 = vmatprep.subr.bf16.mxu1 %v6678_v0 }
0x3022   :  { %v4083_v21 = vpop.f32.mrb[40].mxu1 }
0x3023   :  { %4088 = vrot.lane.b32.xlu1 %v4083_v21, %s6672_s18  ;;  %v5956_v58 = vpop.f32.mrb[41].mxu1 }
0x302a   :  { %v4246_v22 = vpop.f32.mrb[42].mxu1 }
0x302b   :  { %v4251_v59 = vrot.slane %v4246_v22, 1  ;;  %v4252_v52 = vrot.slane %v4246_v22, 2  ;;  %v5978_v55 = vpop.f32.mrb[43].mxu1 }
0x302d   :  { %v4255_v37 = vadd.f32 %v4251_v59, %v6866_v16  ;;  %v4256_v60 = vadd.f32 %v6864_v15, %v4252_v52 }
0x302f   :  { %v4257_v5 = vadd.f32 %v7334_v25, %v4255_v37  ;;  %v4258_v27 = vadd.f32 %v7334_v25, %v4256_v60 }
0x3031   :  { %v5188_v57 = vmul.f32 -1.442695, %v4257_v5 }
0x3095   :  { %v4089_v11 = vpop.permute.xlu1 %4088 }
0x3096   :  { %v4091_v63 = vadd.f32 %v4089_v11, %v3926_v17 }
0x3098   :  { %v4092_v61 = vadd.f32 %v4091_v63, %v6981_v43 }
0x309a   :  { %6468 = vtanh.f32 %v4092_v61 }
0x309b   :  { %6470 = vpow2.f32 %v5188_v57 }
0x30a4   :  { %v6469_v51 = vpop.eup %6468 }
0x30a5   :  { %v4094_v8 = vsub.f32 %v7575_v54, %v6469_v51  ;;  %v5189_v54 = vmul.f32 -1.442695, %v4258_v27  ;;  %v6471_v29 = vpop.eup %6470 }
0x30a6   :  { %v4265_v7 = vadd.f32 1.0, %v6471_v29 }
0x30a7   :  { %4096 = vrot.lane.b32.xlu0 %v4094_v8, %s6672_s18  ;;  %6472 = vpow2.f32 %v5189_v54 }
0x30a8   :  { %6474 = vrcp.f32 %v4265_v7 }
0x30ab   :  { %4273 = vrot.lane.b32.xlu0 %v4271_v23, %s6681_s26 }
0x30b1   :  { %v6473_v30 = vpop.eup %6472 }
0x30b2   :  { %v4266_v42 = vadd.f32 1.0, %v6473_v30  ;;  %v7687_v3 = vpop.eup %6474 }
0x30b4   :  { %6476 = vrcp.f32 %v4266_v42 }
0x30be   :  { %v7692_v25 = vpop.eup %6476 }
0x3119   :  { %v4097_v18 = vpop.permute.xlu0 %4096 }
0x311a   :  { %v4099_v31 = vmul.f32 %v6467_v28, %v4097_v18 }
0x311c   :  { %4101 = vrot.lane.b32.xlu1 %v4099_v31, %s6672_s18 }
0x311d   :  { %v4274_v32 = vpop.permute.xlu0 %4273 }
0x311e   :  { %v4279_v24 = vmul.f32 %v7687_v3, %v4274_v32 }
0x3120   :  { %4275 = vrot.lane.b32.xlu1 %v4272_v6, %s6681_s26  ;;  %v4283_v38 = vrot.slane %v4279_v24, 7 }
0x318e   :  { %v4102_v62 = vpop.permute.xlu1 %4101 }
0x318f   :  { %v7685_v26 = vadd.f32 %v6469_v51, %v4102_v62 }
0x3191   :  { %4106 = vrot.lane.b32.xlu0 %v7685_v26, %s6672_s18 }
0x3192   :  { %v4276_v17 = vpop.permute.xlu1 %4275 }
0x3193   :  { %v4280_v36 = vmul.f32 %v7692_v25, %v4276_v17 }
0x3195   :  { %v4284_v12 = vrot.slane %v4280_v36, 6 }
0x3197   :  { %v4285_v41 = vsel %vm116_vm2, %v4284_v12, %v4283_v38 }
0x3198   :  { %4286 = vrot.lane.b32.xlu1 %v4285_v41, %s6681_s26 }
0x3203   :  { %v4107_v44 = vpop.permute.xlu0 %4106 }
0x3204   :  { %5966 = vmatmul.mubr.msk.f32.vlgmr.msra.gmra.mrb[42].mxu0 %vm276_vm4, %v4107_v44 }
0x3205   :  { %6298 = vmatpush3.bf16.msra.mxu0 %v7351_v45  ;;  %5987 = vmatprep.mubr.msk.f32.mxu0 %vm6679_vm0, %v6680_v1 }
0x3206   :  { %6299 = vmatprep.subr.bf16.mxu0 %v6678_v0 }
0x3209   :  { %6301 = vmatpush3.bf16.msra.mxu0 %v7357_v46 }
0x320a   :  { %v4287_v40 = vpop.permute.xlu1 %4286  ;;  %6308 = vmatprep.subr.bf16.mxu0 %v6678_v0 }
0x320c   :  { %5988 = vmatmul.mubr.msk.f32.vlgmr.msra.gmra.mrb[44].mxu0 %vm276_vm4, %v4287_v40 }
0x320d   :  { %6310 = vmatpush3.bf16.msra.mxu0 %v7362_v50  ;;  %6009 = vmatprep.mubr.msk.f32.mxu0 %vm6679_vm0, %v6680_v1 }
0x320e   :  { %6311 = vmatprep.subr.bf16.mxu0 %v6678_v0 }
0x3211   :  { %6313 = vmatpush3.bf16.msra.mxu0 %v7368_v20 }
0x3212   :  { %6320 = vmatprep.subr.bf16.mxu0 %v6678_v0 }
0x3214   :  { %6010 = vmatmul.mubr.msk.f32.vlgmr.msra.gmra.mrb[46].mxu0 %vm276_vm4, %v4107_v44 }
0x3215   :  { %6322 = vmatpush3.bf16.msra.mxu0 %v7376_v13  ;;  %6031 = vmatprep.mubr.msk.f32.mxu0 %vm6679_vm0, %v6680_v1 }
0x3216   :  { %6323 = vmatprep.subr.bf16.mxu0 %v6678_v0 }
0x3219   :  { %6325 = vmatpush3.bf16.msra.mxu0 %v7499_v19 }
0x32d7   :  { %v4176_v45 = vpop.f32.mrb[42].mxu0 }
0x32d8   :  { %v4177_v46 = vadd.f32 %v7611_v35, %v4176_v45  ;;  %v5967_v50 = vpop.f32.mrb[43].mxu0 }
0x32da   :  { %v4895_v28 = vrot.slane %v4177_v46, %v7135_v33 }
0x32dc   :  { %v4896_v20 = vcombine.high %v4895_v28, %v4895_v28  ;;  %v4903_v10 = vrot.slane %v4895_v28, %v7135_v33 }
0x32de   :  { %v4910_v9 = vrot.slane %v4896_v20, %v7135_v33  ;;  %v4987_v13 = vrot.slane %v4903_v10, %v7140_v39 }
0x32df   :  { %v4356_v4 = vpop.f32.mrb[44].mxu0 }
0x32e0   :  { %v4991_v21 = vrot.slane %v4910_v9, %v7140_v39  ;;  %v4361_v58 = vrot.slane %v4356_v4, 1  ;;  %v4362_v22 = vrot.slane %v4356_v4, 2  ;;  %v5989_v19 = vpop.f32.mrb[45].mxu0  ;;  %v7724_v59 = vsel %vm5019_vm12, %v7620_v49, %v4987_v13 }
0x32e2   :  { %4365 = vrot.lane.b32.xlu1 %v4362_v22, %s6672_s18  ;;  %4363 = vrot.lane.b32.xlu0 %v4361_v58, %s6672_s18  ;;  %v7729_v52 = vsel %vm5019_vm12, %v7625_v2, %v4991_v21 }
0x32e7   :  { %v4550_v55 = vpop.f32.mrb[46].mxu0 }
0x32e8   :  { %v6011_v37 = vpop.f32.mrb[47].mxu0 }
0x3354   :  { %v4366_v60 = vpop.permute.xlu1 %4365  ;;  %v4364_v11 = vpop.permute.xlu0 %4363 }
0x3355   :  { %v4370_v63 = vadd.f32 %v6864_v15, %v4366_v60  ;;  %v4369_v61 = vadd.f32 %v4364_v11, %v6866_v16 }
0x3357   :  { %v4372_v51 = vadd.f32 %v4370_v63, %v6890_v48  ;;  %v4371_v49 = vadd.f32 %v4369_v61, %v6890_v48 }
0x3359   :  { %6478 = vtanh.f32 %v4372_v51 }
0x335a   :  { %6480 = vtanh.f32 %v4371_v49 }
0x3363   :  { %v6479_v8 = vpop.eup %6478 }
0x3364   :  { %v6481_v23 = vpop.eup %6480  ;;  %v4378_v18 = vrot.slane %v6479_v8, 1 }
0x3365   :  { %v4377_v31 = vrot.slane %v6481_v23, 1 }
0x3366   :  { %v4382_v2 = vsub.f32 %v7641_v56, %v4378_v18 }
0x3367   :  { %v4381_v6 = vsub.f32 %v7643_v34, %v4377_v31 }
0x3368   :  { %v4386_v5 = vrot.slane %v4382_v2, 7 }
0x3369   :  { %v4385_v27 = vrot.slane %v4381_v6, 7 }
0x336a   :  { %4389 = vrot.lane.b32.xlu1 %v4386_v5, %s6672_s18 }
0x336b   :  { %4387 = vrot.lane.b32.xlu0 %v4385_v27, %s6672_s18 }
0x33dc   :  { %v4390_v15 = vpop.permute.xlu1 %4389 }
0x33dd   :  { %v4394_v16 = vmul.f32 %v7692_v25, %v4390_v15  ;;  %v4388_v48 = vpop.permute.xlu0 %4387 }
0x33de   :  { %v4393_v57 = vmul.f32 %v7687_v3, %v4388_v48 }
0x33df   :  { %4399 = vrot.lane.b32.xlu1 %v4394_v16, %s6672_s18 }
0x33e0   :  { %4397 = vrot.lane.b32.xlu0 %v4393_v57, %s6672_s18 }
0x33e3   :  { %4562 = vrot.lane.b32.xlu1 %v7685_v26, %s6681_s26 }
0x3451   :  { %v4400_v56 = vpop.permute.xlu1 %4399 }
0x3452   :  { %v4404_v34 = vadd.f32 %v6479_v8, %v4400_v56  ;;  %v4398_v54 = vpop.permute.xlu0 %4397 }
0x3453   :  { %v4403_v29 = vadd.f32 %v6481_v23, %v4398_v54 }
0x3454   :  { %v4408_v30 = vrot.slane %v4404_v34, 6 }
0x3455   :  { %v4407_v7 = vrot.slane %v4403_v29, 7  ;;  %v4563_v41 = vpop.permute.xlu1 %4562 }
0x3457   :  { %v4409_v42 = vsel %vm116_vm2, %v4408_v30, %v4407_v7 }
0x3458   :  { %4410 = vrot.lane.b32.xlu0 %v4409_v42, %s6672_s18 }
0x34ca   :  { %v4411_v32 = vpop.permute.xlu0 %4410 }
0x34cb   :  { %5999 = vmatmul.mubr.msk.f32.vlgmr.msra.gmra.mrb[44].mxu1 %vm276_vm4, %v4411_v32 }
0x34cc   :  { %6316 = vmatpush3.bf16.msra.mxu1 %v7421_v47  ;;  %6020 = vmatprep.mubr.msk.f32.mxu1 %vm6679_vm0, %v6680_v1 }
0x34cd   :  { %6317 = vmatprep.subr.bf16.mxu1 %v6678_v0 }
0x34d0   :  { %6319 = vmatpush3.bf16.msra.mxu1 %v7427_v14 }
0x359e   :  { %v4480_v62 = vpop.f32.mrb[44].mxu1 }
0x359f   :  { %v4554_v3 = vadd.f32 %v4550_v55, %v4480_v62  ;;  %v6000_v24 = vpop.f32.mrb[45].mxu1 }
0x35a1   :  { %v4555_v25 = vadd.f32 %v7434_v53, %v4554_v3 }
0x35a3   :  { %v5193_v17 = vmul.f32 -1.442695, %v4555_v25 }
0x35a5   :  { %6482 = vpow2.f32 %v5193_v17 }
0x35af   :  { %v6483_v36 = vpop.eup %6482 }
0x35b0   :  { %v4559_v38 = vadd.f32 1.0, %v6483_v36 }
0x35b2   :  { %6484 = vrcp.f32 %v4559_v38 }
0x35bc   :  { %v6485_v12 = vpop.eup %6484 }
0x35bd   :  { %v4565_v47 = vmul.f32 %v6485_v12, %v4563_v41 }
0x35bf   :  { %4567 = vrot.lane.b32.xlu0 %v4565_v47, %s6681_s26  ;;  %s5093_s26 = sshll.u32 %s6683_s9, 4  ;;  %s5094_s26 = int_to_ptr.vmem [resolvable:$true] %s5093_s26 }
0x35c0   :  { %p6618_p13 = scmp.lt.s32.totalorder %s5094_s26, %s5094_s26 }
0x3631   :  { %v4568_v1 = vpop.permute.xlu0 %4567 }
0x3632   :  { %6021 = vmatmul.mubr.msk.f32.vlgmr.msra.gmra.mrb[46].mxu1 %vm276_vm4, %v4568_v1 }
0x3705   :  { %v4637_v0 = vpop.f32.mrb[46].mxu1 }
0x3706   :  { %4642 = vrot.lane.b32.xlu1 %v4637_v0, %s6672_s18  ;;  %v6022_v14 = vpop.f32.mrb[47].mxu1 }
0x3778   :  { %v4643_v44 = vpop.permute.xlu1 %4642 }
0x3779   :  { %v4645_v40 = vadd.f32 %v4643_v44, %v4480_v62 }
0x377b   :  { %v4646_v53 = vadd.f32 %v4645_v40, %v6981_v43 }
0x377d   :  { %6486 = vtanh.f32 %v4646_v53 }
0x3787   :  { %v6487_v45 = vpop.eup %6486 }
0x3788   :  { %v4648_v46 = vsub.f32 %v7685_v26, %v6487_v45  ;;  %v4734_v26 = vrot.slane %v4404_v34, 7 }
0x378a   :  { %4650 = vrot.lane.b32.xlu0 %v4648_v46, %s6672_s18 }
0x37fc   :  { %v4651_v50 = vpop.permute.xlu0 %4650 }
0x37fd   :  { %v4653_v28 = vmul.f32 %v6485_v12, %v4651_v50 }
0x37ff   :  { %4655 = vrot.lane.b32.xlu1 %v4653_v28, %s6672_s18 }
0x3871   :  { %v4656_v20 = vpop.permute.xlu1 %4655 }
0x3872   :  { %v4658_v10 = vadd.f32 %v6487_v45, %v4656_v20 }
0x3874   :  { %v5036_v9 = vrot.slane %v4658_v10, %v7135_v33  ;;  %4660 = vrot.lane.b32.xlu0 %v4658_v10, %s6672_s18 }
0x3876   :  { %v5037_v13 = vcombine.high %v5036_v9, %v5036_v9  ;;  %v5044_v4 = vrot.slane %v5036_v9, %v7135_v33 }
0x3878   :  { %v5051_v43 = vrot.slane %v5037_v13, %v7135_v33  ;;  %v5057_v21 = vrot.slane %v5044_v4, %v7140_v39 }
0x387a   :  { %v5064_v58 = vsel %vm5004_vm7, %v4407_v7, %v5057_v21  ;;  %v5061_v22 = vrot.slane %v5051_v43, %v7140_v39 }
0x387b   :  { %5068 = vrot.lane.b32.xlu1 %v5064_v58, %s6672_s18 }
0x387c   :  { %v5065_v19 = vsel %vm5004_vm7, %v4734_v26, %v5061_v22 }
0x387d   :  { %5070 = vrot.lane.b32.xlu0 %v5065_v19, %s6672_s18 }
0x387f   :  { %4735 = vrot.lane.b32.xlu1 %v4403_v29, %s6672_s18 }
0x3881   :  { %4737 = vrot.lane.b32.xlu0 %v4734_v26, %s6672_s18  ;;  %s6613_s18 = scalar_lea.vmem %s5094_s26, 64 }
0x3882   :  { %p6614_p12 = scmp.ne.s32.totalorder %s5094_s26, %s6613_s18  ;;  %p6619_p0 = scmp.lt.s32.totalorder %s6613_s18, %s6613_s18 }
0x3884   :  { %p6620_p1 = por %p6619_p0, %p6618_p13 }
0x3886   :  { %p6621_p2 = pnand %p6620_p1, %p6614_p12 }
0x38e6   :  { %v4661_v55 = vpop.permute.xlu0 %4660 }
0x38e7   :  { %4747 = vst.msk [vmem:[#allocation2 + $0x2] sm:$0x3] %vm119_vm3, %v4661_v55  ;;  %6032 = vmatmul.mubr.msk.f32.vlgmr.msra.gmra.mrb[48].mxu0 %vm276_vm4, %v4661_v55 }
0x38ed   :  { %v5069_v37 = vpop.permute.xlu1 %5068 }
0x38ee   :  { %5074 = vst.msk [vmem:[#allocation13] sm:$0x3] %vm119_vm3, %v5069_v37 }
0x38ef   :  { %v5071_v60 = vpop.permute.xlu0 %5070 }
0x38f0   :  { %5075 = vst.msk [vmem:[#allocation13 + $0x2] sm:$0x3] %vm119_vm3, %v5071_v60 }
0x38f1   :  { %v4736_v11 = vpop.permute.xlu1 %4735 }
0x38f2   :  { %4742 = vst.msk [vmem:[#allocation2 - $0x7] sm:$0x80] %vm4741_vm13, %v4736_v11 }
0x38f3   :  { %v4738_v63 = vpop.permute.xlu0 %4737 }
0x38f4   :  { %4744 = vst.msk [vmem:[#allocation2 + $0x1] sm:$0x1] %vm4743_vm14, %v4738_v63 }
0x38f5   :  { %6624 = shalt.err (!%p6621_p2)
}
0x38f6   :  { %s6625_s7 = scalar_lea.hbm %s7828_s11, 64 }
0x38f7   :  { %p6626_p3 = scmp.ne.s32.totalorder %s7828_s11, %s6625_s7  ;;  %p6629_p4 = scmp.lt.u32.totalorder %s6625_s7, %s7828_s11 }
0x38f9   :  { %p6631_p5 = pnand %p6629_p4, %p6626_p3 }
0x38fb   :  { %6634 = shalt.err (!%p6631_p5)
}
0x38fc   :  { %5099 = dma.vmem_to_hbm [thread:$0]  %s5094_s26, 64, %s7828_s11, [#allocation14], %s6668_s27, %s6668_s27, %s6669_s28   ;;  %vm5022_vm15 = vcmask 1046528  }
0x38fd   :  { %s6684_s5 = smov [#allocation12]  }
0x38fe   :  { %s5081_s24 = sshll.u32 %s6684_s5, 4  ;;  %s5082_s24 = int_to_ptr.vmem [resolvable:$true] %s5081_s24 }
0x38ff   :  { %s6635_s11 = scalar_lea.vmem %s5082_s24, 256  ;;  %p6640_p7 = scmp.lt.s32.totalorder %s5082_s24, %s5082_s24 }
0x3900   :  { %p6636_p6 = scmp.ne.s32.totalorder %s5082_s24, %s6635_s11  ;;  %p6641_p8 = scmp.lt.s32.totalorder %s6635_s11, %s6635_s11 }
0x3902   :  { %p6642_p9 = por %p6641_p8, %p6640_p7 }
0x3904   :  { %p6643_p10 = pnand %p6642_p9, %p6636_p6 }
0x39ba   :  { %v4730_v61 = vpop.f32.mrb[48].mxu0 }
0x39bb   :  { %v4731_v51 = vadd.f32 %v7611_v35, %v4730_v61  ;;  %v6033_v49 = vpop.f32.mrb[49].mxu0 }
0x39bd   :  { %v4918_v8 = vrot.slane %v4731_v51, %v7135_v33 }
0x39bf   :  { %v4919_v23 = vcombine.high %v4918_v8, %v4918_v8  ;;  %v4926_v18 = vrot.slane %v4918_v8, %v7135_v33 }
0x39c1   :  { %v4933_v31 = vrot.slane %v4919_v23, %v7135_v33  ;;  %v4997_v2 = vrot.slane %v4926_v18, %v7140_v39 }
0x39c3   :  { %v5001_v6 = vrot.slane %v4933_v31, %v7140_v39  ;;  %v5023_v5 = vsel %vm5022_vm15, %v7724_v59, %v4997_v2 }
0x39c4   :  { %5025 = vst.msk [vmem:[#allocation12] sm:$0xff] %vm194_vm1, %v5023_v5 }
0x39c5   :  { %v5024_v35 = vsel %vm5022_vm15, %v7729_v52, %v5001_v6 }
0x39c6   :  { %5026 = vst.msk [vmem:[#allocation12 + $0x8] sm:$0xff] %vm194_vm1, %v5024_v35 }
0x39c7   :  { %6646 = shalt.err (!%p6643_p10)
}
0x39c8   :  { %s6647_s16 = scalar_lea.hbm %s7827_s10, 256 }
0x39c9   :  { %p6648_p11 = scmp.ne.s32.totalorder %s7827_s10, %s6647_s16  ;;  %p6651_p12 = scmp.lt.u32.totalorder %s6647_s16, %s7827_s10 }
0x39cb   :  { %p6653_p13 = pnand %p6651_p12, %p6648_p11 }
0x39cd   :  { %6656 = shalt.err (!%p6653_p13)
}
0x39ce   :  { %5087 = dma.vmem_to_hbm [thread:$0]  %s5082_s24, 256, %s7827_s10, [#allocation5], %s6674_s4, %s6674_s4, %s6675_s13  }
0x39cf   :  { %6663 = dma.done.wait [#allocation5], 256  }
0x39d0   :  { %6664 = vsyncadd [#allocation5], 4294967040 }
0x39d1   :  { %6665 = dma.done.wait [#allocation14], 64  }
0x39d2   :  { %6666 = vsyncadd [#allocation14], 4294967232 }
0x39d3   :  { %5106 = vsyncpa [#allocation4], 1 }
0x39d4   :  { %5107 = vsyncpa [#allocation7], 1 }
0x39d5   :  { %5108 = vsyncpa [#allocation10], 1 }
0x39d6   :  { %5109 = vsyncpa [#allocation5], 1 }
0x39d7   :  { %5110 = vsyncpa [#allocation14], 1 }

</bundles_post_ra>
